<compile_context>
chip_gen: v6e
topology: v6e:2x2x1
jax: 0.10.0
libtpu: 0.0.40
codegen_flags: <defaults>
</compile_context>

<pallas_src>
import functools

import jax
import jax.numpy as jnp
from jax.experimental import pallas as pl
from jax.experimental.pallas import tpu as pltpu


# ----------------------------------------------------------------------------
# Kernel 1: fused 1x1x1 convs (branch1x1 + 3x3-reduce + 5x5-reduce) + BN + ReLU
# ----------------------------------------------------------------------------
def matmul_bn_relu_kernel(x_ref, w_ref, scale_ref, shift_ref, o_ref):
    acc = jnp.dot(x_ref[...], w_ref[...], preferred_element_type=jnp.float32)
    y = acc * scale_ref[...] + shift_ref[...]
    o_ref[...] = jnp.maximum(y, 0.0).astype(o_ref.dtype)


def fused_matmul_bn_relu(x2d, w, scale, shift, tm=1024):
    """Row-tiled (x @ w) * scale + shift -> ReLU, bf16 in / bf16 out."""
    m, kdim = x2d.shape
    nc = w.shape[1]
    # At least two row tiles when possible so both v7x TensorCores get work.
    tm = min(tm, max(8, ((pl.cdiv(m, 2) + 7) // 8) * 8))
    mp = pl.cdiv(m, tm) * tm
    if mp != m:
        x2d = jnp.pad(x2d, ((0, mp - m), (0, 0)))
    out = pl.pallas_call(
        matmul_bn_relu_kernel,
        out_shape=jax.ShapeDtypeStruct((mp, nc), jnp.bfloat16),
        grid=(mp // tm,),
        in_specs=[
            pl.BlockSpec((tm, kdim), lambda i: (i, 0)),
            pl.BlockSpec((kdim, nc), lambda i: (0, 0)),
            pl.BlockSpec((1, nc), lambda i: (0, 0)),
            pl.BlockSpec((1, nc), lambda i: (0, 0)),
        ],
        out_specs=pl.BlockSpec((tm, nc), lambda i: (i, 0)),
        compiler_params=pltpu.CompilerParams(
            dimension_semantics=("parallel",),
            vmem_limit_bytes=32 * 1024 * 1024),
    )(x2d, w, scale.reshape(1, nc), shift.reshape(1, nc))
    return out[:m]


# ----------------------------------------------------------------------------
# Kernel 2: fused branch3x3 + branch5x5 + branch_pool (+ branch1x1 passthrough)
# ----------------------------------------------------------------------------
def _rows(ref4, d_idx, row_start, nrows):
    """Rows [row_start, row_start+nrows) of depth plane d_idx from a
    (1, Dp, Hp*W, C) VMEM block (dynamic depth index, static row offset)."""
    v = ref4[pl.ds(0, 1), pl.ds(d_idx, 1), pl.ds(row_start, nrows), :]
    return v.reshape(nrows, ref4.shape[-1])


def fused_branches_kernel(b1_ref, s3_ref, w3_ref, sc3_ref, sh3_ref,
                          s5_ref, w5_ref, sc5_ref, sh5_ref,
                          xp_ref, wp_ref, scp_ref, shp_ref,
                          o_ref, *, h, w, db):
    """Grid = (N, D // db).  The padded depth windows s3/s5/xp are resident in
    VMEM for the whole sample (their block index ignores the depth-block axis),
    so every HBM byte is DMA'd once per sample.  Each step emits db output
    depth planes into one lane-fused (db*H*W, Ctot) block."""
    di = pl.program_id(1)
    hw = h * w
    c1 = b1_ref.shape[1]
    c3 = w3_ref.shape[3]
    c5 = w5_ref.shape[3]
    cp = wp_ref.shape[1]
    o3 = c1
    o5 = c1 + c3
    op = c1 + c3 + c5

    @pl.loop(0, db)
    def _per_plane(od):
        d0 = di * db + od                    # output depth plane == padded base idx
        r0 = od * hw
        if hw % 8 == 0:
            r0 = pl.multiple_of(r0, 8)
        rows = pl.ds(r0, hw)

        # ---- branch1x1: passthrough of the already-computed fused 1x1 conv ----
        o_ref[rows, 0:c1] = b1_ref[rows, :].astype(o_ref.dtype)

        # ---- branch3x3: 3x3x3 conv, kw folded into contraction (K = 3*C3r) ----
        acc3 = jnp.zeros((hw, c3), jnp.float32)
        for kd in range(3):
            for kh in range(3):
                tap = _rows(s3_ref, d0 + kd, kh * w, hw)       # (H*W, 3*C3r) bf16
                acc3 = acc3 + jnp.dot(tap, w3_ref[kd, kh],
                                      preferred_element_type=jnp.float32)
        y3 = jnp.maximum(acc3 * sc3_ref[...] + sh3_ref[...], 0.0)
        o_ref[rows, o3:o3 + c3] = y3.astype(o_ref.dtype)

        # ---- branch5x5: 5x5x5 conv, kw folded into contraction (K = 5*C5r) ----
        acc5 = jnp.zeros((hw, c5), jnp.float32)
        for kd in range(5):
            for kh in range(5):
                tap = _rows(s5_ref, d0 + kd, kh * w, hw)
                acc5 = acc5 + jnp.dot(tap, w5_ref[kd, kh],
                                      preferred_element_type=jnp.float32)
        y5 = jnp.maximum(acc5 * sc5_ref[...] + sh5_ref[...], 0.0)
        o_ref[rows, o5:o5 + c5] = y5.astype(o_ref.dtype)

        # ---- branch_pool: 3x3x3 max pool (W pre-reduced) + 1x1 proj + BN + ReLU
        pooled = _rows(xp_ref, d0, 0, hw)
        for kd in range(3):
            for kh in range(3):
                if kd == 0 and kh == 0:
                    continue
                pooled = jnp.maximum(pooled, _rows(xp_ref, d0 + kd, kh * w, hw))
        accp = jnp.dot(pooled, wp_ref[...], preferred_element_type=jnp.float32)
        yp = jnp.maximum(accp * scp_ref[...] + shp_ref[...], 0.0)
        o_ref[rows, op:op + cp] = yp.astype(o_ref.dtype)


def fused_branches(b1, s3, p3, s5, p5, xp, pp, n, d, h, w):
    hw = h * w
    c1 = b1.shape[1]
    c3 = p3["w"].shape[-1]
    c5 = p5["w"].shape[-1]
    cp = pp["w"].shape[-1]
    ctot = c1 + c3 + c5 + cp
    # Depth planes per grid step: largest divisor of D with <= ~1024 output rows.
    db = 1
    for cand in range(d, 0, -1):
        if d % cand == 0 and cand * hw <= 1024:
            db = cand
            break
    nd_blk = d // db
    m = n * d * hw
    dp3, hp3w, kc3 = s3.shape[1], s3.shape[2], s3.shape[3]
    dp5, hp5w, kc5 = s5.shape[1], s5.shape[2], s5.shape[3]
    dpx, hpxw, cin = xp.shape[1], xp.shape[2], xp.shape[3]

    kernel = functools.partial(fused_branches_kernel, h=h, w=w, db=db)
    row_blk = lambda ni, di: (ni * nd_blk + di, 0)
    per_n = lambda ni, di: (ni, 0, 0, 0)
    const2 = lambda ni, di: (0, 0)
    const4 = lambda ni, di: (0, 0, 0, 0)

    return pl.pallas_call(
        kernel,
        out_shape=jax.ShapeDtypeStruct((m, ctot), jnp.float32),
        grid=(n, nd_blk),
        in_specs=[
            pl.BlockSpec((db * hw, c1), row_blk),              # branch1x1 rows
            pl.BlockSpec((1, dp3, hp3w, kc3), per_n),          # resident 3x3 stack
            pl.BlockSpec((3, 3, kc3, c3), const4),
            pl.BlockSpec((1, c3), const2),
            pl.BlockSpec((1, c3), const2),
            pl.BlockSpec((1, dp5, hp5w, kc5), per_n),          # resident 5x5 stack
            pl.BlockSpec((5, 5, kc5, c5), const4),
            pl.BlockSpec((1, c5), const2),
            pl.BlockSpec((1, c5), const2),
            pl.BlockSpec((1, dpx, hpxw, cin), per_n),          # resident pool input
            pl.BlockSpec((cin, cp), const2),
            pl.BlockSpec((1, cp), const2),
            pl.BlockSpec((1, cp), const2),
        ],
        out_specs=pl.BlockSpec((db * hw, ctot), row_blk),      # fused concat output
        compiler_params=pltpu.CompilerParams(
            dimension_semantics=("parallel", "parallel"),
            vmem_limit_bytes=32 * 1024 * 1024),
    )(b1,
      s3, p3["w"], p3["scale"].reshape(1, c3), p3["shift"].reshape(1, c3),
      s5, p5["w"], p5["scale"].reshape(1, c5), p5["shift"].reshape(1, c5),
      xp, pp["w"], pp["scale"].reshape(1, cp), pp["shift"].reshape(1, cp))


# ----------------------------------------------------------------------------
# Glue (plain JAX, bf16): small padded/shifted views of the reduce tensors only.
# ----------------------------------------------------------------------------
def build_wshift_stack(r, k, pad):
    """r:(N,D,H,W,C) -> (N, Dp, Hp*W, k*C): zero-padded in D/H/W with the k
    W-taps folded into the channel (contraction) dim, channel-fastest."""
    n, d, h, w, c = r.shape
    rp = jnp.pad(r, ((0, 0), (pad, pad), (pad, pad), (pad, pad), (0, 0)))
    taps = [rp[:, :, :, kw:kw + w, :] for kw in range(k)]
    xs = jnp.stack(taps, axis=4)                       # (N, Dp, Hp, W, k, C)
    return xs.reshape(n, d + 2 * pad, (h + 2 * pad) * w, k * c)


def build_pool_wmax(x, k, pad):
    """x:(N,D,H,W,C) -> (N, Dp, Hp*W, C): separable max over the W window, then
    -inf padding of D/H (stride-1 pool: the center tap is always valid)."""
    n, d, h, w, c = x.shape
    xw = jnp.pad(x, ((0, 0), (0, 0), (0, 0), (pad, pad), (0, 0)),
                 constant_values=-jnp.inf)
    wm = xw[:, :, :, 0:w, :]
    for kw in range(1, k):
        wm = jnp.maximum(wm, xw[:, :, :, kw:kw + w, :])
    wp = jnp.pad(wm, ((0, 0), (pad, pad), (pad, pad), (0, 0), (0, 0)),
                 constant_values=-jnp.inf)
    return wp.reshape(n, d + 2 * pad, (h + 2 * pad) * w, c)


# ----------------------------------------------------------------------------
# Parameters (deterministic synthetic init; mirrors PyTorch module shapes)
# ----------------------------------------------------------------------------
def _conv_bn_folded(ki, cin, cout, k, eps=1e-5):
    w = jax.random.normal(next(ki), (cout, cin, k, k, k), jnp.float32) * 0.1
    b = jax.random.normal(next(ki), (cout,), jnp.float32) * 0.1
    gamma = 1.0 + 0.1 * jax.random.normal(next(ki), (cout,), jnp.float32)
    beta = 0.1 * jax.random.normal(next(ki), (cout,), jnp.float32)
    rmean = 0.1 * jax.random.normal(next(ki), (cout,), jnp.float32)
    rvar = 1.0 + jax.random.uniform(next(ki), (cout,), jnp.float32)   # > 0
    scale = gamma / jnp.sqrt(rvar + eps)
    shift = beta + (b - rmean) * scale
    return w, scale, shift


def _as_1x1(w):  # (Cout, Cin, 1,1,1) -> (Cin, Cout)
    return jnp.transpose(w.reshape(w.shape[0], w.shape[1]), (1, 0))


def _as_kwfold_taps(w, k):
    """(Cout, Cin, k,k,k) -> (kd, kh, kw*Cin + ci, Cout): matches the
    channel-fastest kw folding of build_wshift_stack."""
    cout, cin = w.shape[0], w.shape[1]
    wt = jnp.transpose(w, (2, 3, 4, 1, 0))            # (kd, kh, kw, Cin, Cout)
    return wt.reshape(k, k, k * cin, cout)


def _dhwio(w):  # torch (Cout, Cin, kD,kH,kW) -> DHWIO for the XLA reference
    return jnp.transpose(w, (2, 3, 4, 1, 0))


def init_inception3d_params(key, in_ch, out1x1, out3x3_red, out3x3,
                            out5x5_red, out5x5, out_pool_proj):
    keys = iter(jax.random.split(key, 64))
    w1, s1, h1 = _conv_bn_folded(keys, in_ch, out1x1, 1)
    w3r, s3r, h3r = _conv_bn_folded(keys, in_ch, out3x3_red, 1)
    w3, s3, h3 = _conv_bn_folded(keys, out3x3_red, out3x3, 3)
    w5r, s5r, h5r = _conv_bn_folded(keys, in_ch, out5x5_red, 1)
    w5, s5, h5 = _conv_bn_folded(keys, out5x5_red, out5x5, 5)
    wp, sp, hp = _conv_bn_folded(keys, in_ch, out_pool_proj, 1)
    params = {
        # the three 1x1 convs that read x, fused along the output-channel dim
        "b1x1": {
            "w": jnp.concatenate([_as_1x1(w1), _as_1x1(w3r), _as_1x1(w5r)],
                                 axis=1).astype(jnp.bfloat16),
            "scale": jnp.concatenate([s1, s3r, s5r]),
            "shift": jnp.concatenate([h1, h3r, h5r]),
        },
        "b3": {"w": _as_kwfold_taps(w3, 3).astype(jnp.bfloat16),
               "scale": s3, "shift": h3},
        "b5": {"w": _as_kwfold_taps(w5, 5).astype(jnp.bfloat16),
               "scale": s5, "shift": h5},
        "bp": {"w": _as_1x1(wp).astype(jnp.bfloat16), "scale": sp, "shift": hp},
    }
    ref = {
        "b1": {"w": _dhwio(w1), "scale": s1, "shift": h1},
        "b3r": {"w": _dhwio(w3r), "scale": s3r, "shift": h3r},
        "b3": {"w": _dhwio(w3), "scale": s3, "shift": h3},
        "b5r": {"w": _dhwio(w5r), "scale": s5r, "shift": h5r},
        "b5": {"w": _dhwio(w5), "scale": s5, "shift": h5},
        "bp": {"w": _dhwio(wp), "scale": sp, "shift": hp},
    }
    return params, ref


# ----------------------------------------------------------------------------
# Forward pass (matches Inception3D.forward, eval-mode BN, bf16 MXU operands)
# ----------------------------------------------------------------------------
@jax.jit
def inception3d_forward(x_ncdhw, params):
    n, cin, d, h, w = x_ncdhw.shape
    m = n * d * h * w
    x_nd = jnp.transpose(x_ncdhw, (0, 2, 3, 4, 1))            # NDHWC
    x_bf = x_nd.astype(jnp.bfloat16)

    # fused 1x1x1 convs (branch1x1 + 3x3-reduce + 5x5-reduce): x read once (bf16)
    p1 = params["b1x1"]
    y1 = fused_matmul_bn_relu(x_bf.reshape(m, cin), p1["w"], p1["scale"], p1["shift"])
    c3r = params["b3"]["w"].shape[2] // 3
    c5r = params["b5"]["w"].shape[2] // 5
    c1 = p1["w"].shape[1] - c3r - c5r
    b1 = y1[:, :c1]                                           # (M, C1) bf16
    r3 = y1[:, c1:c1 + c3r].reshape(n, d, h, w, c3r)
    r5 = y1[:, c1 + c3r:].reshape(n, d, h, w, c5r)

    # small bf16 glue tensors: kw folded into channels (no im2col in HBM)
    s3 = build_wshift_stack(r3, 3, 1)
    s5 = build_wshift_stack(r5, 5, 2)
    xp = build_pool_wmax(x_bf, 3, 1)

    # one fused call: branch3x3 + branch5x5 + branch_pool + branch1x1 copy-through,
    # writing the concatenated (M, Ctot) output directly (no jnp.concatenate pass)
    out2d = fused_branches(b1, s3, params["b3"], s5, params["b5"],
                           xp, params["bp"], n, d, h, w)
    out = out2d.reshape(n, d, h, w, -1)
    return jnp.transpose(out, (0, 4, 1, 2, 3))                # (N, Ctot, D, H, W)


# ----------------------------------------------------------------------------
# Pure-XLA f32 reference (for a loose numerical sanity check)
# ----------------------------------------------------------------------------
def _conv3d_ndhwc(x, w_dhwio, pad):
    return jax.lax.conv_general_dilated(
        x, w_dhwio, window_strides=(1, 1, 1), padding=[(pad, pad)] * 3,
        dimension_numbers=("NDHWC", "DHWIO", "NDHWC"))


def inception3d_reference(x_ncdhw, ref):
    x = jnp.transpose(x_ncdhw, (0, 2, 3, 4, 1)).astype(jnp.float32)

    def cbr(z, p, pad):
        y = _conv3d_ndhwc(z, p["w"], pad)
        return jnp.maximum(y * p["scale"] + p["shift"], 0.0)

    b1 = cbr(x, ref["b1"], 0)
    b3 = cbr(cbr(x, ref["b3r"], 0), ref["b3"], 1)
    b5 = cbr(cbr(x, ref["b5r"], 0), ref["b5"], 2)
    pooled = jax.lax.reduce_window(
        x, -jnp.inf, jax.lax.max, (1, 3, 3, 3, 1), (1, 1, 1, 1, 1),
        [(0, 0), (1, 1), (1, 1), (1, 1), (0, 0)])
    bp = cbr(pooled, ref["bp"], 0)
    out = jnp.concatenate([b1, b3, b5, bp], axis=-1)
    return jnp.transpose(out, (0, 4, 1, 2, 3))


# ----------------------------------------------------------------------------
if __name__ == "__main__":
    key = jax.random.PRNGKey(0)
    k_x, k_p = jax.random.split(key)

    # small shapes: batch=2, in_channels=4, D=H=W=8
    N, Cin, D, H, W = 2, 4, 8, 8, 8
    out1x1, out3x3_red, out3x3 = 8, 4, 8
    out5x5_red, out5x5, out_pool = 4, 8, 8

    x = jax.random.normal(k_x, (N, Cin, D, H, W), jnp.float32)
    params, ref = init_inception3d_params(
        k_p, Cin, out1x1, out3x3_red, out3x3, out5x5_red, out5x5, out_pool
    )

    y = inception3d_forward(x, params)
    y = jax.block_until_ready(y)

    expected_shape = (N, out1x1 + out3x3 + out5x5 + out_pool, D, H, W)
    assert y.shape == expected_shape, (y.shape, expected_shape)
    assert bool(jnp.all(jnp.isfinite(y)))

    # numerical sanity vs. an f32 XLA reference (bf16 MXU operands -> loose tol)
    y_ref = inception3d_reference(x, ref)
    max_err = float(jnp.max(jnp.abs(y - y_ref)))
    assert max_err < 1e-1, max_err

    print("KERNEL_OK")
</pallas_src>

<mosaic_0001>
module attributes {stable_mosaic.version = 11 : i64} {
  func.func @matmul_bn_relu_kernel(%arg0: i32, %arg1: memref<512x4xbf16, #tpu.memory_space<vmem>>, %arg2: memref<4x16xbf16, #tpu.memory_space<vmem>>, %arg3: memref<1x16xf32, #tpu.memory_space<vmem>>, %arg4: memref<1x16xf32, #tpu.memory_space<vmem>>, %arg5: memref<512x16xbf16, #tpu.memory_space<vmem>>) attributes {dimension_semantics = [#tpu.dimension_semantics<parallel>], iteration_bounds = array<i64: 2>, scalar_prefetch = 0 : i64, scratch_operands = 0 : i64, tpu.core_type = #tpu.core_type<tc>, window_params = [{transform_indices = @transform_0, window_bounds = array<i64: 512, 4>}, {pipeline_mode = #tpu.pipeline_mode<synchronous>, transform_indices = @transform_1, window_bounds = array<i64: 4, 16>}, {pipeline_mode = #tpu.pipeline_mode<synchronous>, transform_indices = @transform_2, window_bounds = array<i64: 1, 16>}, {pipeline_mode = #tpu.pipeline_mode<synchronous>, transform_indices = @transform_3, window_bounds = array<i64: 1, 16>}, {transform_indices = @transform_4, window_bounds = array<i64: 512, 16>}]} {
    %c0 = arith.constant 0 : index
    %c0_0 = arith.constant 0 : index
    %0 = vector.load %arg1[%c0, %c0_0] : memref<512x4xbf16, #tpu.memory_space<vmem>>, vector<512x4xbf16>
    %c0_1 = arith.constant 0 : index
    %c0_2 = arith.constant 0 : index
    %1 = vector.load %arg2[%c0_1, %c0_2] : memref<4x16xbf16, #tpu.memory_space<vmem>>, vector<4x16xbf16>
    %cst = arith.constant dense<0.000000e+00> : vector<512x16xf32>
    %2 = tpu.matmul %0, %1, %cst {dimension_numbers = #tpu.dot_dimension_numbers<[1], [0], [0], [1], [0, 0, 1, 1], [], []>} : vector<512x4xbf16>, vector<4x16xbf16>, vector<512x16xf32> -> vector<512x16xf32>
    %c0_3 = arith.constant 0 : index
    %c0_4 = arith.constant 0 : index
    %3 = vector.load %arg3[%c0_3, %c0_4] : memref<1x16xf32, #tpu.memory_space<vmem>>, vector<1x16xf32>
    %4 = vector.broadcast %3 : vector<1x16xf32> to vector<512x16xf32>
    %5 = arith.mulf %2, %4 : vector<512x16xf32>
    %c0_5 = arith.constant 0 : index
    %c0_6 = arith.constant 0 : index
    %6 = vector.load %arg4[%c0_5, %c0_6] : memref<1x16xf32, #tpu.memory_space<vmem>>, vector<1x16xf32>
    %7 = vector.broadcast %6 : vector<1x16xf32> to vector<512x16xf32>
    %8 = arith.addf %5, %7 : vector<512x16xf32>
    %cst_7 = arith.constant 0.000000e+00 : f32
    %9 = vector.broadcast %cst_7 : f32 to vector<512x16xf32>
    %10 = arith.maximumf %8, %9 : vector<512x16xf32>
    %11 = arith.truncf %10 : vector<512x16xf32> to vector<512x16xbf16>
    %c0_8 = arith.constant 0 : index
    %c0_9 = arith.constant 0 : index
    %12 = vector.load %arg5[%c0_8, %c0_9] : memref<512x16xbf16, #tpu.memory_space<vmem>>, vector<512x16xbf16>
    tpu.vector_store %arg5[%c0_8, %c0_9], %11 {strides = array<i32>} : memref<512x16xbf16, #tpu.memory_space<vmem>>, vector<512x16xbf16>,
    return
  }
  func.func @transform_0(%arg0: i32) -> (i32, i32) {
    %c0_i32 = arith.constant 0 : i32
    %c0_i32_0 = arith.constant 0 : i32
    return %arg0, %c0_i32 : i32, i32
  }
  func.func @transform_1(%arg0: i32) -> (i32, i32) {
    %c0_i32 = arith.constant 0 : i32
    %c0_i32_0 = arith.constant 0 : i32
    %c0_i32_1 = arith.constant 0 : i32
    return %c0_i32, %c0_i32_0 : i32, i32
  }
  func.func @transform_2(%arg0: i32) -> (i32, i32) {
    %c0_i32 = arith.constant 0 : i32
    %c0_i32_0 = arith.constant 0 : i32
    %c0_i32_1 = arith.constant 0 : i32
    return %c0_i32, %c0_i32_0 : i32, i32
  }
  func.func @transform_3(%arg0: i32) -> (i32, i32) {
    %c0_i32 = arith.constant 0 : i32
    %c0_i32_0 = arith.constant 0 : i32
    %c0_i32_1 = arith.constant 0 : i32
    return %c0_i32, %c0_i32_0 : i32, i32
  }
  func.func @transform_4(%arg0: i32) -> (i32, i32) {
    %c0_i32 = arith.constant 0 : i32
    %c0_i32_0 = arith.constant 0 : i32
    return %arg0, %c0_i32 : i32, i32
  }
}

module attributes {stable_mosaic.version = 11 : i64} {
  func.func @fused_branches_kernel(%arg0: i32, %arg1: i32, %arg2: memref<512x8xbf16, #tpu.memory_space<vmem>>, %arg3: memref<1x10x80x12xbf16, #tpu.memory_space<vmem>>, %arg4: memref<3x3x12x8xbf16, #tpu.memory_space<vmem>>, %arg5: memref<1x8xf32, #tpu.memory_space<vmem>>, %arg6: memref<1x8xf32, #tpu.memory_space<vmem>>, %arg7: memref<1x12x96x20xbf16, #tpu.memory_space<vmem>>, %arg8: memref<5x5x20x8xbf16, #tpu.memory_space<vmem>>, %arg9: memref<1x8xf32, #tpu.memory_space<vmem>>, %arg10: memref<1x8xf32, #tpu.memory_space<vmem>>, %arg11: memref<1x10x80x4xbf16, #tpu.memory_space<vmem>>, %arg12: memref<4x8xbf16, #tpu.memory_space<vmem>>, %arg13: memref<1x8xf32, #tpu.memory_space<vmem>>, %arg14: memref<1x8xf32, #tpu.memory_space<vmem>>, %arg15: memref<512x32xf32, #tpu.memory_space<vmem>>) attributes {dimension_semantics = [#tpu.dimension_semantics<parallel>, #tpu.dimension_semantics<parallel>], iteration_bounds = array<i64: 2, 1>, scalar_prefetch = 0 : i64, scratch_operands = 0 : i64, tpu.core_type = #tpu.core_type<tc>, window_params = [{transform_indices = @transform_0, window_bounds = array<i64: 512, 8>}, {transform_indices = @transform_1, window_bounds = array<i64: 1, 10, 80, 12>}, {pipeline_mode = #tpu.pipeline_mode<synchronous>, transform_indices = @transform_2, window_bounds = array<i64: 3, 3, 12, 8>}, {pipeline_mode = #tpu.pipeline_mode<synchronous>, transform_indices = @transform_3, window_bounds = array<i64: 1, 8>}, {pipeline_mode = #tpu.pipeline_mode<synchronous>, transform_indices = @transform_4, window_bounds = array<i64: 1, 8>}, {transform_indices = @transform_5, window_bounds = array<i64: 1, 12, 96, 20>}, {pipeline_mode = #tpu.pipeline_mode<synchronous>, transform_indices = @transform_6, window_bounds = array<i64: 5, 5, 20, 8>}, {pipeline_mode = #tpu.pipeline_mode<synchronous>, transform_indices = @transform_7, window_bounds = array<i64: 1, 8>}, {pipeline_mode = #tpu.pipeline_mode<synchronous>, transform_indices = @transform_8, window_bounds = array<i64: 1, 8>}, {transform_indices = @transform_9, window_bounds = array<i64: 1, 10, 80, 4>}, {pipeline_mode = #tpu.pipeline_mode<synchronous>, transform_indices = @transform_10, window_bounds = array<i64: 4, 8>}, {pipeline_mode = #tpu.pipeline_mode<synchronous>, transform_indices = @transform_11, window_bounds = array<i64: 1, 8>}, {pipeline_mode = #tpu.pipeline_mode<synchronous>, transform_indices = @transform_12, window_bounds = array<i64: 1, 8>}, {transform_indices = @transform_13, window_bounds = array<i64: 512, 32>}]} {
    %c0_i32 = arith.constant 0 : i32
    %c8_i32 = arith.constant 8 : i32
    %0 = arith.addi %c0_i32, %c8_i32 : i32
    %c1_i32 = arith.constant 1 : i32
    scf.for %arg16 = %c0_i32 to %0 step %c1_i32  : i32 {
      %c1_i32_1 = arith.constant 1 : i32
      %1 = arith.muli %arg16, %c1_i32_1 : i32
      %c0_i32_2 = arith.constant 0 : i32
      %2 = arith.addi %c0_i32_2, %1 : i32
      %c8_i32_3 = arith.constant 8 : i32
      %3 = arith.muli %arg1, %c8_i32_3 : i32
      %4 = arith.addi %3, %2 : i32
      %c64_i32 = arith.constant 64 : i32
      %5 = arith.muli %2, %c64_i32 : i32
      %6 = tpu.assume_multiple %5, 8 : i32
      %7 = arith.index_cast %6 : i32 to index
      %c0 = arith.constant 0 : index
      %8 = vector.load %arg2[%7, %c0] : memref<512x8xbf16, #tpu.memory_space<vmem>>, vector<64x8xbf16>
      %9 = arith.extf %8 : vector<64x8xbf16> to vector<64x8xf32>
      %10 = arith.index_cast %6 : i32 to index
      %c0_4 = arith.constant 0 : index
      %11 = vector.load %arg15[%10, %c0_4] : memref<512x32xf32, #tpu.memory_space<vmem>>, vector<64x8xf32>
      tpu.vector_store %arg15[%10, %c0_4], %9 {strides = array<i32>} : memref<512x32xf32, #tpu.memory_space<vmem>>, vector<64x8xf32>,
      %cst = arith.constant 0.000000e+00 : f32
      %12 = vector.broadcast %cst : f32 to vector<64x8xf32>
      %c0_i32_5 = arith.constant 0 : i32
      %13 = arith.addi %4, %c0_i32_5 : i32
      %c0_6 = arith.constant 0 : index
      %14 = arith.index_cast %13 : i32 to index
      %c0_7 = arith.constant 0 : index
      %c0_8 = arith.constant 0 : index
      %15 = vector.load %arg3[%c0_6, %14, %c0_7, %c0_8] : memref<1x10x80x12xbf16, #tpu.memory_space<vmem>>, vector<1x1x64x12xbf16>
      %16 = vector.shape_cast %15 : vector<1x1x64x12xbf16> to vector<64x12xbf16>
      %c0_9 = arith.constant 0 : index
      %c0_10 = arith.constant 0 : index
      %c0_11 = arith.constant 0 : index
      %c0_12 = arith.constant 0 : index
      %17 = vector.load %arg4[%c0_9, %c0_10, %c0_11, %c0_12] : memref<3x3x12x8xbf16, #tpu.memory_space<vmem>>, vector<1x1x12x8xbf16>
      %18 = vector.shape_cast %17 : vector<1x1x12x8xbf16> to vector<12x8xbf16>
      %cst_13 = arith.constant dense<0.000000e+00> : vector<64x8xf32>
      %19 = tpu.matmul %16, %18, %cst_13 {dimension_numbers = #tpu.dot_dimension_numbers<[1], [0], [0], [1], [0, 0, 1, 1], [], []>} : vector<64x12xbf16>, vector<12x8xbf16>, vector<64x8xf32> -> vector<64x8xf32>
      %20 = arith.addf %12, %19 : vector<64x8xf32>
      %c0_i32_14 = arith.constant 0 : i32
      %21 = arith.addi %4, %c0_i32_14 : i32
      %c0_15 = arith.constant 0 : index
      %22 = arith.index_cast %21 : i32 to index
      %c8 = arith.constant 8 : index
      %c0_16 = arith.constant 0 : index
      %23 = vector.load %arg3[%c0_15, %22, %c8, %c0_16] : memref<1x10x80x12xbf16, #tpu.memory_space<vmem>>, vector<1x1x64x12xbf16>
      %24 = vector.shape_cast %23 : vector<1x1x64x12xbf16> to vector<64x12xbf16>
      %c0_17 = arith.constant 0 : index
      %c1 = arith.constant 1 : index
      %c0_18 = arith.constant 0 : index
      %c0_19 = arith.constant 0 : index
      %25 = vector.load %arg4[%c0_17, %c1, %c0_18, %c0_19] : memref<3x3x12x8xbf16, #tpu.memory_space<vmem>>, vector<1x1x12x8xbf16>
      %26 = vector.shape_cast %25 : vector<1x1x12x8xbf16> to vector<12x8xbf16>
      %cst_20 = arith.constant dense<0.000000e+00> : vector<64x8xf32>
      %27 = tpu.matmul %24, %26, %cst_20 {dimension_numbers = #tpu.dot_dimension_numbers<[1], [0], [0], [1], [0, 0, 1, 1], [], []>} : vector<64x12xbf16>, vector<12x8xbf16>, vector<64x8xf32> -> vector<64x8xf32>
      %28 = arith.addf %20, %27 : vector<64x8xf32>
      %c0_i32_21 = arith.constant 0 : i32
      %29 = arith.addi %4, %c0_i32_21 : i32
      %c0_22 = arith.constant 0 : index
      %30 = arith.index_cast %29 : i32 to index
      %c16 = arith.constant 16 : index
      %c0_23 = arith.constant 0 : index
      %31 = vector.load %arg3[%c0_22, %30, %c16, %c0_23] : memref<1x10x80x12xbf16, #tpu.memory_space<vmem>>, vector<1x1x64x12xbf16>
      %32 = vector.shape_cast %31 : vector<1x1x64x12xbf16> to vector<64x12xbf16>
      %c0_24 = arith.constant 0 : index
      %c2 = arith.constant 2 : index
      %c0_25 = arith.constant 0 : index
      %c0_26 = arith.constant 0 : index
      %33 = vector.load %arg4[%c0_24, %c2, %c0_25, %c0_26] : memref<3x3x12x8xbf16, #tpu.memory_space<vmem>>, vector<1x1x12x8xbf16>
      %34 = vector.shape_cast %33 : vector<1x1x12x8xbf16> to vector<12x8xbf16>
      %cst_27 = arith.constant dense<0.000000e+00> : vector<64x8xf32>
      %35 = tpu.matmul %32, %34, %cst_27 {dimension_numbers = #tpu.dot_dimension_numbers<[1], [0], [0], [1], [0, 0, 1, 1], [], []>} : vector<64x12xbf16>, vector<12x8xbf16>, vector<64x8xf32> -> vector<64x8xf32>
      %36 = arith.addf %28, %35 : vector<64x8xf32>
      %c1_i32_28 = arith.constant 1 : i32
      %37 = arith.addi %4, %c1_i32_28 : i32
      %c0_29 = arith.constant 0 : index
      %38 = arith.index_cast %37 : i32 to index
      %c0_30 = arith.constant 0 : index
      %c0_31 = arith.constant 0 : index
      %39 = vector.load %arg3[%c0_29, %38, %c0_30, %c0_31] : memref<1x10x80x12xbf16, #tpu.memory_space<vmem>>, vector<1x1x64x12xbf16>
      %40 = vector.shape_cast %39 : vector<1x1x64x12xbf16> to vector<64x12xbf16>
      %c1_32 = arith.constant 1 : index
      %c0_33 = arith.constant 0 : index
      %c0_34 = arith.constant 0 : index
      %c0_35 = arith.constant 0 : index
      %41 = vector.load %arg4[%c1_32, %c0_33, %c0_34, %c0_35] : memref<3x3x12x8xbf16, #tpu.memory_space<vmem>>, vector<1x1x12x8xbf16>
      %42 = vector.shape_cast %41 : vector<1x1x12x8xbf16> to vector<12x8xbf16>
      %cst_36 = arith.constant dense<0.000000e+00> : vector<64x8xf32>
      %43 = tpu.matmul %40, %42, %cst_36 {dimension_numbers = #tpu.dot_dimension_numbers<[1], [0], [0], [1], [0, 0, 1, 1], [], []>} : vector<64x12xbf16>, vector<12x8xbf16>, vector<64x8xf32> -> vector<64x8xf32>
      %44 = arith.addf %36, %43 : vector<64x8xf32>
      %c1_i32_37 = arith.constant 1 : i32
      %45 = arith.addi %4, %c1_i32_37 : i32
      %c0_38 = arith.constant 0 : index
      %46 = arith.index_cast %45 : i32 to index
      %c8_39 = arith.constant 8 : index
      %c0_40 = arith.constant 0 : index
      %47 = vector.load %arg3[%c0_38, %46, %c8_39, %c0_40] : memref<1x10x80x12xbf16, #tpu.memory_space<vmem>>, vector<1x1x64x12xbf16>
      %48 = vector.shape_cast %47 : vector<1x1x64x12xbf16> to vector<64x12xbf16>
      %c1_41 = arith.constant 1 : index
      %c1_42 = arith.constant 1 : index
      %c0_43 = arith.constant 0 : index
      %c0_44 = arith.constant 0 : index
      %49 = vector.load %arg4[%c1_41, %c1_42, %c0_43, %c0_44] : memref<3x3x12x8xbf16, #tpu.memory_space<vmem>>, vector<1x1x12x8xbf16>
      %50 = vector.shape_cast %49 : vector<1x1x12x8xbf16> to vector<12x8xbf16>
      %cst_45 = arith.constant dense<0.000000e+00> : vector<64x8xf32>
      %51 = tpu.matmul %48, %50, %cst_45 {dimension_numbers = #tpu.dot_dimension_numbers<[1], [0], [0], [1], [0, 0, 1, 1], [], []>} : vector<64x12xbf16>, vector<12x8xbf16>, vector<64x8xf32> -> vector<64x8xf32>
      %52 = arith.addf %44, %51 : vector<64x8xf32>
      %c1_i32_46 = arith.constant 1 : i32
      %53 = arith.addi %4, %c1_i32_46 : i32
      %c0_47 = arith.constant 0 : index
      %54 = arith.index_cast %53 : i32 to index
      %c16_48 = arith.constant 16 : index
      %c0_49 = arith.constant 0 : index
      %55 = vector.load %arg3[%c0_47, %54, %c16_48, %c0_49] : memref<1x10x80x12xbf16, #tpu.memory_space<vmem>>, vector<1x1x64x12xbf16>
      %56 = vector.shape_cast %55 : vector<1x1x64x12xbf16> to vector<64x12xbf16>
      %c1_50 = arith.constant 1 : index
      %c2_51 = arith.constant 2 : index
      %c0_52 = arith.constant 0 : index
      %c0_53 = arith.constant 0 : index
      %57 = vector.load %arg4[%c1_50, %c2_51, %c0_52, %c0_53] : memref<3x3x12x8xbf16, #tpu.memory_space<vmem>>, vector<1x1x12x8xbf16>
      %58 = vector.shape_cast %57 : vector<1x1x12x8xbf16> to vector<12x8xbf16>
      %cst_54 = arith.constant dense<0.000000e+00> : vector<64x8xf32>
      %59 = tpu.matmul %56, %58, %cst_54 {dimension_numbers = #tpu.dot_dimension_numbers<[1], [0], [0], [1], [0, 0, 1, 1], [], []>} : vector<64x12xbf16>, vector<12x8xbf16>, vector<64x8xf32> -> vector<64x8xf32>
      %60 = arith.addf %52, %59 : vector<64x8xf32>
      %c2_i32 = arith.constant 2 : i32
      %61 = arith.addi %4, %c2_i32 : i32
      %c0_55 = arith.constant 0 : index
      %62 = arith.index_cast %61 : i32 to index
      %c0_56 = arith.constant 0 : index
      %c0_57 = arith.constant 0 : index
      %63 = vector.load %arg3[%c0_55, %62, %c0_56, %c0_57] : memref<1x10x80x12xbf16, #tpu.memory_space<vmem>>, vector<1x1x64x12xbf16>
      %64 = vector.shape_cast %63 : vector<1x1x64x12xbf16> to vector<64x12xbf16>
      %c2_58 = arith.constant 2 : index
      %c0_59 = arith.constant 0 : index
      %c0_60 = arith.constant 0 : index
      %c0_61 = arith.constant 0 : index
      %65 = vector.load %arg4[%c2_58, %c0_59, %c0_60, %c0_61] : memref<3x3x12x8xbf16, #tpu.memory_space<vmem>>, vector<1x1x12x8xbf16>
      %66 = vector.shape_cast %65 : vector<1x1x12x8xbf16> to vector<12x8xbf16>
      %cst_62 = arith.constant dense<0.000000e+00> : vector<64x8xf32>
      %67 = tpu.matmul %64, %66, %cst_62 {dimension_numbers = #tpu.dot_dimension_numbers<[1], [0], [0], [1], [0, 0, 1, 1], [], []>} : vector<64x12xbf16>, vector<12x8xbf16>, vector<64x8xf32> -> vector<64x8xf32>
      %68 = arith.addf %60, %67 : vector<64x8xf32>
      %c2_i32_63 = arith.constant 2 : i32
      %69 = arith.addi %4, %c2_i32_63 : i32
      %c0_64 = arith.constant 0 : index
      %70 = arith.index_cast %69 : i32 to index
      %c8_65 = arith.constant 8 : index
      %c0_66 = arith.constant 0 : index
      %71 = vector.load %arg3[%c0_64, %70, %c8_65, %c0_66] : memref<1x10x80x12xbf16, #tpu.memory_space<vmem>>, vector<1x1x64x12xbf16>
      %72 = vector.shape_cast %71 : vector<1x1x64x12xbf16> to vector<64x12xbf16>
      %c2_67 = arith.constant 2 : index
      %c1_68 = arith.constant 1 : index
      %c0_69 = arith.constant 0 : index
      %c0_70 = arith.constant 0 : index
      %73 = vector.load %arg4[%c2_67, %c1_68, %c0_69, %c0_70] : memref<3x3x12x8xbf16, #tpu.memory_space<vmem>>, vector<1x1x12x8xbf16>
      %74 = vector.shape_cast %73 : vector<1x1x12x8xbf16> to vector<12x8xbf16>
      %cst_71 = arith.constant dense<0.000000e+00> : vector<64x8xf32>
      %75 = tpu.matmul %72, %74, %cst_71 {dimension_numbers = #tpu.dot_dimension_numbers<[1], [0], [0], [1], [0, 0, 1, 1], [], []>} : vector<64x12xbf16>, vector<12x8xbf16>, vector<64x8xf32> -> vector<64x8xf32>
      %76 = arith.addf %68, %75 : vector<64x8xf32>
      %c2_i32_72 = arith.constant 2 : i32
      %77 = arith.addi %4, %c2_i32_72 : i32
      %c0_73 = arith.constant 0 : index
      %78 = arith.index_cast %77 : i32 to index
      %c16_74 = arith.constant 16 : index
      %c0_75 = arith.constant 0 : index
      %79 = vector.load %arg3[%c0_73, %78, %c16_74, %c0_75] : memref<1x10x80x12xbf16, #tpu.memory_space<vmem>>, vector<1x1x64x12xbf16>
      %80 = vector.shape_cast %79 : vector<1x1x64x12xbf16> to vector<64x12xbf16>
      %c2_76 = arith.constant 2 : index
      %c2_77 = arith.constant 2 : index
      %c0_78 = arith.constant 0 : index
      %c0_79 = arith.constant 0 : index
      %81 = vector.load %arg4[%c2_76, %c2_77, %c0_78, %c0_79] : memref<3x3x12x8xbf16, #tpu.memory_space<vmem>>, vector<1x1x12x8xbf16>
      %82 = vector.shape_cast %81 : vector<1x1x12x8xbf16> to vector<12x8xbf16>
      %cst_80 = arith.constant dense<0.000000e+00> : vector<64x8xf32>
      %83 = tpu.matmul %80, %82, %cst_80 {dimension_numbers = #tpu.dot_dimension_numbers<[1], [0], [0], [1], [0, 0, 1, 1], [], []>} : vector<64x12xbf16>, vector<12x8xbf16>, vector<64x8xf32> -> vector<64x8xf32>
      %84 = arith.addf %76, %83 : vector<64x8xf32>
      %c0_81 = arith.constant 0 : index
      %c0_82 = arith.constant 0 : index
      %85 = vector.load %arg5[%c0_81, %c0_82] : memref<1x8xf32, #tpu.memory_space<vmem>>, vector<1x8xf32>
      %86 = vector.broadcast %85 : vector<1x8xf32> to vector<64x8xf32>
      %87 = arith.mulf %84, %86 : vector<64x8xf32>
      %c0_83 = arith.constant 0 : index
      %c0_84 = arith.constant 0 : index
      %88 = vector.load %arg6[%c0_83, %c0_84] : memref<1x8xf32, #tpu.memory_space<vmem>>, vector<1x8xf32>
      %89 = vector.broadcast %88 : vector<1x8xf32> to vector<64x8xf32>
      %90 = arith.addf %87, %89 : vector<64x8xf32>
      %cst_85 = arith.constant 0.000000e+00 : f32
      %91 = vector.broadcast %cst_85 : f32 to vector<64x8xf32>
      %92 = arith.maximumf %90, %91 : vector<64x8xf32>
      %93 = arith.index_cast %6 : i32 to index
      %c8_86 = arith.constant 8 : index
      %94 = vector.load %arg15[%93, %c8_86] : memref<512x32xf32, #tpu.memory_space<vmem>>, vector<64x8xf32>
      tpu.vector_store %arg15[%93, %c8_86], %92 {strides = array<i32>} : memref<512x32xf32, #tpu.memory_space<vmem>>, vector<64x8xf32>,
      %cst_87 = arith.constant 0.000000e+00 : f32
      %95 = vector.broadcast %cst_87 : f32 to vector<64x8xf32>
      %c0_i32_88 = arith.constant 0 : i32
      %96 = arith.addi %4, %c0_i32_88 : i32
      %c0_89 = arith.constant 0 : index
      %97 = arith.index_cast %96 : i32 to index
      %c0_90 = arith.constant 0 : index
      %c0_91 = arith.constant 0 : index
      %98 = vector.load %arg7[%c0_89, %97, %c0_90, %c0_91] : memref<1x12x96x20xbf16, #tpu.memory_space<vmem>>, vector<1x1x64x20xbf16>
      %99 = vector.shape_cast %98 : vector<1x1x64x20xbf16> to vector<64x20xbf16>
      %c0_92 = arith.constant 0 : index
      %c0_93 = arith.constant 0 : index
      %c0_94 = arith.constant 0 : index
      %c0_95 = arith.constant 0 : index
      %100 = vector.load %arg8[%c0_92, %c0_93, %c0_94, %c0_95] : memref<5x5x20x8xbf16, #tpu.memory_space<vmem>>, vector<1x1x20x8xbf16>
      %101 = vector.shape_cast %100 : vector<1x1x20x8xbf16> to vector<20x8xbf16>
      %cst_96 = arith.constant dense<0.000000e+00> : vector<64x8xf32>
      %102 = tpu.matmul %99, %101, %cst_96 {dimension_numbers = #tpu.dot_dimension_numbers<[1], [0], [0], [1], [0, 0, 1, 1], [], []>} : vector<64x20xbf16>, vector<20x8xbf16>, vector<64x8xf32> -> vector<64x8xf32>
      %103 = arith.addf %95, %102 : vector<64x8xf32>
      %c0_i32_97 = arith.constant 0 : i32
      %104 = arith.addi %4, %c0_i32_97 : i32
      %c0_98 = arith.constant 0 : index
      %105 = arith.index_cast %104 : i32 to index
      %c8_99 = arith.constant 8 : index
      %c0_100 = arith.constant 0 : index
      %106 = vector.load %arg7[%c0_98, %105, %c8_99, %c0_100] : memref<1x12x96x20xbf16, #tpu.memory_space<vmem>>, vector<1x1x64x20xbf16>
      %107 = vector.shape_cast %106 : vector<1x1x64x20xbf16> to vector<64x20xbf16>
      %c0_101 = arith.constant 0 : index
      %c1_102 = arith.constant 1 : index
      %c0_103 = arith.constant 0 : index
      %c0_104 = arith.constant 0 : index
      %108 = vector.load %arg8[%c0_101, %c1_102, %c0_103, %c0_104] : memref<5x5x20x8xbf16, #tpu.memory_space<vmem>>, vector<1x1x20x8xbf16>
      %109 = vector.shape_cast %108 : vector<1x1x20x8xbf16> to vector<20x8xbf16>
      %cst_105 = arith.constant dense<0.000000e+00> : vector<64x8xf32>
      %110 = tpu.matmul %107, %109, %cst_105 {dimension_numbers = #tpu.dot_dimension_numbers<[1], [0], [0], [1], [0, 0, 1, 1], [], []>} : vector<64x20xbf16>, vector<20x8xbf16>, vector<64x8xf32> -> vector<64x8xf32>
      %111 = arith.addf %103, %110 : vector<64x8xf32>
      %c0_i32_106 = arith.constant 0 : i32
      %112 = arith.addi %4, %c0_i32_106 : i32
      %c0_107 = arith.constant 0 : index
      %113 = arith.index_cast %112 : i32 to index
      %c16_108 = arith.constant 16 : index
      %c0_109 = arith.constant 0 : index
      %114 = vector.load %arg7[%c0_107, %113, %c16_108, %c0_109] : memref<1x12x96x20xbf16, #tpu.memory_space<vmem>>, vector<1x1x64x20xbf16>
      %115 = vector.shape_cast %114 : vector<1x1x64x20xbf16> to vector<64x20xbf16>
      %c0_110 = arith.constant 0 : index
      %c2_111 = arith.constant 2 : index
      %c0_112 = arith.constant 0 : index
      %c0_113 = arith.constant 0 : index
      %116 = vector.load %arg8[%c0_110, %c2_111, %c0_112, %c0_113] : memref<5x5x20x8xbf16, #tpu.memory_space<vmem>>, vector<1x1x20x8xbf16>
      %117 = vector.shape_cast %116 : vector<1x1x20x8xbf16> to vector<20x8xbf16>
      %cst_114 = arith.constant dense<0.000000e+00> : vector<64x8xf32>
      %118 = tpu.matmul %115, %117, %cst_114 {dimension_numbers = #tpu.dot_dimension_numbers<[1], [0], [0], [1], [0, 0, 1, 1], [], []>} : vector<64x20xbf16>, vector<20x8xbf16>, vector<64x8xf32> -> vector<64x8xf32>
      %119 = arith.addf %111, %118 : vector<64x8xf32>
      %c0_i32_115 = arith.constant 0 : i32
      %120 = arith.addi %4, %c0_i32_115 : i32
      %c0_116 = arith.constant 0 : index
      %121 = arith.index_cast %120 : i32 to index
      %c24 = arith.constant 24 : index
      %c0_117 = arith.constant 0 : index
      %122 = vector.load %arg7[%c0_116, %121, %c24, %c0_117] : memref<1x12x96x20xbf16, #tpu.memory_space<vmem>>, vector<1x1x64x20xbf16>
      %123 = vector.shape_cast %122 : vector<1x1x64x20xbf16> to vector<64x20xbf16>
      %c0_118 = arith.constant 0 : index
      %c3 = arith.constant 3 : index
      %c0_119 = arith.constant 0 : index
      %c0_120 = arith.constant 0 : index
      %124 = vector.load %arg8[%c0_118, %c3, %c0_119, %c0_120] : memref<5x5x20x8xbf16, #tpu.memory_space<vmem>>, vector<1x1x20x8xbf16>
      %125 = vector.shape_cast %124 : vector<1x1x20x8xbf16> to vector<20x8xbf16>
      %cst_121 = arith.constant dense<0.000000e+00> : vector<64x8xf32>
      %126 = tpu.matmul %123, %125, %cst_121 {dimension_numbers = #tpu.dot_dimension_numbers<[1], [0], [0], [1], [0, 0, 1, 1], [], []>} : vector<64x20xbf16>, vector<20x8xbf16>, vector<64x8xf32> -> vector<64x8xf32>
      %127 = arith.addf %119, %126 : vector<64x8xf32>
      %c0_i32_122 = arith.constant 0 : i32
      %128 = arith.addi %4, %c0_i32_122 : i32
      %c0_123 = arith.constant 0 : index
      %129 = arith.index_cast %128 : i32 to index
      %c32 = arith.constant 32 : index
      %c0_124 = arith.constant 0 : index
      %130 = vector.load %arg7[%c0_123, %129, %c32, %c0_124] : memref<1x12x96x20xbf16, #tpu.memory_space<vmem>>, vector<1x1x64x20xbf16>
      %131 = vector.shape_cast %130 : vector<1x1x64x20xbf16> to vector<64x20xbf16>
      %c0_125 = arith.constant 0 : index
      %c4 = arith.constant 4 : index
      %c0_126 = arith.constant 0 : index
      %c0_127 = arith.constant 0 : index
      %132 = vector.load %arg8[%c0_125, %c4, %c0_126, %c0_127] : memref<5x5x20x8xbf16, #tpu.memory_space<vmem>>, vector<1x1x20x8xbf16>
      %133 = vector.shape_cast %132 : vector<1x1x20x8xbf16> to vector<20x8xbf16>
      %cst_128 = arith.constant dense<0.000000e+00> : vector<64x8xf32>
      %134 = tpu.matmul %131, %133, %cst_128 {dimension_numbers = #tpu.dot_dimension_numbers<[1], [0], [0], [1], [0, 0, 1, 1], [], []>} : vector<64x20xbf16>, vector<20x8xbf16>, vector<64x8xf32> -> vector<64x8xf32>
      %135 = arith.addf %127, %134 : vector<64x8xf32>
      %c1_i32_129 = arith.constant 1 : i32
      %136 = arith.addi %4, %c1_i32_129 : i32
      %c0_130 = arith.constant 0 : index
      %137 = arith.index_cast %136 : i32 to index
      %c0_131 = arith.constant 0 : index
      %c0_132 = arith.constant 0 : index
      %138 = vector.load %arg7[%c0_130, %137, %c0_131, %c0_132] : memref<1x12x96x20xbf16, #tpu.memory_space<vmem>>, vector<1x1x64x20xbf16>
      %139 = vector.shape_cast %138 : vector<1x1x64x20xbf16> to vector<64x20xbf16>
      %c1_133 = arith.constant 1 : index
      %c0_134 = arith.constant 0 : index
      %c0_135 = arith.constant 0 : index
      %c0_136 = arith.constant 0 : index
      %140 = vector.load %arg8[%c1_133, %c0_134, %c0_135, %c0_136] : memref<5x5x20x8xbf16, #tpu.memory_space<vmem>>, vector<1x1x20x8xbf16>
      %141 = vector.shape_cast %140 : vector<1x1x20x8xbf16> to vector<20x8xbf16>
      %cst_137 = arith.constant dense<0.000000e+00> : vector<64x8xf32>
      %142 = tpu.matmul %139, %141, %cst_137 {dimension_numbers = #tpu.dot_dimension_numbers<[1], [0], [0], [1], [0, 0, 1, 1], [], []>} : vector<64x20xbf16>, vector<20x8xbf16>, vector<64x8xf32> -> vector<64x8xf32>
      %143 = arith.addf %135, %142 : vector<64x8xf32>
      %c1_i32_138 = arith.constant 1 : i32
      %144 = arith.addi %4, %c1_i32_138 : i32
      %c0_139 = arith.constant 0 : index
      %145 = arith.index_cast %144 : i32 to index
      %c8_140 = arith.constant 8 : index
      %c0_141 = arith.constant 0 : index
      %146 = vector.load %arg7[%c0_139, %145, %c8_140, %c0_141] : memref<1x12x96x20xbf16, #tpu.memory_space<vmem>>, vector<1x1x64x20xbf16>
      %147 = vector.shape_cast %146 : vector<1x1x64x20xbf16> to vector<64x20xbf16>
      %c1_142 = arith.constant 1 : index
      %c1_143 = arith.constant 1 : index
      %c0_144 = arith.constant 0 : index
      %c0_145 = arith.constant 0 : index
      %148 = vector.load %arg8[%c1_142, %c1_143, %c0_144, %c0_145] : memref<5x5x20x8xbf16, #tpu.memory_space<vmem>>, vector<1x1x20x8xbf16>
      %149 = vector.shape_cast %148 : vector<1x1x20x8xbf16> to vector<20x8xbf16>
      %cst_146 = arith.constant dense<0.000000e+00> : vector<64x8xf32>
      %150 = tpu.matmul %147, %149, %cst_146 {dimension_numbers = #tpu.dot_dimension_numbers<[1], [0], [0], [1], [0, 0, 1, 1], [], []>} : vector<64x20xbf16>, vector<20x8xbf16>, vector<64x8xf32> -> vector<64x8xf32>
      %151 = arith.addf %143, %150 : vector<64x8xf32>
      %c1_i32_147 = arith.constant 1 : i32
      %152 = arith.addi %4, %c1_i32_147 : i32
      %c0_148 = arith.constant 0 : index
      %153 = arith.index_cast %152 : i32 to index
      %c16_149 = arith.constant 16 : index
      %c0_150 = arith.constant 0 : index
      %154 = vector.load %arg7[%c0_148, %153, %c16_149, %c0_150] : memref<1x12x96x20xbf16, #tpu.memory_space<vmem>>, vector<1x1x64x20xbf16>
      %155 = vector.shape_cast %154 : vector<1x1x64x20xbf16> to vector<64x20xbf16>
      %c1_151 = arith.constant 1 : index
      %c2_152 = arith.constant 2 : index
      %c0_153 = arith.constant 0 : index
      %c0_154 = arith.constant 0 : index
      %156 = vector.load %arg8[%c1_151, %c2_152, %c0_153, %c0_154] : memref<5x5x20x8xbf16, #tpu.memory_space<vmem>>, vector<1x1x20x8xbf16>
      %157 = vector.shape_cast %156 : vector<1x1x20x8xbf16> to vector<20x8xbf16>
      %cst_155 = arith.constant dense<0.000000e+00> : vector<64x8xf32>
      %158 = tpu.matmul %155, %157, %cst_155 {dimension_numbers = #tpu.dot_dimension_numbers<[1], [0], [0], [1], [0, 0, 1, 1], [], []>} : vector<64x20xbf16>, vector<20x8xbf16>, vector<64x8xf32> -> vector<64x8xf32>
      %159 = arith.addf %151, %158 : vector<64x8xf32>
      %c1_i32_156 = arith.constant 1 : i32
      %160 = arith.addi %4, %c1_i32_156 : i32
      %c0_157 = arith.constant 0 : index
      %161 = arith.index_cast %160 : i32 to index
      %c24_158 = arith.constant 24 : index
      %c0_159 = arith.constant 0 : index
      %162 = vector.load %arg7[%c0_157, %161, %c24_158, %c0_159] : memref<1x12x96x20xbf16, #tpu.memory_space<vmem>>, vector<1x1x64x20xbf16>
      %163 = vector.shape_cast %162 : vector<1x1x64x20xbf16> to vector<64x20xbf16>
      %c1_160 = arith.constant 1 : index
      %c3_161 = arith.constant 3 : index
      %c0_162 = arith.constant 0 : index
      %c0_163 = arith.constant 0 : index
      %164 = vector.load %arg8[%c1_160, %c3_161, %c0_162, %c0_163] : memref<5x5x20x8xbf16, #tpu.memory_space<vmem>>, vector<1x1x20x8xbf16>
      %165 = vector.shape_cast %164 : vector<1x1x20x8xbf16> to vector<20x8xbf16>
      %cst_164 = arith.constant dense<0.000000e+00> : vector<64x8xf32>
      %166 = tpu.matmul %163, %165, %cst_164 {dimension_numbers = #tpu.dot_dimension_numbers<[1], [0], [0], [1], [0, 0, 1, 1], [], []>} : vector<64x20xbf16>, vector<20x8xbf16>, vector<64x8xf32> -> vector<64x8xf32>
      %167 = arith.addf %159, %166 : vector<64x8xf32>
      %c1_i32_165 = arith.constant 1 : i32
      %168 = arith.addi %4, %c1_i32_165 : i32
      %c0_166 = arith.constant 0 : index
      %169 = arith.index_cast %168 : i32 to index
      %c32_167 = arith.constant 32 : index
      %c0_168 = arith.constant 0 : index
      %170 = vector.load %arg7[%c0_166, %169, %c32_167, %c0_168] : memref<1x12x96x20xbf16, #tpu.memory_space<vmem>>, vector<1x1x64x20xbf16>
      %171 = vector.shape_cast %170 : vector<1x1x64x20xbf16> to vector<64x20xbf16>
      %c1_169 = arith.constant 1 : index
      %c4_170 = arith.constant 4 : index
      %c0_171 = arith.constant 0 : index
      %c0_172 = arith.constant 0 : index
      %172 = vector.load %arg8[%c1_169, %c4_170, %c0_171, %c0_172] : memref<5x5x20x8xbf16, #tpu.memory_space<vmem>>, vector<1x1x20x8xbf16>
      %173 = vector.shape_cast %172 : vector<1x1x20x8xbf16> to vector<20x8xbf16>
      %cst_173 = arith.constant dense<0.000000e+00> : vector<64x8xf32>
      %174 = tpu.matmul %171, %173, %cst_173 {dimension_numbers = #tpu.dot_dimension_numbers<[1], [0], [0], [1], [0, 0, 1, 1], [], []>} : vector<64x20xbf16>, vector<20x8xbf16>, vector<64x8xf32> -> vector<64x8xf32>
      %175 = arith.addf %167, %174 : vector<64x8xf32>
      %c2_i32_174 = arith.constant 2 : i32
      %176 = arith.addi %4, %c2_i32_174 : i32
      %c0_175 = arith.constant 0 : index
      %177 = arith.index_cast %176 : i32 to index
      %c0_176 = arith.constant 0 : index
      %c0_177 = arith.constant 0 : index
      %178 = vector.load %arg7[%c0_175, %177, %c0_176, %c0_177] : memref<1x12x96x20xbf16, #tpu.memory_space<vmem>>, vector<1x1x64x20xbf16>
      %179 = vector.shape_cast %178 : vector<1x1x64x20xbf16> to vector<64x20xbf16>
      %c2_178 = arith.constant 2 : index
      %c0_179 = arith.constant 0 : index
      %c0_180 = arith.constant 0 : index
      %c0_181 = arith.constant 0 : index
      %180 = vector.load %arg8[%c2_178, %c0_179, %c0_180, %c0_181] : memref<5x5x20x8xbf16, #tpu.memory_space<vmem>>, vector<1x1x20x8xbf16>
      %181 = vector.shape_cast %180 : vector<1x1x20x8xbf16> to vector<20x8xbf16>
      %cst_182 = arith.constant dense<0.000000e+00> : vector<64x8xf32>
      %182 = tpu.matmul %179, %181, %cst_182 {dimension_numbers = #tpu.dot_dimension_numbers<[1], [0], [0], [1], [0, 0, 1, 1], [], []>} : vector<64x20xbf16>, vector<20x8xbf16>, vector<64x8xf32> -> vector<64x8xf32>
      %183 = arith.addf %175, %182 : vector<64x8xf32>
      %c2_i32_183 = arith.constant 2 : i32
      %184 = arith.addi %4, %c2_i32_183 : i32
      %c0_184 = arith.constant 0 : index
      %185 = arith.index_cast %184 : i32 to index
      %c8_185 = arith.constant 8 : index
      %c0_186 = arith.constant 0 : index
      %186 = vector.load %arg7[%c0_184, %185, %c8_185, %c0_186] : memref<1x12x96x20xbf16, #tpu.memory_space<vmem>>, vector<1x1x64x20xbf16>
      %187 = vector.shape_cast %186 : vector<1x1x64x20xbf16> to vector<64x20xbf16>
      %c2_187 = arith.constant 2 : index
      %c1_188 = arith.constant 1 : index
      %c0_189 = arith.constant 0 : index
      %c0_190 = arith.constant 0 : index
      %188 = vector.load %arg8[%c2_187, %c1_188, %c0_189, %c0_190] : memref<5x5x20x8xbf16, #tpu.memory_space<vmem>>, vector<1x1x20x8xbf16>
      %189 = vector.shape_cast %188 : vector<1x1x20x8xbf16> to vector<20x8xbf16>
      %cst_191 = arith.constant dense<0.000000e+00> : vector<64x8xf32>
      %190 = tpu.matmul %187, %189, %cst_191 {dimension_numbers = #tpu.dot_dimension_numbers<[1], [0], [0], [1], [0, 0, 1, 1], [], []>} : vector<64x20xbf16>, vector<20x8xbf16>, vector<64x8xf32> -> vector<64x8xf32>
      %191 = arith.addf %183, %190 : vector<64x8xf32>
      %c2_i32_192 = arith.constant 2 : i32
      %192 = arith.addi %4, %c2_i32_192 : i32
      %c0_193 = arith.constant 0 : index
      %193 = arith.index_cast %192 : i32 to index
      %c16_194 = arith.constant 16 : index
      %c0_195 = arith.constant 0 : index
      %194 = vector.load %arg7[%c0_193, %193, %c16_194, %c0_195] : memref<1x12x96x20xbf16, #tpu.memory_space<vmem>>, vector<1x1x64x20xbf16>
      %195 = vector.shape_cast %194 : vector<1x1x64x20xbf16> to vector<64x20xbf16>
      %c2_196 = arith.constant 2 : index
      %c2_197 = arith.constant 2 : index
      %c0_198 = arith.constant 0 : index
      %c0_199 = arith.constant 0 : index
      %196 = vector.load %arg8[%c2_196, %c2_197, %c0_198, %c0_199] : memref<5x5x20x8xbf16, #tpu.memory_space<vmem>>, vector<1x1x20x8xbf16>
      %197 = vector.shape_cast %196 : vector<1x1x20x8xbf16> to vector<20x8xbf16>
      %cst_200 = arith.constant dense<0.000000e+00> : vector<64x8xf32>
      %198 = tpu.matmul %195, %197, %cst_200 {dimension_numbers = #tpu.dot_dimension_numbers<[1], [0], [0], [1], [0, 0, 1, 1], [], []>} : vector<64x20xbf16>, vector<20x8xbf16>, vector<64x8xf32> -> vector<64x8xf32>
      %199 = arith.addf %191, %198 : vector<64x8xf32>
      %c2_i32_201 = arith.constant 2 : i32
      %200 = arith.addi %4, %c2_i32_201 : i32
      %c0_202 = arith.constant 0 : index
      %201 = arith.index_cast %200 : i32 to index
      %c24_203 = arith.constant 24 : index
      %c0_204 = arith.constant 0 : index
      %202 = vector.load %arg7[%c0_202, %201, %c24_203, %c0_204] : memref<1x12x96x20xbf16, #tpu.memory_space<vmem>>, vector<1x1x64x20xbf16>
      %203 = vector.shape_cast %202 : vector<1x1x64x20xbf16> to vector<64x20xbf16>
      %c2_205 = arith.constant 2 : index
      %c3_206 = arith.constant 3 : index
      %c0_207 = arith.constant 0 : index
      %c0_208 = arith.constant 0 : index
      %204 = vector.load %arg8[%c2_205, %c3_206, %c0_207, %c0_208] : memref<5x5x20x8xbf16, #tpu.memory_space<vmem>>, vector<1x1x20x8xbf16>
      %205 = vector.shape_cast %204 : vector<1x1x20x8xbf16> to vector<20x8xbf16>
      %cst_209 = arith.constant dense<0.000000e+00> : vector<64x8xf32>
      %206 = tpu.matmul %203, %205, %cst_209 {dimension_numbers = #tpu.dot_dimension_numbers<[1], [0], [0], [1], [0, 0, 1, 1], [], []>} : vector<64x20xbf16>, vector<20x8xbf16>, vector<64x8xf32> -> vector<64x8xf32>
      %207 = arith.addf %199, %206 : vector<64x8xf32>
      %c2_i32_210 = arith.constant 2 : i32
      %208 = arith.addi %4, %c2_i32_210 : i32
      %c0_211 = arith.constant 0 : index
      %209 = arith.index_cast %208 : i32 to index
      %c32_212 = arith.constant 32 : index
      %c0_213 = arith.constant 0 : index
      %210 = vector.load %arg7[%c0_211, %209, %c32_212, %c0_213] : memref<1x12x96x20xbf16, #tpu.memory_space<vmem>>, vector<1x1x64x20xbf16>
      %211 = vector.shape_cast %210 : vector<1x1x64x20xbf16> to vector<64x20xbf16>
      %c2_214 = arith.constant 2 : index
      %c4_215 = arith.constant 4 : index
      %c0_216 = arith.constant 0 : index
      %c0_217 = arith.constant 0 : index
      %212 = vector.load %arg8[%c2_214, %c4_215, %c0_216, %c0_217] : memref<5x5x20x8xbf16, #tpu.memory_space<vmem>>, vector<1x1x20x8xbf16>
      %213 = vector.shape_cast %212 : vector<1x1x20x8xbf16> to vector<20x8xbf16>
      %cst_218 = arith.constant dense<0.000000e+00> : vector<64x8xf32>
      %214 = tpu.matmul %211, %213, %cst_218 {dimension_numbers = #tpu.dot_dimension_numbers<[1], [0], [0], [1], [0, 0, 1, 1], [], []>} : vector<64x20xbf16>, vector<20x8xbf16>, vector<64x8xf32> -> vector<64x8xf32>
      %215 = arith.addf %207, %214 : vector<64x8xf32>
      %c3_i32 = arith.constant 3 : i32
      %216 = arith.addi %4, %c3_i32 : i32
      %c0_219 = arith.constant 0 : index
      %217 = arith.index_cast %216 : i32 to index
      %c0_220 = arith.constant 0 : index
      %c0_221 = arith.constant 0 : index
      %218 = vector.load %arg7[%c0_219, %217, %c0_220, %c0_221] : memref<1x12x96x20xbf16, #tpu.memory_space<vmem>>, vector<1x1x64x20xbf16>
      %219 = vector.shape_cast %218 : vector<1x1x64x20xbf16> to vector<64x20xbf16>
      %c3_222 = arith.constant 3 : index
      %c0_223 = arith.constant 0 : index
      %c0_224 = arith.constant 0 : index
      %c0_225 = arith.constant 0 : index
      %220 = vector.load %arg8[%c3_222, %c0_223, %c0_224, %c0_225] : memref<5x5x20x8xbf16, #tpu.memory_space<vmem>>, vector<1x1x20x8xbf16>
      %221 = vector.shape_cast %220 : vector<1x1x20x8xbf16> to vector<20x8xbf16>
      %cst_226 = arith.constant dense<0.000000e+00> : vector<64x8xf32>
      %222 = tpu.matmul %219, %221, %cst_226 {dimension_numbers = #tpu.dot_dimension_numbers<[1], [0], [0], [1], [0, 0, 1, 1], [], []>} : vector<64x20xbf16>, vector<20x8xbf16>, vector<64x8xf32> -> vector<64x8xf32>
      %223 = arith.addf %215, %222 : vector<64x8xf32>
      %c3_i32_227 = arith.constant 3 : i32
      %224 = arith.addi %4, %c3_i32_227 : i32
      %c0_228 = arith.constant 0 : index
      %225 = arith.index_cast %224 : i32 to index
      %c8_229 = arith.constant 8 : index
      %c0_230 = arith.constant 0 : index
      %226 = vector.load %arg7[%c0_228, %225, %c8_229, %c0_230] : memref<1x12x96x20xbf16, #tpu.memory_space<vmem>>, vector<1x1x64x20xbf16>
      %227 = vector.shape_cast %226 : vector<1x1x64x20xbf16> to vector<64x20xbf16>
      %c3_231 = arith.constant 3 : index
      %c1_232 = arith.constant 1 : index
      %c0_233 = arith.constant 0 : index
      %c0_234 = arith.constant 0 : index
      %228 = vector.load %arg8[%c3_231, %c1_232, %c0_233, %c0_234] : memref<5x5x20x8xbf16, #tpu.memory_space<vmem>>, vector<1x1x20x8xbf16>
      %229 = vector.shape_cast %228 : vector<1x1x20x8xbf16> to vector<20x8xbf16>
      %cst_235 = arith.constant dense<0.000000e+00> : vector<64x8xf32>
      %230 = tpu.matmul %227, %229, %cst_235 {dimension_numbers = #tpu.dot_dimension_numbers<[1], [0], [0], [1], [0, 0, 1, 1], [], []>} : vector<64x20xbf16>, vector<20x8xbf16>, vector<64x8xf32> -> vector<64x8xf32>
      %231 = arith.addf %223, %230 : vector<64x8xf32>
      %c3_i32_236 = arith.constant 3 : i32
      %232 = arith.addi %4, %c3_i32_236 : i32
      %c0_237 = arith.constant 0 : index
      %233 = arith.index_cast %232 : i32 to index
      %c16_238 = arith.constant 16 : index
      %c0_239 = arith.constant 0 : index
      %234 = vector.load %arg7[%c0_237, %233, %c16_238, %c0_239] : memref<1x12x96x20xbf16, #tpu.memory_space<vmem>>, vector<1x1x64x20xbf16>
      %235 = vector.shape_cast %234 : vector<1x1x64x20xbf16> to vector<64x20xbf16>
      %c3_240 = arith.constant 3 : index
      %c2_241 = arith.constant 2 : index
      %c0_242 = arith.constant 0 : index
      %c0_243 = arith.constant 0 : index
      %236 = vector.load %arg8[%c3_240, %c2_241, %c0_242, %c0_243] : memref<5x5x20x8xbf16, #tpu.memory_space<vmem>>, vector<1x1x20x8xbf16>
      %237 = vector.shape_cast %236 : vector<1x1x20x8xbf16> to vector<20x8xbf16>
      %cst_244 = arith.constant dense<0.000000e+00> : vector<64x8xf32>
      %238 = tpu.matmul %235, %237, %cst_244 {dimension_numbers = #tpu.dot_dimension_numbers<[1], [0], [0], [1], [0, 0, 1, 1], [], []>} : vector<64x20xbf16>, vector<20x8xbf16>, vector<64x8xf32> -> vector<64x8xf32>
      %239 = arith.addf %231, %238 : vector<64x8xf32>
      %c3_i32_245 = arith.constant 3 : i32
      %240 = arith.addi %4, %c3_i32_245 : i32
      %c0_246 = arith.constant 0 : index
      %241 = arith.index_cast %240 : i32 to index
      %c24_247 = arith.constant 24 : index
      %c0_248 = arith.constant 0 : index
      %242 = vector.load %arg7[%c0_246, %241, %c24_247, %c0_248] : memref<1x12x96x20xbf16, #tpu.memory_space<vmem>>, vector<1x1x64x20xbf16>
      %243 = vector.shape_cast %242 : vector<1x1x64x20xbf16> to vector<64x20xbf16>
      %c3_249 = arith.constant 3 : index
      %c3_250 = arith.constant 3 : index
      %c0_251 = arith.constant 0 : index
      %c0_252 = arith.constant 0 : index
      %244 = vector.load %arg8[%c3_249, %c3_250, %c0_251, %c0_252] : memref<5x5x20x8xbf16, #tpu.memory_space<vmem>>, vector<1x1x20x8xbf16>
      %245 = vector.shape_cast %244 : vector<1x1x20x8xbf16> to vector<20x8xbf16>
      %cst_253 = arith.constant dense<0.000000e+00> : vector<64x8xf32>
      %246 = tpu.matmul %243, %245, %cst_253 {dimension_numbers = #tpu.dot_dimension_numbers<[1], [0], [0], [1], [0, 0, 1, 1], [], []>} : vector<64x20xbf16>, vector<20x8xbf16>, vector<64x8xf32> -> vector<64x8xf32>
      %247 = arith.addf %239, %246 : vector<64x8xf32>
      %c3_i32_254 = arith.constant 3 : i32
      %248 = arith.addi %4, %c3_i32_254 : i32
      %c0_255 = arith.constant 0 : index
      %249 = arith.index_cast %248 : i32 to index
      %c32_256 = arith.constant 32 : index
      %c0_257 = arith.constant 0 : index
      %250 = vector.load %arg7[%c0_255, %249, %c32_256, %c0_257] : memref<1x12x96x20xbf16, #tpu.memory_space<vmem>>, vector<1x1x64x20xbf16>
      %251 = vector.shape_cast %250 : vector<1x1x64x20xbf16> to vector<64x20xbf16>
      %c3_258 = arith.constant 3 : index
      %c4_259 = arith.constant 4 : index
      %c0_260 = arith.constant 0 : index
      %c0_261 = arith.constant 0 : index
      %252 = vector.load %arg8[%c3_258, %c4_259, %c0_260, %c0_261] : memref<5x5x20x8xbf16, #tpu.memory_space<vmem>>, vector<1x1x20x8xbf16>
      %253 = vector.shape_cast %252 : vector<1x1x20x8xbf16> to vector<20x8xbf16>
      %cst_262 = arith.constant dense<0.000000e+00> : vector<64x8xf32>
      %254 = tpu.matmul %251, %253, %cst_262 {dimension_numbers = #tpu.dot_dimension_numbers<[1], [0], [0], [1], [0, 0, 1, 1], [], []>} : vector<64x20xbf16>, vector<20x8xbf16>, vector<64x8xf32> -> vector<64x8xf32>
      %255 = arith.addf %247, %254 : vector<64x8xf32>
      %c4_i32 = arith.constant 4 : i32
      %256 = arith.addi %4, %c4_i32 : i32
      %c0_263 = arith.constant 0 : index
      %257 = arith.index_cast %256 : i32 to index
      %c0_264 = arith.constant 0 : index
      %c0_265 = arith.constant 0 : index
      %258 = vector.load %arg7[%c0_263, %257, %c0_264, %c0_265] : memref<1x12x96x20xbf16, #tpu.memory_space<vmem>>, vector<1x1x64x20xbf16>
      %259 = vector.shape_cast %258 : vector<1x1x64x20xbf16> to vector<64x20xbf16>
      %c4_266 = arith.constant 4 : index
      %c0_267 = arith.constant 0 : index
      %c0_268 = arith.constant 0 : index
      %c0_269 = arith.constant 0 : index
      %260 = vector.load %arg8[%c4_266, %c0_267, %c0_268, %c0_269] : memref<5x5x20x8xbf16, #tpu.memory_space<vmem>>, vector<1x1x20x8xbf16>
      %261 = vector.shape_cast %260 : vector<1x1x20x8xbf16> to vector<20x8xbf16>
      %cst_270 = arith.constant dense<0.000000e+00> : vector<64x8xf32>
      %262 = tpu.matmul %259, %261, %cst_270 {dimension_numbers = #tpu.dot_dimension_numbers<[1], [0], [0], [1], [0, 0, 1, 1], [], []>} : vector<64x20xbf16>, vector<20x8xbf16>, vector<64x8xf32> -> vector<64x8xf32>
      %263 = arith.addf %255, %262 : vector<64x8xf32>
      %c4_i32_271 = arith.constant 4 : i32
      %264 = arith.addi %4, %c4_i32_271 : i32
      %c0_272 = arith.constant 0 : index
      %265 = arith.index_cast %264 : i32 to index
      %c8_273 = arith.constant 8 : index
      %c0_274 = arith.constant 0 : index
      %266 = vector.load %arg7[%c0_272, %265, %c8_273, %c0_274] : memref<1x12x96x20xbf16, #tpu.memory_space<vmem>>, vector<1x1x64x20xbf16>
      %267 = vector.shape_cast %266 : vector<1x1x64x20xbf16> to vector<64x20xbf16>
      %c4_275 = arith.constant 4 : index
      %c1_276 = arith.constant 1 : index
      %c0_277 = arith.constant 0 : index
      %c0_278 = arith.constant 0 : index
      %268 = vector.load %arg8[%c4_275, %c1_276, %c0_277, %c0_278] : memref<5x5x20x8xbf16, #tpu.memory_space<vmem>>, vector<1x1x20x8xbf16>
      %269 = vector.shape_cast %268 : vector<1x1x20x8xbf16> to vector<20x8xbf16>
      %cst_279 = arith.constant dense<0.000000e+00> : vector<64x8xf32>
      %270 = tpu.matmul %267, %269, %cst_279 {dimension_numbers = #tpu.dot_dimension_numbers<[1], [0], [0], [1], [0, 0, 1, 1], [], []>} : vector<64x20xbf16>, vector<20x8xbf16>, vector<64x8xf32> -> vector<64x8xf32>
      %271 = arith.addf %263, %270 : vector<64x8xf32>
      %c4_i32_280 = arith.constant 4 : i32
      %272 = arith.addi %4, %c4_i32_280 : i32
      %c0_281 = arith.constant 0 : index
      %273 = arith.index_cast %272 : i32 to index
      %c16_282 = arith.constant 16 : index
      %c0_283 = arith.constant 0 : index
      %274 = vector.load %arg7[%c0_281, %273, %c16_282, %c0_283] : memref<1x12x96x20xbf16, #tpu.memory_space<vmem>>, vector<1x1x64x20xbf16>
      %275 = vector.shape_cast %274 : vector<1x1x64x20xbf16> to vector<64x20xbf16>
      %c4_284 = arith.constant 4 : index
      %c2_285 = arith.constant 2 : index
      %c0_286 = arith.constant 0 : index
      %c0_287 = arith.constant 0 : index
      %276 = vector.load %arg8[%c4_284, %c2_285, %c0_286, %c0_287] : memref<5x5x20x8xbf16, #tpu.memory_space<vmem>>, vector<1x1x20x8xbf16>
      %277 = vector.shape_cast %276 : vector<1x1x20x8xbf16> to vector<20x8xbf16>
      %cst_288 = arith.constant dense<0.000000e+00> : vector<64x8xf32>
      %278 = tpu.matmul %275, %277, %cst_288 {dimension_numbers = #tpu.dot_dimension_numbers<[1], [0], [0], [1], [0, 0, 1, 1], [], []>} : vector<64x20xbf16>, vector<20x8xbf16>, vector<64x8xf32> -> vector<64x8xf32>
      %279 = arith.addf %271, %278 : vector<64x8xf32>
      %c4_i32_289 = arith.constant 4 : i32
      %280 = arith.addi %4, %c4_i32_289 : i32
      %c0_290 = arith.constant 0 : index
      %281 = arith.index_cast %280 : i32 to index
      %c24_291 = arith.constant 24 : index
      %c0_292 = arith.constant 0 : index
      %282 = vector.load %arg7[%c0_290, %281, %c24_291, %c0_292] : memref<1x12x96x20xbf16, #tpu.memory_space<vmem>>, vector<1x1x64x20xbf16>
      %283 = vector.shape_cast %282 : vector<1x1x64x20xbf16> to vector<64x20xbf16>
      %c4_293 = arith.constant 4 : index
      %c3_294 = arith.constant 3 : index
      %c0_295 = arith.constant 0 : index
      %c0_296 = arith.constant 0 : index
      %284 = vector.load %arg8[%c4_293, %c3_294, %c0_295, %c0_296] : memref<5x5x20x8xbf16, #tpu.memory_space<vmem>>, vector<1x1x20x8xbf16>
      %285 = vector.shape_cast %284 : vector<1x1x20x8xbf16> to vector<20x8xbf16>
      %cst_297 = arith.constant dense<0.000000e+00> : vector<64x8xf32>
      %286 = tpu.matmul %283, %285, %cst_297 {dimension_numbers = #tpu.dot_dimension_numbers<[1], [0], [0], [1], [0, 0, 1, 1], [], []>} : vector<64x20xbf16>, vector<20x8xbf16>, vector<64x8xf32> -> vector<64x8xf32>
      %287 = arith.addf %279, %286 : vector<64x8xf32>
      %c4_i32_298 = arith.constant 4 : i32
      %288 = arith.addi %4, %c4_i32_298 : i32
      %c0_299 = arith.constant 0 : index
      %289 = arith.index_cast %288 : i32 to index
      %c32_300 = arith.constant 32 : index
      %c0_301 = arith.constant 0 : index
      %290 = vector.load %arg7[%c0_299, %289, %c32_300, %c0_301] : memref<1x12x96x20xbf16, #tpu.memory_space<vmem>>, vector<1x1x64x20xbf16>
      %291 = vector.shape_cast %290 : vector<1x1x64x20xbf16> to vector<64x20xbf16>
      %c4_302 = arith.constant 4 : index
      %c4_303 = arith.constant 4 : index
      %c0_304 = arith.constant 0 : index
      %c0_305 = arith.constant 0 : index
      %292 = vector.load %arg8[%c4_302, %c4_303, %c0_304, %c0_305] : memref<5x5x20x8xbf16, #tpu.memory_space<vmem>>, vector<1x1x20x8xbf16>
      %293 = vector.shape_cast %292 : vector<1x1x20x8xbf16> to vector<20x8xbf16>
      %cst_306 = arith.constant dense<0.000000e+00> : vector<64x8xf32>
      %294 = tpu.matmul %291, %293, %cst_306 {dimension_numbers = #tpu.dot_dimension_numbers<[1], [0], [0], [1], [0, 0, 1, 1], [], []>} : vector<64x20xbf16>, vector<20x8xbf16>, vector<64x8xf32> -> vector<64x8xf32>
      %295 = arith.addf %287, %294 : vector<64x8xf32>
      %c0_307 = arith.constant 0 : index
      %c0_308 = arith.constant 0 : index
      %296 = vector.load %arg9[%c0_307, %c0_308] : memref<1x8xf32, #tpu.memory_space<vmem>>, vector<1x8xf32>
      %297 = vector.broadcast %296 : vector<1x8xf32> to vector<64x8xf32>
      %298 = arith.mulf %295, %297 : vector<64x8xf32>
      %c0_309 = arith.constant 0 : index
      %c0_310 = arith.constant 0 : index
      %299 = vector.load %arg10[%c0_309, %c0_310] : memref<1x8xf32, #tpu.memory_space<vmem>>, vector<1x8xf32>
      %300 = vector.broadcast %299 : vector<1x8xf32> to vector<64x8xf32>
      %301 = arith.addf %298, %300 : vector<64x8xf32>
      %cst_311 = arith.constant 0.000000e+00 : f32
      %302 = vector.broadcast %cst_311 : f32 to vector<64x8xf32>
      %303 = arith.maximumf %301, %302 : vector<64x8xf32>
      %304 = arith.index_cast %6 : i32 to index
      %c16_312 = arith.constant 16 : index
      %305 = vector.load %arg15[%304, %c16_312] : memref<512x32xf32, #tpu.memory_space<vmem>>, vector<64x8xf32>
      tpu.vector_store %arg15[%304, %c16_312], %303 {strides = array<i32>} : memref<512x32xf32, #tpu.memory_space<vmem>>, vector<64x8xf32>,
      %c0_313 = arith.constant 0 : index
      %306 = arith.index_cast %4 : i32 to index
      %c0_314 = arith.constant 0 : index
      %c0_315 = arith.constant 0 : index
      %307 = vector.load %arg11[%c0_313, %306, %c0_314, %c0_315] : memref<1x10x80x4xbf16, #tpu.memory_space<vmem>>, vector<1x1x64x4xbf16>
      %308 = vector.shape_cast %307 : vector<1x1x64x4xbf16> to vector<64x4xbf16>
      %c0_i32_316 = arith.constant 0 : i32
      %309 = arith.addi %4, %c0_i32_316 : i32
      %c0_317 = arith.constant 0 : index
      %310 = arith.index_cast %309 : i32 to index
      %c8_318 = arith.constant 8 : index
      %c0_319 = arith.constant 0 : index
      %311 = vector.load %arg11[%c0_317, %310, %c8_318, %c0_319] : memref<1x10x80x4xbf16, #tpu.memory_space<vmem>>, vector<1x1x64x4xbf16>
      %312 = vector.shape_cast %311 : vector<1x1x64x4xbf16> to vector<64x4xbf16>
      %313 = arith.maximumf %308, %312 : vector<64x4xbf16>
      %c0_i32_320 = arith.constant 0 : i32
      %314 = arith.addi %4, %c0_i32_320 : i32
      %c0_321 = arith.constant 0 : index
      %315 = arith.index_cast %314 : i32 to index
      %c16_322 = arith.constant 16 : index
      %c0_323 = arith.constant 0 : index
      %316 = vector.load %arg11[%c0_321, %315, %c16_322, %c0_323] : memref<1x10x80x4xbf16, #tpu.memory_space<vmem>>, vector<1x1x64x4xbf16>
      %317 = vector.shape_cast %316 : vector<1x1x64x4xbf16> to vector<64x4xbf16>
      %318 = arith.maximumf %313, %317 : vector<64x4xbf16>
      %c1_i32_324 = arith.constant 1 : i32
      %319 = arith.addi %4, %c1_i32_324 : i32
      %c0_325 = arith.constant 0 : index
      %320 = arith.index_cast %319 : i32 to index
      %c0_326 = arith.constant 0 : index
      %c0_327 = arith.constant 0 : index
      %321 = vector.load %arg11[%c0_325, %320, %c0_326, %c0_327] : memref<1x10x80x4xbf16, #tpu.memory_space<vmem>>, vector<1x1x64x4xbf16>
      %322 = vector.shape_cast %321 : vector<1x1x64x4xbf16> to vector<64x4xbf16>
      %323 = arith.maximumf %318, %322 : vector<64x4xbf16>
      %c1_i32_328 = arith.constant 1 : i32
      %324 = arith.addi %4, %c1_i32_328 : i32
      %c0_329 = arith.constant 0 : index
      %325 = arith.index_cast %324 : i32 to index
      %c8_330 = arith.constant 8 : index
      %c0_331 = arith.constant 0 : index
      %326 = vector.load %arg11[%c0_329, %325, %c8_330, %c0_331] : memref<1x10x80x4xbf16, #tpu.memory_space<vmem>>, vector<1x1x64x4xbf16>
      %327 = vector.shape_cast %326 : vector<1x1x64x4xbf16> to vector<64x4xbf16>
      %328 = arith.maximumf %323, %327 : vector<64x4xbf16>
      %c1_i32_332 = arith.constant 1 : i32
      %329 = arith.addi %4, %c1_i32_332 : i32
      %c0_333 = arith.constant 0 : index
      %330 = arith.index_cast %329 : i32 to index
      %c16_334 = arith.constant 16 : index
      %c0_335 = arith.constant 0 : index
      %331 = vector.load %arg11[%c0_333, %330, %c16_334, %c0_335] : memref<1x10x80x4xbf16, #tpu.memory_space<vmem>>, vector<1x1x64x4xbf16>
      %332 = vector.shape_cast %331 : vector<1x1x64x4xbf16> to vector<64x4xbf16>
      %333 = arith.maximumf %328, %332 : vector<64x4xbf16>
      %c2_i32_336 = arith.constant 2 : i32
      %334 = arith.addi %4, %c2_i32_336 : i32
      %c0_337 = arith.constant 0 : index
      %335 = arith.index_cast %334 : i32 to index
      %c0_338 = arith.constant 0 : index
      %c0_339 = arith.constant 0 : index
      %336 = vector.load %arg11[%c0_337, %335, %c0_338, %c0_339] : memref<1x10x80x4xbf16, #tpu.memory_space<vmem>>, vector<1x1x64x4xbf16>
      %337 = vector.shape_cast %336 : vector<1x1x64x4xbf16> to vector<64x4xbf16>
      %338 = arith.maximumf %333, %337 : vector<64x4xbf16>
      %c2_i32_340 = arith.constant 2 : i32
      %339 = arith.addi %4, %c2_i32_340 : i32
      %c0_341 = arith.constant 0 : index
      %340 = arith.index_cast %339 : i32 to index
      %c8_342 = arith.constant 8 : index
      %c0_343 = arith.constant 0 : index
      %341 = vector.load %arg11[%c0_341, %340, %c8_342, %c0_343] : memref<1x10x80x4xbf16, #tpu.memory_space<vmem>>, vector<1x1x64x4xbf16>
      %342 = vector.shape_cast %341 : vector<1x1x64x4xbf16> to vector<64x4xbf16>
      %343 = arith.maximumf %338, %342 : vector<64x4xbf16>
      %c2_i32_344 = arith.constant 2 : i32
      %344 = arith.addi %4, %c2_i32_344 : i32
      %c0_345 = arith.constant 0 : index
      %345 = arith.index_cast %344 : i32 to index
      %c16_346 = arith.constant 16 : index
      %c0_347 = arith.constant 0 : index
      %346 = vector.load %arg11[%c0_345, %345, %c16_346, %c0_347] : memref<1x10x80x4xbf16, #tpu.memory_space<vmem>>, vector<1x1x64x4xbf16>
      %347 = vector.shape_cast %346 : vector<1x1x64x4xbf16> to vector<64x4xbf16>
      %348 = arith.maximumf %343, %347 : vector<64x4xbf16>
      %c0_348 = arith.constant 0 : index
      %c0_349 = arith.constant 0 : index
      %349 = vector.load %arg12[%c0_348, %c0_349] : memref<4x8xbf16, #tpu.memory_space<vmem>>, vector<4x8xbf16>
      %cst_350 = arith.constant dense<0.000000e+00> : vector<64x8xf32>
      %350 = tpu.matmul %348, %349, %cst_350 {dimension_numbers = #tpu.dot_dimension_numbers<[1], [0], [0], [1], [0, 0, 1, 1], [], []>} : vector<64x4xbf16>, vector<4x8xbf16>, vector<64x8xf32> -> vector<64x8xf32>
      %c0_351 = arith.constant 0 : index
      %c0_352 = arith.constant 0 : index
      %351 = vector.load %arg13[%c0_351, %c0_352] : memref<1x8xf32, #tpu.memory_space<vmem>>, vector<1x8xf32>
      %352 = vector.broadcast %351 : vector<1x8xf32> to vector<64x8xf32>
      %353 = arith.mulf %350, %352 : vector<64x8xf32>
      %c0_353 = arith.constant 0 : index
      %c0_354 = arith.constant 0 : index
      %354 = vector.load %arg14[%c0_353, %c0_354] : memref<1x8xf32, #tpu.memory_space<vmem>>, vector<1x8xf32>
      %355 = vector.broadcast %354 : vector<1x8xf32> to vector<64x8xf32>
      %356 = arith.addf %353, %355 : vector<64x8xf32>
      %cst_355 = arith.constant 0.000000e+00 : f32
      %357 = vector.broadcast %cst_355 : f32 to vector<64x8xf32>
      %358 = arith.maximumf %356, %357 : vector<64x8xf32>
      %359 = arith.index_cast %6 : i32 to index
      %c24_356 = arith.constant 24 : index
      %360 = vector.load %arg15[%359, %c24_356] : memref<512x32xf32, #tpu.memory_space<vmem>>, vector<64x8xf32>
      tpu.vector_store %arg15[%359, %c24_356], %358 {strides = array<i32>} : memref<512x32xf32, #tpu.memory_space<vmem>>, vector<64x8xf32>,
    }
    %c8_i32_0 = arith.constant 8 : i32
    return
  }
  func.func @transform_0(%arg0: i32, %arg1: i32) -> (i32, i32) {
    %c1_i32 = arith.constant 1 : i32
    %0 = arith.muli %arg0, %c1_i32 : i32
    %1 = arith.addi %0, %arg1 : i32
    %c0_i32 = arith.constant 0 : i32
    %c0_i32_0 = arith.constant 0 : i32
    return %1, %c0_i32 : i32, i32
  }
  func.func @transform_1(%arg0: i32, %arg1: i32) -> (i32, i32, i32, i32) {
    %c0_i32 = arith.constant 0 : i32
    %c0_i32_0 = arith.constant 0 : i32
    %c0_i32_1 = arith.constant 0 : i32
    %c0_i32_2 = arith.constant 0 : i32
    return %arg0, %c0_i32, %c0_i32_0, %c0_i32_1 : i32, i32, i32, i32
  }
  func.func @transform_2(%arg0: i32, %arg1: i32) -> (i32, i32, i32, i32) {
    %c0_i32 = arith.constant 0 : i32
    %c0_i32_0 = arith.constant 0 : i32
    %c0_i32_1 = arith.constant 0 : i32
    %c0_i32_2 = arith.constant 0 : i32
    %c0_i32_3 = arith.constant 0 : i32
    return %c0_i32, %c0_i32_0, %c0_i32_1, %c0_i32_2 : i32, i32, i32, i32
  }
  func.func @transform_3(%arg0: i32, %arg1: i32) -> (i32, i32) {
    %c0_i32 = arith.constant 0 : i32
    %c0_i32_0 = arith.constant 0 : i32
    %c0_i32_1 = arith.constant 0 : i32
    return %c0_i32, %c0_i32_0 : i32, i32
  }
  func.func @transform_4(%arg0: i32, %arg1: i32) -> (i32, i32) {
    %c0_i32 = arith.constant 0 : i32
    %c0_i32_0 = arith.constant 0 : i32
    %c0_i32_1 = arith.constant 0 : i32
    return %c0_i32, %c0_i32_0 : i32, i32
  }
  func.func @transform_5(%arg0: i32, %arg1: i32) -> (i32, i32, i32, i32) {
    %c0_i32 = arith.constant 0 : i32
    %c0_i32_0 = arith.constant 0 : i32
    %c0_i32_1 = arith.constant 0 : i32
    %c0_i32_2 = arith.constant 0 : i32
    return %arg0, %c0_i32, %c0_i32_0, %c0_i32_1 : i32, i32, i32, i32
  }
  func.func @transform_6(%arg0: i32, %arg1: i32) -> (i32, i32, i32, i32) {
    %c0_i32 = arith.constant 0 : i32
    %c0_i32_0 = arith.constant 0 : i32
    %c0_i32_1 = arith.constant 0 : i32
    %c0_i32_2 = arith.constant 0 : i32
    %c0_i32_3 = arith.constant 0 : i32
    return %c0_i32, %c0_i32_0, %c0_i32_1, %c0_i32_2 : i32, i32, i32, i32
  }
  func.func @transform_7(%arg0: i32, %arg1: i32) -> (i32, i32) {
    %c0_i32 = arith.constant 0 : i32
    %c0_i32_0 = arith.constant 0 : i32
    %c0_i32_1 = arith.constant 0 : i32
    return %c0_i32, %c0_i32_0 : i32, i32
  }
  func.func @transform_8(%arg0: i32, %arg1: i32) -> (i32, i32) {
    %c0_i32 = arith.constant 0 : i32
    %c0_i32_0 = arith.constant 0 : i32
    %c0_i32_1 = arith.constant 0 : i32
    return %c0_i32, %c0_i32_0 : i32, i32
  }
  func.func @transform_9(%arg0: i32, %arg1: i32) -> (i32, i32, i32, i32) {
    %c0_i32 = arith.constant 0 : i32
    %c0_i32_0 = arith.constant 0 : i32
    %c0_i32_1 = arith.constant 0 : i32
    %c0_i32_2 = arith.constant 0 : i32
    return %arg0, %c0_i32, %c0_i32_0, %c0_i32_1 : i32, i32, i32, i32
  }
  func.func @transform_10(%arg0: i32, %arg1: i32) -> (i32, i32) {
    %c0_i32 = arith.constant 0 : i32
    %c0_i32_0 = arith.constant 0 : i32
    %c0_i32_1 = arith.constant 0 : i32
    return %c0_i32, %c0_i32_0 : i32, i32
  }
  func.func @transform_11(%arg0: i32, %arg1: i32) -> (i32, i32) {
    %c0_i32 = arith.constant 0 : i32
    %c0_i32_0 = arith.constant 0 : i32
    %c0_i32_1 = arith.constant 0 : i32
    return %c0_i32, %c0_i32_0 : i32, i32
  }
  func.func @transform_12(%arg0: i32, %arg1: i32) -> (i32, i32) {
    %c0_i32 = arith.constant 0 : i32
    %c0_i32_0 = arith.constant 0 : i32
    %c0_i32_1 = arith.constant 0 : i32
    return %c0_i32, %c0_i32_0 : i32, i32
  }
  func.func @transform_13(%arg0: i32, %arg1: i32) -> (i32, i32) {
    %c1_i32 = arith.constant 1 : i32
    %0 = arith.muli %arg0, %c1_i32 : i32
    %1 = arith.addi %0, %arg1 : i32
    %c0_i32 = arith.constant 0 : i32
    %c0_i32_0 = arith.constant 0 : i32
    return %1, %c0_i32 : i32, i32
  }
}

</mosaic_0001>

<bundles_post_ra>
// kernel: inception3d_forward.2
= control target key start
LH: loop header
LB: loop body
LE: loop exit
PB: predicated region body
PF: predicated region fallthrough
CT: control target
= control target key end

     0   :  { %s1781_s15 = smov 0   ;;  %s2142_s0 = inlined_call_operand.vmem [shape: bf16[1024,4], index: 0, kind: input, shape index: {}]   ;;  %s2143_s1 = inlined_call_operand.vmem [shape: bf16[4,16], index: 1, kind: input, shape index: {}]   ;;  %s2144_s2 = inlined_call_operand.vmem [shape: f32[1,16], index: 2, kind: input, shape index: {}]   ;;  %s2145_s3 = inlined_call_operand.vmem [shape: f32[1,16], index: 3, kind: input, shape index: {}]   ;;  %s2146_s4 = inlined_call_operand.vmem [shape: bf16[1024,16], index: 4, kind: output, shape index: {}]  }
   0x1 LB: > { %s1400_s16 = sadd.s32 4294967295, %s1754_s15   ;;  %p1404_p0 = scmp.ge.s32.totalorder %s1754_s15, 1  ;;  %s1754_s15 = sphi %s1781_s15, %s14_s15  }
   0x2   : > { %p163_p1 = scmp.lt.s32.totalorder %s1754_s15, 3 }
   0x4   : > { %p164_p2 = pnand %p1404_p0, %p163_p1 }
   0x5   : > { %s1405_s19 = sshll.u32 (!%p164_p2), %s1400_s16, 6 }
   0x6   : > { %167 = sbr.rel (%p164_p2) target bundleno = 281 (0x119), region = 36  ;;  %p190_p3 = scmp.lt.s32.totalorder (!%p164_p2), %s1405_s19, 127 }
   0xb   : > { %v266_v0 = vld [vmem:[%s2143_s1] sm:$0x3]  ;;  %vm524_vm0 = vcmask 1041408   ;;  %s2148_s19 = smov (!%p190_p3, %s1405_s19), 127  ;;  %vm427_vm1 = vcmask 31744   ;;  %vm1279_vm2 = vcmask 125952  }
   0xc   : > { %1706 = vmatprep.subr.msk.bf16.mxu0 %vm524_vm0, %v266_v0  ;;  %1707 = vmatprep.subr.msk.bf16.mxu1 %vm524_vm0, %v266_v0  ;;  %v526_v1 = vsel %vm524_vm0, %v266_v0, 0  ;;  %s1406_s20 = sshll.u32 %s2148_s19, 2  ;;  %v1869_v34 = vld [vmem:[%s2144_s2] ss:$0 sm:$0xff] }
   0xd   : > { %1639 = vmatpush3.bf16.msra.mxu0 %v526_v1  ;;  %1705 = vmatpush3.bf16.msra.mxu1 %v526_v1  ;;  %s1800_s23 = scalar_lea.vmem %s2142_s0, %s1406_s20  ;;  %v1874_v36 = vld [vmem:[%s2145_s3] ss:$0 sm:$0xff]  ;;  %s1889_s30 = scalar_lea.vmem %s2146_s4, %s1406_s20 }
   0xe   : > { %v1716_v2 = vld [vmem:[%s1800_s23] sm:$0xff]   ;;  %v1718_v4 = vld [vmem:[%s1800_s23 + $0x8] sm:$0xff]   ;;  %v1720_v6 = vld [vmem:[%s1800_s23 + $0x10] sm:$0xff]  }
   0xf   : > { %v1717_v3 = vld [vmem:[%s1800_s23 + $0x80] sm:$0xff]   ;;  %1640 = vmatprep.mubr.msk.bf16.mxu0 %vm427_vm1, %v1716_v2  ;;  %v1719_v5 = vld [vmem:[%s1800_s23 + $0x88] sm:$0xff]   ;;  %v1721_v7 = vld [vmem:[%s1800_s23 + $0x90] sm:$0xff]  }
  0x10   : > { %1672 = vmatprep.mubr.msk.bf16.mxu1 %vm427_vm1, %v1717_v3  ;;  %1641 = vmatmul.mubr.msk.bf16.vlgmr.msra.gmra.mxu0 %vm427_vm1, %v1718_v4  ;;  %v1722_v8 = vld [vmem:[%s1800_s23 + $0x18] sm:$0xff]   ;;  %v1724_v10 = vld [vmem:[%s1800_s23 + $0x20] sm:$0xff]   ;;  %v1726_v12 = vld [vmem:[%s1800_s23 + $0x28] sm:$0xff]  }
  0x11   : > { %1673 = vmatmul.mubr.msk.bf16.vlgmr.msra.gmra.mxu1 %vm427_vm1, %v1719_v5  ;;  %1644 = vmatprep.mubr.msk.bf16.mxu0 %vm427_vm1, %v1720_v6  ;;  %v1723_v9 = vld [vmem:[%s1800_s23 + $0x98] sm:$0xff]   ;;  %v1725_v11 = vld [vmem:[%s1800_s23 + $0xa0] sm:$0xff]   ;;  %v1727_v13 = vld [vmem:[%s1800_s23 + $0xa8] sm:$0xff]  }
  0x12   : > { %1676 = vmatprep.mubr.msk.bf16.mxu1 %vm427_vm1, %v1721_v7  ;;  %v1728_v14 = vld [vmem:[%s1800_s23 + $0x30] sm:$0xff]   ;;  %v1730_v16 = vld [vmem:[%s1800_s23 + $0x38] sm:$0xff]   ;;  %v1732_v18 = vld [vmem:[%s1800_s23 + $0x40] sm:$0xff]  }
  0x13   : > { %v1729_v15 = vld [vmem:[%s1800_s23 + $0xb0] sm:$0xff]   ;;  %v1731_v17 = vld [vmem:[%s1800_s23 + $0xb8] sm:$0xff]   ;;  %v1733_v19 = vld [vmem:[%s1800_s23 + $0xc0] sm:$0xff]  }
  0x14   : > { %v1734_v20 = vld [vmem:[%s1800_s23 + $0x48] sm:$0xff]   ;;  %v1736_v22 = vld [vmem:[%s1800_s23 + $0x50] sm:$0xff]   ;;  %v1738_v24 = vld [vmem:[%s1800_s23 + $0x58] sm:$0xff]  }
  0x15   : > { %v1735_v21 = vld [vmem:[%s1800_s23 + $0xc8] sm:$0xff]   ;;  %v1737_v23 = vld [vmem:[%s1800_s23 + $0xd0] sm:$0xff]   ;;  %v1739_v25 = vld [vmem:[%s1800_s23 + $0xd8] sm:$0xff]  }
  0x16   : > { %v1740_v26 = vld [vmem:[%s1800_s23 + $0x60] sm:$0xff]   ;;  %v1742_v28 = vld [vmem:[%s1800_s23 + $0x68] sm:$0xff]   ;;  %v1744_v30 = vld [vmem:[%s1800_s23 + $0x70] sm:$0xff]  }
  0x17   : > { %v1741_v27 = vld [vmem:[%s1800_s23 + $0xe0] sm:$0xff]   ;;  %v1743_v29 = vld [vmem:[%s1800_s23 + $0xe8] sm:$0xff]   ;;  %v1745_v31 = vld [vmem:[%s1800_s23 + $0xf0] sm:$0xff]  }
  0x18   : > { %1645 = vmatmul.mubr.msk.bf16.gmra.mxu0 %vm427_vm1, %v1722_v8  ;;  %v1746_v32 = vld [vmem:[%s1800_s23 + $0x78] sm:$0xff]  }
  0x19   : > { %1677 = vmatmul.mubr.msk.bf16.gmra.mxu1 %vm427_vm1, %v1723_v9  ;;  %1648 = vmatprep.mubr.msk.bf16.mxu0 %vm427_vm1, %v1724_v10  ;;  %v1747_v33 = vld [vmem:[%s1800_s23 + $0xf8] sm:$0xff]  }
  0x1a   : > { %1680 = vmatprep.mubr.msk.bf16.mxu1 %vm427_vm1, %v1725_v11 }
  0x20   : > { %1649 = vmatmul.mubr.msk.bf16.gmra.mxu0 %vm427_vm1, %v1726_v12 }
  0x21   : > { %1681 = vmatmul.mubr.msk.bf16.gmra.mxu1 %vm427_vm1, %v1727_v13  ;;  %1652 = vmatprep.mubr.msk.bf16.mxu0 %vm427_vm1, %v1728_v14 }
  0x22   : > { %1684 = vmatprep.mubr.msk.bf16.mxu1 %vm427_vm1, %v1729_v15 }
  0x28   : > { %1653 = vmatmul.mubr.msk.bf16.gmra.mxu0 %vm427_vm1, %v1730_v16 }
  0x29   : > { %1685 = vmatmul.mubr.msk.bf16.gmra.mxu1 %vm427_vm1, %v1731_v17  ;;  %1656 = vmatprep.mubr.msk.bf16.mxu0 %vm427_vm1, %v1732_v18 }
  0x2a   : > { %1688 = vmatprep.mubr.msk.bf16.mxu1 %vm427_vm1, %v1733_v19 }
  0x30   : > { %1657 = vmatmul.mubr.msk.bf16.gmra.mxu0 %vm427_vm1, %v1734_v20 }
  0x31   : > { %1689 = vmatmul.mubr.msk.bf16.gmra.mxu1 %vm427_vm1, %v1735_v21  ;;  %1660 = vmatprep.mubr.msk.bf16.mxu0 %vm427_vm1, %v1736_v22 }
  0x32   : > { %1692 = vmatprep.mubr.msk.bf16.mxu1 %vm427_vm1, %v1737_v23 }
  0x38   : > { %1661 = vmatmul.mubr.msk.bf16.gmra.mxu0 %vm427_vm1, %v1738_v24 }
  0x39   : > { %1693 = vmatmul.mubr.msk.bf16.gmra.mxu1 %vm427_vm1, %v1739_v25  ;;  %1664 = vmatprep.mubr.msk.bf16.mxu0 %vm427_vm1, %v1740_v26 }
  0x3a   : > { %1696 = vmatprep.mubr.msk.bf16.mxu1 %vm427_vm1, %v1741_v27 }
  0x40   : > { %1665 = vmatmul.mubr.msk.bf16.gmra.mxu0 %vm427_vm1, %v1742_v28 }
  0x41   : > { %1697 = vmatmul.mubr.msk.bf16.gmra.mxu1 %vm427_vm1, %v1743_v29  ;;  %1668 = vmatprep.mubr.msk.bf16.mxu0 %vm427_vm1, %v1744_v30 }
  0x42   : > { %1700 = vmatprep.mubr.msk.bf16.mxu1 %vm427_vm1, %v1745_v31 }
  0x48   : > { %1669 = vmatmul.mubr.msk.bf16.gmra.mxu0 %vm427_vm1, %v1746_v32 }
  0x49   : > { %1701 = vmatmul.mubr.msk.bf16.gmra.mxu1 %vm427_vm1, %v1747_v33 }
  0xd0   : > { %v1642_v35 = vpop.f32.mrf.mxu0 }
  0xd1   : > { %v826_v37 = vmul.f32 %v1642_v35, %v1869_v34  ;;  %v1674_v38 = vpop.f32.mrf.mxu1 }
  0xd2   : > { %v858_v39 = vmul.f32 %v1674_v38, %v1869_v34  ;;  %v562_v40 = vpop.f32.mrf.mxu0 }
  0xd3   : > { %v897_v41 = vadd.f32 %v1874_v36, %v826_v37  ;;  %v824_v42 = vmul.f32 %v1869_v34, %v562_v40  ;;  %v690_v43 = vpop.f32.mrf.mxu1 }
  0xd4   : > { %v929_v44 = vadd.f32 %v1874_v36, %v858_v39  ;;  %v856_v45 = vmul.f32 %v1869_v34, %v690_v43  ;;  %v1643_v46 = vpop.f32.mrf.mxu0 }
  0xd5   : > { %v961_v47 = vmax.f32 %v897_v41, 0.0  ;;  %v895_v48 = vadd.f32 %v1874_v36, %v824_v42  ;;  %v827_v49 = vmul.f32 %v1643_v46, %v1869_v34  ;;  %v1675_v50 = vpop.f32.mrf.mxu1 }
  0xd6   : > { %v993_v51 = vmax.f32 %v929_v44, 0.0  ;;  %v927_v52 = vadd.f32 %v1874_v36, %v856_v45  ;;  %v859_v53 = vmul.f32 %v1675_v50, %v1869_v34  ;;  %v565_v54 = vpop.f32.mrf.mxu0 }
  0xd7   : > { %v1543_v55 = vpack.c.bf16 %v961_v47, %v961_v47  ;;  %v959_v56 = vmax.f32 %v895_v48, 0.0  ;;  %v898_v57 = vadd.f32 %v1874_v36, %v827_v49  ;;  %v825_v58 = vmul.f32 %v1869_v34, %v565_v54  ;;  %v693_v59 = vpop.f32.mrf.mxu1 }
  0xd8   : > { %v1575_v60 = vpack.c.bf16 %v993_v51, %v993_v51  ;;  %v991_v61 = vmax.f32 %v927_v52, 0.0  ;;  %v930_v62 = vadd.f32 %v1874_v36, %v859_v53  ;;  %v857_v63 = vmul.f32 %v1869_v34, %v693_v59  ;;  %v1646_v0 = vpop.f32.mrf.mxu0 }
  0xd9   : > { %1282 = vst.msk [vmem:[%s1889_s30 + $0x8] sm:$0xf] %vm1279_vm2, %v1543_v55  ;;  %v1541_v1 = vpack.c.bf16 %v959_v56, %v959_v56  ;;  %v962_v2 = vmax.f32 %v898_v57, 0.0  ;;  %v896_v3 = vadd.f32 %v1874_v36, %v825_v58  ;;  %v830_v4 = vmul.f32 %v1646_v0, %v1869_v34  ;;  %v1678_v5 = vpop.f32.mrf.mxu1 }
  0xda   : > { %1314 = vst.msk [vmem:[%s1889_s30 + $0x88] sm:$0xf] %vm1279_vm2, %v1575_v60  ;;  %v1573_v6 = vpack.c.bf16 %v991_v61, %v991_v61  ;;  %v994_v7 = vmax.f32 %v930_v62, 0.0  ;;  %v928_v8 = vadd.f32 %v1874_v36, %v857_v63  ;;  %v862_v9 = vmul.f32 %v1678_v5, %v1869_v34  ;;  %v578_v10 = vpop.f32.mrf.mxu0 }
  0xdb   : > { %1280 = vst.msk [vmem:[%s1889_s30] sm:$0xf] %vm1279_vm2, %v1541_v1  ;;  %v1544_v11 = vpack.c.bf16 %v962_v2, %v962_v2  ;;  %v960_v12 = vmax.f32 %v896_v3, 0.0  ;;  %v901_v13 = vadd.f32 %v1874_v36, %v830_v4  ;;  %v828_v14 = vmul.f32 %v1869_v34, %v578_v10  ;;  %v706_v15 = vpop.f32.mrf.mxu1 }
  0xdc   : > { %1312 = vst.msk [vmem:[%s1889_s30 + $0x80] sm:$0xf] %vm1279_vm2, %v1573_v6  ;;  %v1576_v16 = vpack.c.bf16 %v994_v7, %v994_v7  ;;  %v992_v17 = vmax.f32 %v928_v8, 0.0  ;;  %v933_v18 = vadd.f32 %v1874_v36, %v862_v9  ;;  %v860_v19 = vmul.f32 %v1869_v34, %v706_v15  ;;  %v1647_v20 = vpop.f32.mrf.mxu0 }
  0xdd   : > { %1283 = vst.msk [vmem:[%s1889_s30 + $0xc] sm:$0xf] %vm1279_vm2, %v1544_v11  ;;  %v1542_v21 = vpack.c.bf16 %v960_v12, %v960_v12  ;;  %v965_v22 = vmax.f32 %v901_v13, 0.0  ;;  %v899_v23 = vadd.f32 %v1874_v36, %v828_v14  ;;  %v831_v24 = vmul.f32 %v1647_v20, %v1869_v34  ;;  %v1679_v25 = vpop.f32.mrf.mxu1 }
  0xde   : > { %1315 = vst.msk [vmem:[%s1889_s30 + $0x8c] sm:$0xf] %vm1279_vm2, %v1576_v16  ;;  %v1574_v26 = vpack.c.bf16 %v992_v17, %v992_v17  ;;  %v997_v27 = vmax.f32 %v933_v18, 0.0  ;;  %v931_v28 = vadd.f32 %v1874_v36, %v860_v19  ;;  %v863_v29 = vmul.f32 %v1679_v25, %v1869_v34  ;;  %v581_v30 = vpop.f32.mrf.mxu0 }
  0xdf   : > { %1281 = vst.msk [vmem:[%s1889_s30 + $0x4] sm:$0xf] %vm1279_vm2, %v1542_v21  ;;  %v1547_v31 = vpack.c.bf16 %v965_v22, %v965_v22  ;;  %v963_v32 = vmax.f32 %v899_v23, 0.0  ;;  %v902_v33 = vadd.f32 %v1874_v36, %v831_v24  ;;  %v829_v35 = vmul.f32 %v1869_v34, %v581_v30  ;;  %v709_v37 = vpop.f32.mrf.mxu1 }
  0xe0   : > { %1313 = vst.msk [vmem:[%s1889_s30 + $0x84] sm:$0xf] %vm1279_vm2, %v1574_v26  ;;  %v1579_v38 = vpack.c.bf16 %v997_v27, %v997_v27  ;;  %v995_v39 = vmax.f32 %v931_v28, 0.0  ;;  %v934_v40 = vadd.f32 %v1874_v36, %v863_v29  ;;  %v861_v41 = vmul.f32 %v1869_v34, %v709_v37  ;;  %v1650_v42 = vpop.f32.mrf.mxu0 }
  0xe1   : > { %1286 = vst.msk [vmem:[%s1889_s30 + $0x18] sm:$0xf] %vm1279_vm2, %v1547_v31  ;;  %v1545_v43 = vpack.c.bf16 %v963_v32, %v963_v32  ;;  %v966_v44 = vmax.f32 %v902_v33, 0.0  ;;  %v900_v45 = vadd.f32 %v1874_v36, %v829_v35  ;;  %v834_v46 = vmul.f32 %v1650_v42, %v1869_v34  ;;  %v1682_v47 = vpop.f32.mrf.mxu1 }
  0xe2   : > { %1318 = vst.msk [vmem:[%s1889_s30 + $0x98] sm:$0xf] %vm1279_vm2, %v1579_v38  ;;  %v1577_v48 = vpack.c.bf16 %v995_v39, %v995_v39  ;;  %v998_v49 = vmax.f32 %v934_v40, 0.0  ;;  %v932_v50 = vadd.f32 %v1874_v36, %v861_v41  ;;  %v866_v51 = vmul.f32 %v1682_v47, %v1869_v34  ;;  %v594_v52 = vpop.f32.mrf.mxu0 }
  0xe3   : > { %1284 = vst.msk [vmem:[%s1889_s30 + $0x10] sm:$0xf] %vm1279_vm2, %v1545_v43  ;;  %v1548_v53 = vpack.c.bf16 %v966_v44, %v966_v44  ;;  %v964_v54 = vmax.f32 %v900_v45, 0.0  ;;  %v905_v55 = vadd.f32 %v1874_v36, %v834_v46  ;;  %v832_v56 = vmul.f32 %v1869_v34, %v594_v52  ;;  %v722_v57 = vpop.f32.mrf.mxu1 }
  0xe4   : > { %1316 = vst.msk [vmem:[%s1889_s30 + $0x90] sm:$0xf] %vm1279_vm2, %v1577_v48  ;;  %v1580_v58 = vpack.c.bf16 %v998_v49, %v998_v49  ;;  %v996_v59 = vmax.f32 %v932_v50, 0.0  ;;  %v937_v60 = vadd.f32 %v1874_v36, %v866_v51  ;;  %v864_v61 = vmul.f32 %v1869_v34, %v722_v57  ;;  %v1651_v62 = vpop.f32.mrf.mxu0 }
  0xe5   : > { %1287 = vst.msk [vmem:[%s1889_s30 + $0x1c] sm:$0xf] %vm1279_vm2, %v1548_v53  ;;  %v1546_v63 = vpack.c.bf16 %v964_v54, %v964_v54  ;;  %v969_v0 = vmax.f32 %v905_v55, 0.0  ;;  %v903_v1 = vadd.f32 %v1874_v36, %v832_v56  ;;  %v835_v2 = vmul.f32 %v1651_v62, %v1869_v34  ;;  %v1683_v3 = vpop.f32.mrf.mxu1 }
  0xe6   : > { %1319 = vst.msk [vmem:[%s1889_s30 + $0x9c] sm:$0xf] %vm1279_vm2, %v1580_v58  ;;  %v1578_v4 = vpack.c.bf16 %v996_v59, %v996_v59  ;;  %v1001_v5 = vmax.f32 %v937_v60, 0.0  ;;  %v935_v6 = vadd.f32 %v1874_v36, %v864_v61  ;;  %v867_v7 = vmul.f32 %v1683_v3, %v1869_v34  ;;  %v597_v8 = vpop.f32.mrf.mxu0 }
  0xe7   : > { %1285 = vst.msk [vmem:[%s1889_s30 + $0x14] sm:$0xf] %vm1279_vm2, %v1546_v63  ;;  %v1551_v9 = vpack.c.bf16 %v969_v0, %v969_v0  ;;  %v967_v10 = vmax.f32 %v903_v1, 0.0  ;;  %v906_v11 = vadd.f32 %v1874_v36, %v835_v2  ;;  %v833_v12 = vmul.f32 %v1869_v34, %v597_v8  ;;  %v725_v13 = vpop.f32.mrf.mxu1 }
  0xe8   : > { %1317 = vst.msk [vmem:[%s1889_s30 + $0x94] sm:$0xf] %vm1279_vm2, %v1578_v4  ;;  %v1583_v14 = vpack.c.bf16 %v1001_v5, %v1001_v5  ;;  %v999_v15 = vmax.f32 %v935_v6, 0.0  ;;  %v938_v16 = vadd.f32 %v1874_v36, %v867_v7  ;;  %v865_v17 = vmul.f32 %v1869_v34, %v725_v13  ;;  %v1654_v18 = vpop.f32.mrf.mxu0 }
  0xe9   : > { %1290 = vst.msk [vmem:[%s1889_s30 + $0x28] sm:$0xf] %vm1279_vm2, %v1551_v9  ;;  %v1549_v19 = vpack.c.bf16 %v967_v10, %v967_v10  ;;  %v970_v20 = vmax.f32 %v906_v11, 0.0  ;;  %v904_v21 = vadd.f32 %v1874_v36, %v833_v12  ;;  %v838_v22 = vmul.f32 %v1654_v18, %v1869_v34  ;;  %v1686_v23 = vpop.f32.mrf.mxu1 }
  0xea   : > { %1322 = vst.msk [vmem:[%s1889_s30 + $0xa8] sm:$0xf] %vm1279_vm2, %v1583_v14  ;;  %v1581_v24 = vpack.c.bf16 %v999_v15, %v999_v15  ;;  %v1002_v25 = vmax.f32 %v938_v16, 0.0  ;;  %v936_v26 = vadd.f32 %v1874_v36, %v865_v17  ;;  %v870_v27 = vmul.f32 %v1686_v23, %v1869_v34  ;;  %v610_v28 = vpop.f32.mrf.mxu0 }
  0xeb   : > { %1288 = vst.msk [vmem:[%s1889_s30 + $0x20] sm:$0xf] %vm1279_vm2, %v1549_v19  ;;  %v1552_v29 = vpack.c.bf16 %v970_v20, %v970_v20  ;;  %v968_v30 = vmax.f32 %v904_v21, 0.0  ;;  %v909_v31 = vadd.f32 %v1874_v36, %v838_v22  ;;  %v836_v32 = vmul.f32 %v1869_v34, %v610_v28  ;;  %v738_v33 = vpop.f32.mrf.mxu1 }
  0xec   : > { %1320 = vst.msk [vmem:[%s1889_s30 + $0xa0] sm:$0xf] %vm1279_vm2, %v1581_v24  ;;  %v1584_v35 = vpack.c.bf16 %v1002_v25, %v1002_v25  ;;  %v1000_v37 = vmax.f32 %v936_v26, 0.0  ;;  %v941_v38 = vadd.f32 %v1874_v36, %v870_v27  ;;  %v868_v39 = vmul.f32 %v1869_v34, %v738_v33  ;;  %v1655_v40 = vpop.f32.mrf.mxu0 }
  0xed   : > { %1291 = vst.msk [vmem:[%s1889_s30 + $0x2c] sm:$0xf] %vm1279_vm2, %v1552_v29  ;;  %v1550_v41 = vpack.c.bf16 %v968_v30, %v968_v30  ;;  %v973_v42 = vmax.f32 %v909_v31, 0.0  ;;  %v907_v43 = vadd.f32 %v1874_v36, %v836_v32  ;;  %v839_v44 = vmul.f32 %v1655_v40, %v1869_v34  ;;  %v1687_v45 = vpop.f32.mrf.mxu1 }
  0xee   : > { %1323 = vst.msk [vmem:[%s1889_s30 + $0xac] sm:$0xf] %vm1279_vm2, %v1584_v35  ;;  %v1582_v46 = vpack.c.bf16 %v1000_v37, %v1000_v37  ;;  %v1005_v47 = vmax.f32 %v941_v38, 0.0  ;;  %v939_v48 = vadd.f32 %v1874_v36, %v868_v39  ;;  %v871_v49 = vmul.f32 %v1687_v45, %v1869_v34  ;;  %v613_v50 = vpop.f32.mrf.mxu0 }
  0xef   : > { %1289 = vst.msk [vmem:[%s1889_s30 + $0x24] sm:$0xf] %vm1279_vm2, %v1550_v41  ;;  %v1555_v51 = vpack.c.bf16 %v973_v42, %v973_v42  ;;  %v971_v52 = vmax.f32 %v907_v43, 0.0  ;;  %v910_v53 = vadd.f32 %v1874_v36, %v839_v44  ;;  %v837_v54 = vmul.f32 %v1869_v34, %v613_v50  ;;  %v741_v55 = vpop.f32.mrf.mxu1 }
  0xf0   : > { %1321 = vst.msk [vmem:[%s1889_s30 + $0xa4] sm:$0xf] %vm1279_vm2, %v1582_v46  ;;  %v1587_v56 = vpack.c.bf16 %v1005_v47, %v1005_v47  ;;  %v1003_v57 = vmax.f32 %v939_v48, 0.0  ;;  %v942_v58 = vadd.f32 %v1874_v36, %v871_v49  ;;  %v869_v59 = vmul.f32 %v1869_v34, %v741_v55  ;;  %v1658_v60 = vpop.f32.mrf.mxu0 }
  0xf1   : > { %1294 = vst.msk [vmem:[%s1889_s30 + $0x38] sm:$0xf] %vm1279_vm2, %v1555_v51  ;;  %v1553_v61 = vpack.c.bf16 %v971_v52, %v971_v52  ;;  %v974_v62 = vmax.f32 %v910_v53, 0.0  ;;  %v908_v63 = vadd.f32 %v1874_v36, %v837_v54  ;;  %v842_v0 = vmul.f32 %v1658_v60, %v1869_v34  ;;  %v1690_v1 = vpop.f32.mrf.mxu1 }
  0xf2   : > { %1326 = vst.msk [vmem:[%s1889_s30 + $0xb8] sm:$0xf] %vm1279_vm2, %v1587_v56  ;;  %v1585_v2 = vpack.c.bf16 %v1003_v57, %v1003_v57  ;;  %v1006_v3 = vmax.f32 %v942_v58, 0.0  ;;  %v940_v4 = vadd.f32 %v1874_v36, %v869_v59  ;;  %v874_v5 = vmul.f32 %v1690_v1, %v1869_v34  ;;  %v626_v6 = vpop.f32.mrf.mxu0 }
  0xf3   : > { %1292 = vst.msk [vmem:[%s1889_s30 + $0x30] sm:$0xf] %vm1279_vm2, %v1553_v61  ;;  %v1556_v7 = vpack.c.bf16 %v974_v62, %v974_v62  ;;  %v972_v8 = vmax.f32 %v908_v63, 0.0  ;;  %v913_v9 = vadd.f32 %v1874_v36, %v842_v0  ;;  %v840_v10 = vmul.f32 %v1869_v34, %v626_v6  ;;  %v754_v11 = vpop.f32.mrf.mxu1 }
  0xf4   : > { %1324 = vst.msk [vmem:[%s1889_s30 + $0xb0] sm:$0xf] %vm1279_vm2, %v1585_v2  ;;  %v1588_v12 = vpack.c.bf16 %v1006_v3, %v1006_v3  ;;  %v1004_v13 = vmax.f32 %v940_v4, 0.0  ;;  %v945_v14 = vadd.f32 %v1874_v36, %v874_v5  ;;  %v872_v15 = vmul.f32 %v1869_v34, %v754_v11  ;;  %v1659_v16 = vpop.f32.mrf.mxu0 }
  0xf5   : > { %1295 = vst.msk [vmem:[%s1889_s30 + $0x3c] sm:$0xf] %vm1279_vm2, %v1556_v7  ;;  %v1554_v17 = vpack.c.bf16 %v972_v8, %v972_v8  ;;  %v977_v18 = vmax.f32 %v913_v9, 0.0  ;;  %v911_v19 = vadd.f32 %v1874_v36, %v840_v10  ;;  %v843_v20 = vmul.f32 %v1659_v16, %v1869_v34  ;;  %v1691_v21 = vpop.f32.mrf.mxu1 }
  0xf6   : > { %1327 = vst.msk [vmem:[%s1889_s30 + $0xbc] sm:$0xf] %vm1279_vm2, %v1588_v12  ;;  %v1586_v22 = vpack.c.bf16 %v1004_v13, %v1004_v13  ;;  %v1009_v23 = vmax.f32 %v945_v14, 0.0  ;;  %v943_v24 = vadd.f32 %v1874_v36, %v872_v15  ;;  %v875_v25 = vmul.f32 %v1691_v21, %v1869_v34  ;;  %v629_v26 = vpop.f32.mrf.mxu0 }
  0xf7   : > { %1293 = vst.msk [vmem:[%s1889_s30 + $0x34] sm:$0xf] %vm1279_vm2, %v1554_v17  ;;  %v1559_v27 = vpack.c.bf16 %v977_v18, %v977_v18  ;;  %v975_v28 = vmax.f32 %v911_v19, 0.0  ;;  %v914_v29 = vadd.f32 %v1874_v36, %v843_v20  ;;  %v841_v30 = vmul.f32 %v1869_v34, %v629_v26  ;;  %v757_v31 = vpop.f32.mrf.mxu1 }
  0xf8   : > { %1325 = vst.msk [vmem:[%s1889_s30 + $0xb4] sm:$0xf] %vm1279_vm2, %v1586_v22  ;;  %v1591_v32 = vpack.c.bf16 %v1009_v23, %v1009_v23  ;;  %v1007_v33 = vmax.f32 %v943_v24, 0.0  ;;  %v946_v35 = vadd.f32 %v1874_v36, %v875_v25  ;;  %v873_v37 = vmul.f32 %v1869_v34, %v757_v31  ;;  %v1662_v38 = vpop.f32.mrf.mxu0 }
  0xf9   : > { %1298 = vst.msk [vmem:[%s1889_s30 + $0x48] sm:$0xf] %vm1279_vm2, %v1559_v27  ;;  %v1557_v39 = vpack.c.bf16 %v975_v28, %v975_v28  ;;  %v978_v40 = vmax.f32 %v914_v29, 0.0  ;;  %v912_v41 = vadd.f32 %v1874_v36, %v841_v30  ;;  %v846_v42 = vmul.f32 %v1662_v38, %v1869_v34  ;;  %v1694_v43 = vpop.f32.mrf.mxu1 }
  0xfa   : > { %1330 = vst.msk [vmem:[%s1889_s30 + $0xc8] sm:$0xf] %vm1279_vm2, %v1591_v32  ;;  %v1589_v44 = vpack.c.bf16 %v1007_v33, %v1007_v33  ;;  %v1010_v45 = vmax.f32 %v946_v35, 0.0  ;;  %v944_v46 = vadd.f32 %v1874_v36, %v873_v37  ;;  %v878_v47 = vmul.f32 %v1694_v43, %v1869_v34  ;;  %v642_v48 = vpop.f32.mrf.mxu0 }
  0xfb   : > { %1296 = vst.msk [vmem:[%s1889_s30 + $0x40] sm:$0xf] %vm1279_vm2, %v1557_v39  ;;  %v1560_v49 = vpack.c.bf16 %v978_v40, %v978_v40  ;;  %v976_v50 = vmax.f32 %v912_v41, 0.0  ;;  %v917_v51 = vadd.f32 %v1874_v36, %v846_v42  ;;  %v844_v52 = vmul.f32 %v1869_v34, %v642_v48  ;;  %v770_v53 = vpop.f32.mrf.mxu1 }
  0xfc   : > { %1328 = vst.msk [vmem:[%s1889_s30 + $0xc0] sm:$0xf] %vm1279_vm2, %v1589_v44  ;;  %v1592_v54 = vpack.c.bf16 %v1010_v45, %v1010_v45  ;;  %v1008_v55 = vmax.f32 %v944_v46, 0.0  ;;  %v949_v56 = vadd.f32 %v1874_v36, %v878_v47  ;;  %v876_v57 = vmul.f32 %v1869_v34, %v770_v53  ;;  %v1663_v58 = vpop.f32.mrf.mxu0 }
  0xfd   : > { %1299 = vst.msk [vmem:[%s1889_s30 + $0x4c] sm:$0xf] %vm1279_vm2, %v1560_v49  ;;  %v1558_v59 = vpack.c.bf16 %v976_v50, %v976_v50  ;;  %v981_v60 = vmax.f32 %v917_v51, 0.0  ;;  %v915_v61 = vadd.f32 %v1874_v36, %v844_v52  ;;  %v847_v62 = vmul.f32 %v1663_v58, %v1869_v34  ;;  %v1695_v63 = vpop.f32.mrf.mxu1 }
  0xfe   : > { %1331 = vst.msk [vmem:[%s1889_s30 + $0xcc] sm:$0xf] %vm1279_vm2, %v1592_v54  ;;  %v1590_v0 = vpack.c.bf16 %v1008_v55, %v1008_v55  ;;  %v1013_v1 = vmax.f32 %v949_v56, 0.0  ;;  %v947_v2 = vadd.f32 %v1874_v36, %v876_v57  ;;  %v879_v3 = vmul.f32 %v1695_v63, %v1869_v34  ;;  %v645_v4 = vpop.f32.mrf.mxu0 }
  0xff   : > { %1297 = vst.msk [vmem:[%s1889_s30 + $0x44] sm:$0xf] %vm1279_vm2, %v1558_v59  ;;  %v1563_v5 = vpack.c.bf16 %v981_v60, %v981_v60  ;;  %v979_v6 = vmax.f32 %v915_v61, 0.0  ;;  %v918_v7 = vadd.f32 %v1874_v36, %v847_v62  ;;  %v845_v8 = vmul.f32 %v1869_v34, %v645_v4  ;;  %v773_v9 = vpop.f32.mrf.mxu1 }
 0x100   : > { %1329 = vst.msk [vmem:[%s1889_s30 + $0xc4] sm:$0xf] %vm1279_vm2, %v1590_v0  ;;  %v1595_v10 = vpack.c.bf16 %v1013_v1, %v1013_v1  ;;  %v1011_v11 = vmax.f32 %v947_v2, 0.0  ;;  %v950_v12 = vadd.f32 %v1874_v36, %v879_v3  ;;  %v877_v13 = vmul.f32 %v1869_v34, %v773_v9  ;;  %v1666_v14 = vpop.f32.mrf.mxu0 }
 0x101   : > { %1302 = vst.msk [vmem:[%s1889_s30 + $0x58] sm:$0xf] %vm1279_vm2, %v1563_v5  ;;  %v1561_v15 = vpack.c.bf16 %v979_v6, %v979_v6  ;;  %v982_v16 = vmax.f32 %v918_v7, 0.0  ;;  %v916_v17 = vadd.f32 %v1874_v36, %v845_v8  ;;  %v850_v18 = vmul.f32 %v1666_v14, %v1869_v34  ;;  %v1698_v19 = vpop.f32.mrf.mxu1 }
 0x102   : > { %1334 = vst.msk [vmem:[%s1889_s30 + $0xd8] sm:$0xf] %vm1279_vm2, %v1595_v10  ;;  %v1593_v20 = vpack.c.bf16 %v1011_v11, %v1011_v11  ;;  %v1014_v21 = vmax.f32 %v950_v12, 0.0  ;;  %v948_v22 = vadd.f32 %v1874_v36, %v877_v13  ;;  %v882_v23 = vmul.f32 %v1698_v19, %v1869_v34  ;;  %v658_v24 = vpop.f32.mrf.mxu0 }
 0x103   : > { %1300 = vst.msk [vmem:[%s1889_s30 + $0x50] sm:$0xf] %vm1279_vm2, %v1561_v15  ;;  %v1564_v25 = vpack.c.bf16 %v982_v16, %v982_v16  ;;  %v980_v26 = vmax.f32 %v916_v17, 0.0  ;;  %v921_v27 = vadd.f32 %v1874_v36, %v850_v18  ;;  %v848_v28 = vmul.f32 %v1869_v34, %v658_v24  ;;  %v786_v29 = vpop.f32.mrf.mxu1 }
 0x104   : > { %1332 = vst.msk [vmem:[%s1889_s30 + $0xd0] sm:$0xf] %vm1279_vm2, %v1593_v20  ;;  %v1596_v30 = vpack.c.bf16 %v1014_v21, %v1014_v21  ;;  %v1012_v31 = vmax.f32 %v948_v22, 0.0  ;;  %v953_v32 = vadd.f32 %v1874_v36, %v882_v23  ;;  %v880_v33 = vmul.f32 %v1869_v34, %v786_v29  ;;  %v1667_v35 = vpop.f32.mrf.mxu0 }
 0x105   : > { %1303 = vst.msk [vmem:[%s1889_s30 + $0x5c] sm:$0xf] %vm1279_vm2, %v1564_v25  ;;  %v1562_v37 = vpack.c.bf16 %v980_v26, %v980_v26  ;;  %v985_v38 = vmax.f32 %v921_v27, 0.0  ;;  %v919_v39 = vadd.f32 %v1874_v36, %v848_v28  ;;  %v851_v40 = vmul.f32 %v1667_v35, %v1869_v34  ;;  %v1699_v41 = vpop.f32.mrf.mxu1 }
 0x106   : > { %1335 = vst.msk [vmem:[%s1889_s30 + $0xdc] sm:$0xf] %vm1279_vm2, %v1596_v30  ;;  %v1594_v42 = vpack.c.bf16 %v1012_v31, %v1012_v31  ;;  %v1017_v43 = vmax.f32 %v953_v32, 0.0  ;;  %v951_v44 = vadd.f32 %v1874_v36, %v880_v33  ;;  %v883_v45 = vmul.f32 %v1699_v41, %v1869_v34  ;;  %v661_v46 = vpop.f32.mrf.mxu0 }
 0x107   : > { %1301 = vst.msk [vmem:[%s1889_s30 + $0x54] sm:$0xf] %vm1279_vm2, %v1562_v37  ;;  %v1567_v47 = vpack.c.bf16 %v985_v38, %v985_v38  ;;  %v983_v48 = vmax.f32 %v919_v39, 0.0  ;;  %v922_v49 = vadd.f32 %v1874_v36, %v851_v40  ;;  %v849_v50 = vmul.f32 %v1869_v34, %v661_v46  ;;  %v789_v51 = vpop.f32.mrf.mxu1 }
 0x108   : > { %1333 = vst.msk [vmem:[%s1889_s30 + $0xd4] sm:$0xf] %vm1279_vm2, %v1594_v42  ;;  %v1599_v52 = vpack.c.bf16 %v1017_v43, %v1017_v43  ;;  %v1015_v53 = vmax.f32 %v951_v44, 0.0  ;;  %v954_v54 = vadd.f32 %v1874_v36, %v883_v45  ;;  %v881_v55 = vmul.f32 %v1869_v34, %v789_v51  ;;  %v1670_v56 = vpop.f32.mrf.mxu0 }
 0x109   : > { %1306 = vst.msk [vmem:[%s1889_s30 + $0x68] sm:$0xf] %vm1279_vm2, %v1567_v47  ;;  %v1565_v57 = vpack.c.bf16 %v983_v48, %v983_v48  ;;  %v986_v58 = vmax.f32 %v922_v49, 0.0  ;;  %v920_v59 = vadd.f32 %v1874_v36, %v849_v50  ;;  %v854_v60 = vmul.f32 %v1670_v56, %v1869_v34  ;;  %v1702_v61 = vpop.f32.mrf.mxu1 }
 0x10a   : > { %1338 = vst.msk [vmem:[%s1889_s30 + $0xe8] sm:$0xf] %vm1279_vm2, %v1599_v52  ;;  %v1597_v62 = vpack.c.bf16 %v1015_v53, %v1015_v53  ;;  %v1018_v63 = vmax.f32 %v954_v54, 0.0  ;;  %v952_v0 = vadd.f32 %v1874_v36, %v881_v55  ;;  %v886_v1 = vmul.f32 %v1702_v61, %v1869_v34  ;;  %v674_v2 = vpop.f32.mrf.mxu0 }
 0x10b   : > { %1304 = vst.msk [vmem:[%s1889_s30 + $0x60] sm:$0xf] %vm1279_vm2, %v1565_v57  ;;  %v1568_v3 = vpack.c.bf16 %v986_v58, %v986_v58  ;;  %v984_v4 = vmax.f32 %v920_v59, 0.0  ;;  %v925_v5 = vadd.f32 %v1874_v36, %v854_v60  ;;  %v852_v6 = vmul.f32 %v1869_v34, %v674_v2  ;;  %v802_v7 = vpop.f32.mrf.mxu1 }
 0x10c   : > { %1336 = vst.msk [vmem:[%s1889_s30 + $0xe0] sm:$0xf] %vm1279_vm2, %v1597_v62  ;;  %v1600_v8 = vpack.c.bf16 %v1018_v63, %v1018_v63  ;;  %v1016_v9 = vmax.f32 %v952_v0, 0.0  ;;  %v957_v10 = vadd.f32 %v1874_v36, %v886_v1  ;;  %v884_v11 = vmul.f32 %v1869_v34, %v802_v7  ;;  %v1671_v12 = vpop.f32.mrf.mxu0 }
 0x10d   : > { %1307 = vst.msk [vmem:[%s1889_s30 + $0x6c] sm:$0xf] %vm1279_vm2, %v1568_v3  ;;  %v1566_v13 = vpack.c.bf16 %v984_v4, %v984_v4  ;;  %v989_v14 = vmax.f32 %v925_v5, 0.0  ;;  %v923_v15 = vadd.f32 %v1874_v36, %v852_v6  ;;  %v855_v16 = vmul.f32 %v1671_v12, %v1869_v34  ;;  %v1703_v17 = vpop.f32.mrf.mxu1 }
 0x10e   : > { %1339 = vst.msk [vmem:[%s1889_s30 + $0xec] sm:$0xf] %vm1279_vm2, %v1600_v8  ;;  %v1598_v18 = vpack.c.bf16 %v1016_v9, %v1016_v9  ;;  %v1021_v19 = vmax.f32 %v957_v10, 0.0  ;;  %v955_v20 = vadd.f32 %v1874_v36, %v884_v11  ;;  %v887_v21 = vmul.f32 %v1703_v17, %v1869_v34  ;;  %v677_v22 = vpop.f32.mrf.mxu0 }
 0x10f   : > { %1305 = vst.msk [vmem:[%s1889_s30 + $0x64] sm:$0xf] %vm1279_vm2, %v1566_v13  ;;  %v1571_v23 = vpack.c.bf16 %v989_v14, %v989_v14  ;;  %v987_v24 = vmax.f32 %v923_v15, 0.0  ;;  %v926_v25 = vadd.f32 %v1874_v36, %v855_v16  ;;  %v853_v26 = vmul.f32 %v1869_v34, %v677_v22  ;;  %v805_v27 = vpop.f32.mrf.mxu1 }
 0x110   : > { %1337 = vst.msk [vmem:[%s1889_s30 + $0xe4] sm:$0xf] %vm1279_vm2, %v1598_v18  ;;  %v1603_v28 = vpack.c.bf16 %v1021_v19, %v1021_v19  ;;  %v1019_v29 = vmax.f32 %v955_v20, 0.0  ;;  %v958_v30 = vadd.f32 %v1874_v36, %v887_v21  ;;  %v885_v31 = vmul.f32 %v1869_v34, %v805_v27 }
 0x111   : > { %1310 = vst.msk [vmem:[%s1889_s30 + $0x78] sm:$0xf] %vm1279_vm2, %v1571_v23  ;;  %v1569_v32 = vpack.c.bf16 %v987_v24, %v987_v24  ;;  %v990_v33 = vmax.f32 %v926_v25, 0.0  ;;  %v924_v35 = vadd.f32 %v1874_v36, %v853_v26 }
 0x112   : > { %1342 = vst.msk [vmem:[%s1889_s30 + $0xf8] sm:$0xf] %vm1279_vm2, %v1603_v28  ;;  %v1601_v37 = vpack.c.bf16 %v1019_v29, %v1019_v29  ;;  %v1022_v38 = vmax.f32 %v958_v30, 0.0  ;;  %v956_v39 = vadd.f32 %v1874_v36, %v885_v31 }
 0x113   : > { %1308 = vst.msk [vmem:[%s1889_s30 + $0x70] sm:$0xf] %vm1279_vm2, %v1569_v32  ;;  %v1572_v40 = vpack.c.bf16 %v990_v33, %v990_v33  ;;  %v988_v41 = vmax.f32 %v924_v35, 0.0 }
 0x114   : > { %1340 = vst.msk [vmem:[%s1889_s30 + $0xf0] sm:$0xf] %vm1279_vm2, %v1601_v37  ;;  %v1604_v34 = vpack.c.bf16 %v1022_v38, %v1022_v38  ;;  %v1020_v42 = vmax.f32 %v956_v39, 0.0 }
 0x115   : > { %1311 = vst.msk [vmem:[%s1889_s30 + $0x7c] sm:$0xf] %vm1279_vm2, %v1572_v40  ;;  %v1570_v43 = vpack.c.bf16 %v988_v41, %v988_v41 }
 0x116   : > { %1343 = vst.msk [vmem:[%s1889_s30 + $0xfc] sm:$0xf] %vm1279_vm2, %v1604_v34  ;;  %v1602_v44 = vpack.c.bf16 %v1020_v42, %v1020_v42 }
 0x117   : > { %1309 = vst.msk [vmem:[%s1889_s30 + $0x74] sm:$0xf] %vm1279_vm2, %v1570_v43 }
 0x118   : > { %1341 = vst.msk [vmem:[%s1889_s30 + $0xf4] sm:$0xf] %vm1279_vm2, %v1602_v44 }
 0x119 PF: > { %s14_s15 = sadd.s32 1, %s1754_s15  }
 0x11a   : > { %p11_p4 = scmp.ge.s32.totalorder %s14_s15, 4  }
 0x11c   :  { %13 = sbr.rel (!%p11_p4) target bundleno = 1 (0x1), region = 66 }

// kernel: inception3d_forward.3
= control target key start
LH: loop header
LB: loop body
LE: loop exit
PB: predicated region body
PF: predicated region fallthrough
CT: control target
= control target key end

     0   :  { %s8542_s0 = inlined_call_operand.vmem [shape: bf16[1024,8], index: 0, kind: input, shape index: {}]   ;;  %s8543_s1 = inlined_call_operand.vmem [shape: bf16[2,10,80,12], index: 1, kind: input, shape index: {}]   ;;  %s8544_s2 = inlined_call_operand.vmem [shape: bf16[3,3,12,8], index: 2, kind: input, shape index: {}]   ;;  %s8545_s3 = inlined_call_operand.vmem [shape: f32[1,8], index: 3, kind: input, shape index: {}]   ;;  %s8546_s4 = inlined_call_operand.vmem [shape: f32[1,8], index: 4, kind: input, shape index: {}]   ;;  %s8547_s5 = inlined_call_operand.vmem [shape: bf16[2,12,96,20], index: 5, kind: input, shape index: {}]   ;;  %s8548_s6 = inlined_call_operand.vmem [shape: bf16[5,5,20,8], index: 6, kind: input, shape index: {}]   ;;  %s8549_s7 = inlined_call_operand.vmem [shape: f32[1,8], index: 7, kind: input, shape index: {}]   ;;  %s8550_s8 = inlined_call_operand.vmem [shape: f32[1,8], index: 8, kind: input, shape index: {}]   ;;  %s8551_s9 = inlined_call_operand.vmem [shape: bf16[2,10,80,4], index: 9, kind: input, shape index: {}]   ;;  %s8552_s10 = inlined_call_operand.vmem [shape: bf16[4,8], index: 10, kind: input, shape index: {}]   ;;  %s8553_s11 = inlined_call_operand.vmem [shape: f32[1,8], index: 11, kind: input, shape index: {}]   ;;  %s8554_s12 = inlined_call_operand.vmem [shape: f32[1,8], index: 12, kind: input, shape index: {}]   ;;  %s8555_s13 = inlined_call_operand.hbm [shape: f32[1024,32], index: 13, kind: output, shape index: {}]  }
   0x1   :  { %8568 = sst [smem:[#allocation23_spill]] %s8555_s13 }
   0x2   :  { %18 = vsyncpa [#allocation3], 0 }
   0x3   :  { %20 = vsyncpa [#allocation3 + $0x1], 0  ;;  %s7253_s25 = smov 0   ;;  %s7255_s26 = smov 0  }
   0x4   :  { %s7257_s27 = smov 0   ;;  %s7259_s28 = smov 0  }
   0x5   :  { %s7261_s29 = smov 0   ;;  %s7263_s30 = smov 0  }
   0x6 LB: > { %8569 = sst [smem:[#allocation5_spill]] %s7151_s25  ;;  %s5483_s14 = sadd.s32 4294967295, %s7171_s30   ;;  %s7171_s30 = sphi %s7263_s30, %s26_s30   ;;  %s7167_s29 = sphi %s7261_s29, %s8621_s29   ;;  %s7163_s28 = sphi %s7259_s28, %s8620_s28   ;;  %s7159_s27 = sphi %s7257_s27, %s8619_s27   ;;  %s7155_s26 = sphi %s7255_s26, %s8618_s26   ;;  %s7151_s25 = sphi %s7253_s25, %s8617_s25  }
   0x7   : > { %8570 = sst [smem:[#allocation6_spill]] %s7155_s26  ;;  %s5484_s15 = sadd.s32 4294967294, %s7171_s30  }
   0x8   : > { %8571 = sst [smem:[#allocation7_spill]] %s7159_s27  ;;  %s38_s16 = sadd.s32 1, %s7167_s29 }
   0x9   : > { %8572 = sst [smem:[#allocation8_spill]] %s7167_s29  ;;  %s342_s17 = sadd.s32 1, %s7159_s27 }
   0xa   : > { %8573 = sst [smem:[#allocation9_spill]] %s7171_s30  ;;  %p40_p0 = scmp.ge.s32.totalorder %s38_s16, 2 }
   0xb   : > { %p352_p1 = scmp.ne.s32.totalorder %s7159_s27, %s7155_s26  ;;  %p353_p2 = scmp.eq.s32.totalorder %s5483_s14, 1 }
   0xc   : > { %p358_p3 = scmp.ne.s32.totalorder %s7155_s26, %s7151_s25  ;;  %s8623_s16 = smov (%p40_p0, %s38_s16), 0 }
   0xd   : > { %8574 = sst [smem:[#allocation10_spill]] %s8623_s16  ;;  %p7293_p4 = por %p353_p2, %p352_p1 }
   0xe   : > { %p359_p5 = scmp.eq.s32.totalorder %s5484_s15, 1  ;;  %s339_s19 = ssub.s32 %s7167_s29, %s8623_s16 }
   0xf   : > { %s8575_s18 = scalar_select %p7293_p4, 1, 0 }
  0x10   : > { %p5487_p6 = scmp.ge.s32.totalorder %s7171_s30, 1  ;;  %p340_p7 = scmp.eq.s32.totalorder %s339_s19, 0 }
  0x11   : > { %8576 = sst [smem:[#allocation11_spill]] %s8575_s18  ;;  %p7300_p8 = por %p359_p5, %p358_p3 }
  0x12   : > { %p439_p9 = scmp.lt.s32.totalorder %s7171_s30, 3 }
  0x13   : > { %s8577_s20 = scalar_select %p7300_p8, 1, 0 }
  0x14   : > { %s7306_s21 = scalar_select %p340_p7, %s7159_s27, %s342_s17  }
  0x15   : > { %8578 = sst [smem:[#allocation12_spill]] %s8577_s20  ;;  %p440_p10 = pnand %p5487_p6, %p439_p9 }
  0x16   : > { %8579 = sst [smem:[#allocation13_spill]] %s7306_s21  ;;  %s8561_s22 = sand.u32 (!%p440_p10), 1, %s7155_s26  }
  0x17   : > { %443 = sbr.rel (%p440_p10) target bundleno = 668 (0x29c), region = 72  ;;  %s5489_s23 = sshll.u32 (!%p440_p10), %s7163_s28, 6 }
  0x18   : > { %s7312_s24 = sshll.u32 (!%p440_p10), %s8561_s22, 9  ;;  %p501_p11 = scmp.lt.s32.totalorder (!%p440_p10), %s5489_s23, 127 }
  0x19   : > { %p507_p12 = scmp.lt.s32.totalorder (!%p440_p10), %s7163_s28, 1  ;;  %s498_s17 = scalar_lea.vmem (!%p440_p10), [#allocation2], %s7312_s24 }
  0x1c   : > { %s8625_s23 = smov (!%p501_p11, %s5489_s23), 127 }
  0x1d   : > { %s508_s14 = scalar_select %p507_p12, %s7163_s28, 1 }
  0x1e   : > { %s5490_s15 = sshll.u32 %s8625_s23, 2 }
  0x1f   : > { %s7319_s16 = scalar_lea.vmem %s8542_s0, %s5490_s15  ;;  %s6826_s29 = smul.u32 400, %s508_s14 }
  0x20   : > { %s6827_s21 = smul.u32 576, %s508_s14  ;;  %s7337_s15 = smov 0  }
  0x21   : > { %s7324_s25 = scalar_lea.vmem %s8543_s1, %s6826_s29  ;;  %s7329_s13 = scalar_lea.vmem %s8551_s9, %s6826_s29 }
  0x22   : > { %s7334_s23 = scalar_lea.vmem %s8547_s5, %s6827_s21 }
  0x23 LB: >> { %v6896_v0 = vld [vmem:[%s8544_s2 + $0x8] sm:$0x3f]   ;;  %vm619_vm0 = vcmask 1045504   ;;  %s6165_s26 = smul.u32 40, %s7175_s15  ;;  %v6905_v2 = vld [vmem:[%s8544_s2 + $0x10] sm:$0x3f]   ;;  %s7175_s15 = sphi %s7337_s15, %s530_s15  }
  0x24   : >> { %6790 = vmatprep.subr.msk.bf16.mxu0 %vm619_vm0, %v6896_v0  ;;  %6791 = vmatprep.subr.msk.bf16.mxu1 %vm619_vm0, %v6896_v0  ;;  %v621_v1 = vsel %vm619_vm0, %v6896_v0, 0  ;;  %v6906_v3 = vld [vmem:[%s8544_s2] sm:$0x3f]   ;;  %vm606_vm1 = vcmask 97280   ;;  %v828_v4 = vsel %vm619_vm0, %v6905_v2, 0  ;;  %s6166_s29 = smul.u32 48, %s7175_s15 }
  0x25   : >> { %6389 = vmatpush3.bf16.msra.mxu0 %v621_v1  ;;  %6789 = vmatpush3.bf16.msra.mxu1 %v621_v1  ;;  %s7358_s22 = scalar_lea.vmem %s7324_s25, %s6165_s26  ;;  %v712_v19 = vsel %vm619_vm0, %v6906_v3, 0  ;;  %v6908_v21 = vld [vmem:[%s8544_s2 + $0x20] sm:$0x3f]   ;;  %v6910_v22 = vld [vmem:[%s8544_s2 + $0x18] sm:$0x3f]   ;;  %vm1795_vm2 = vcmask 1041408   ;;  %s7800_s14 = scalar_lea.vmem %s7329_s13, %s6165_s26 }
  0x26   : >> { %6793 = vmatprep.subr.msk.bf16.mxu0 %vm619_vm0, %v6905_v2  ;;  %v567_v5 = vld [vmem:[%s7358_s22] sm:$0xf]  ;;  %v568_v6 = vld [vmem:[%s7358_s22 + $0x4] sm:$0xf]  ;;  %v569_v7 = vld [vmem:[%s7358_s22 + $0x8] sm:$0xf]  ;;  %6792 = vmatprep.subr.msk.bf16.mxu1 %vm619_vm0, %v6906_v3  ;;  %s7452_s19 = scalar_lea.vmem %s7334_s23, %s6166_s29 }
  0x27   : >> { %v570_v8 = vld [vmem:[%s7358_s22 + $0xc] sm:$0xf]  ;;  %v5499_v9 = vcombine.low %v568_v6, %v569_v7  ;;  %v571_v10 = vld [vmem:[%s7358_s22 + $0x10] sm:$0xf]  ;;  %v572_v11 = vld [vmem:[%s7358_s22 + $0x14] sm:$0xf]  ;;  %v5508_v16 = vcombine.low %v567_v5, %v568_v6 }
  0x28   : >> { %v573_v12 = vld [vmem:[%s7358_s22 + $0x18] sm:$0xf]  ;;  %v574_v13 = vld [vmem:[%s7358_s22 + $0x1c] sm:$0xf]  ;;  %v577_v14 = vld [vmem:[%s7358_s22 + $0x20] sm:$0xf]  ;;  %v5500_v15 = vcombine.low %v570_v8, %v571_v10  ;;  %v5509_v25 = vcombine.low %v569_v7, %v570_v8  ;;  %v5510_v27 = vcombine.low %v571_v10, %v572_v11 }
  0x29   : >> { %6390 = vmatprep.mubr.msk.bf16.mxu0 %vm606_vm1, %v5499_v9  ;;  %v5501_v17 = vcombine.low %v572_v11, %v573_v12  ;;  %v5502_v18 = vcombine.low %v574_v13, %v577_v14  ;;  %v6907_v20 = vld [vmem:[%s7358_s22 + $0x8] sm:$0xff]   ;;  %v6909_v23 = vld [vmem:[%s7358_s22 + $0x10] sm:$0xff]   ;;  %v6911_v24 = vld [vmem:[%s7358_s22 + $0x18] sm:$0xff]   ;;  %v1080_v26 = vsel %vm619_vm0, %v6908_v21, 0  ;;  %v956_v29 = vsel %vm619_vm0, %v6910_v22, 0  ;;  %s5494_s26 = sshll.u32 %s7175_s15, 6 }
  0x2a   : >> { %6391 = vmatmul.mubr.msk.bf16.vlgmr.msra.gmra.mxu0 %vm606_vm1, %v5500_v15  ;;  %v6915_v28 = vld [vmem:[%s8544_s2 + $0x30] sm:$0x3f]   ;;  %v6918_v30 = vld [vmem:[%s8544_s2 + $0x28] sm:$0x3f]   ;;  %v6912_v31 = vld [vmem:[%s7358_s22 + $0x20] sm:$0xff]   ;;  %v5511_v33 = vcombine.low %v573_v12, %v574_v13  ;;  %vm1782_vm3 = vcmask 162816   ;;  %s8139_s18 = scalar_lea.vmem %s498_s17, %s5494_s26 [#allocation2] }
  0x2b   : >> { %6394 = vmatprep.mubr.msk.bf16.mxu1 %vm606_vm1, %v5501_v17  ;;  %6409 = vmatpush3.bf16.msra.mxu0 %v828_v4  ;;  %v6914_v32 = vld [vmem:[%s7358_s22 + $0x2c] sm:$0xff]   ;;  %v6917_v36 = vld [vmem:[%s7358_s22 + $0x34] sm:$0xff]   ;;  %v1332_v37 = vsel %vm619_vm0, %v6915_v28, 0  ;;  %v6920_v38 = vld [vmem:[%s7358_s22 + $0x3c] sm:$0xff]   ;;  %v1204_v40 = vsel %vm619_vm0, %v6918_v30, 0  ;;  %s534_s20 = sshra.s32 %s5494_s26, 3 }
  0x2c   : >> { %6395 = vmatmul.mubr.msk.bf16.vlgmr.msra.gmra.mxu1 %vm606_vm1, %v5502_v18  ;;  %6410 = vmatprep.mubr.msk.bf16.mxu0 %vm606_vm1, %v6907_v20  ;;  %v6913_v34 = vld [vmem:[%s7358_s22 + $0x28] sm:$0xff]   ;;  %v6916_v35 = vld [vmem:[%s7358_s22 + $0x30] sm:$0xff]   ;;  %v6925_v39 = vld [vmem:[%s8544_s2 + $0x40] sm:$0x3f]   ;;  %s5495_s29 = sshll.u32 %s534_s20, 2  ;;  %vm555_vm4 = vcmask 64512  }
  0x2d   : >> { %6399 = vmatpush3.bf16.msra.mxu1 %v712_v19  ;;  %6400 = vmatprep.mubr.msk.bf16.mxu1 %vm606_vm1, %v5508_v16  ;;  %v6919_v41 = vld [vmem:[%s7358_s22 + $0x38] sm:$0xff]   ;;  %v6922_v43 = vld [vmem:[%s7358_s22 + $0x44] sm:$0xff]   ;;  %v6924_v45 = vld [vmem:[%s7358_s22 + $0x50] sm:$0xff]   ;;  %v1580_v50 = vsel %vm619_vm0, %v6925_v39, 0  ;;  %s8110_s30 = scalar_lea.vmem %s7319_s16, %s5495_s29  ;;  %vm5140_vm5 = vcmask 31744   ;;  %s7177_s21 = smov 8  }
  0x2e   : >> { %6795 = vmatprep.subr.msk.bf16.mxu0 %vm619_vm0, %v6908_v21  ;;  %6794 = vmatprep.subr.msk.bf16.mxu1 %vm619_vm0, %v6910_v22  ;;  %v6928_v42 = vld [vmem:[%s8544_s2 + $0x38] sm:$0x3f]   ;;  %v6921_v44 = vld [vmem:[%s7358_s22 + $0x40] sm:$0xff]   ;;  %v6923_v46 = vld [vmem:[%s7358_s22 + $0x30] sm:$0xff]   ;;  %vm1725_vm6 = vcmask 130112   ;;  %vm5010_vm7 = vcmask 195712  }
  0x2f   : >> { %v6927_v47 = vld [vmem:[%s7358_s22 + $0x58] sm:$0xff]   ;;  %v6930_v49 = vld [vmem:[%s7358_s22 + $0x60] sm:$0xff]   ;;  %v6935_v51 = vld [vmem:[%s8548_s6 + $0x8] ss:$0 sps:$4 sm:$0x33]   ;;  %v1456_v54 = vsel %vm619_vm0, %v6928_v42, 0 }
  0x30   : >> { %v6926_v48 = vld [vmem:[%s7358_s22 + $0x38] sm:$0xff]   ;;  %v6929_v52 = vld [vmem:[%s7358_s22 + $0x40] sm:$0xff]   ;;  %v6938_v53 = vld [vmem:[%s8548_s6 + $0x14] ss:$0 sps:$4 sm:$0x33]   ;;  %v1892_v63 = vsel %vm1795_vm2, %v6935_v51, 0 }
  0x31   : >> { %v6932_v55 = vld [vmem:[%s7358_s22 + $0x68] sm:$0xff]   ;;  %v6934_v56 = vld [vmem:[%s7358_s22 + $0x58] sm:$0xff]   ;;  %v6937_v59 = vld [vmem:[%s7358_s22 + $0x60] sm:$0xff]   ;;  %v1797_v0 = vsel %vm1795_vm2, %v6938_v53, 0  ;;  %vm5291_vm8 = vcmask 261312   ;;  %s530_s15 = sadd.s32 1, %s7175_s15  }
  0x32   : >> { %6411 = vmatmul.mubr.msk.bf16.vlgmr.msra.gmra.mxu0 %vm606_vm1, %v6909_v23  ;;  %v6931_v57 = vld [vmem:[%s7358_s22 + $0x48] sm:$0xff]   ;;  %v6933_v58 = vld [vmem:[%s7358_s22 + $0x54] sm:$0xff]   ;;  %v6941_v60 = vld [vmem:[%s8548_s6] sm:$0xff]   ;;  %p527_p13 = scmp.ge.s32.totalorder %s530_s15, 8  }
  0x33   : >> { %6429 = vmatpush3.bf16.msra.mxu0 %v1080_v26  ;;  %6414 = vmatprep.mubr.msk.bf16.mxu0 %vm606_vm1, %v6911_v24  ;;  %v6940_v61 = vld [vmem:[%s7358_s22 + $0x68] sm:$0xff]   ;;  %v6936_v62 = vld [vmem:[%s7358_s22 + $0x5c] sm:$0xff]   ;;  %v1738_v3 = vld [vmem:[%s7452_s19 + $0x4] sm:$0xf]  ;;  %s6168_s27 = sshll.u32 (%p527_p13), %s7163_s28, 13  ;;  %s8612_s20 = sld [smem:[#allocation23_spill]] (%p527_p13) }
  0x34   : >> { %6401 = vmatmul.mubr.msk.bf16.vlgmr.msra.gmra.mxu1 %vm606_vm1, %v5509_v25  ;;  %6797 = vmatprep.subr.msk.bf16.mxu0 %vm619_vm0, %v6915_v28  ;;  %v6939_v1 = vld [vmem:[%s7358_s22 + $0x64] sm:$0xff]   ;;  %v6944_v2 = vld [vmem:[%s8548_s6 + $0xc] sm:$0xff]   ;;  %v1737_v5 = vld [vmem:[%s7452_s19] sm:$0xf]  ;;  %s7180_s25 = smov (%p527_p13), [#allocation2]  }
  0x35   : >> { %6419 = vmatpush3.bf16.msra.mxu1 %v956_v29  ;;  %6404 = vmatprep.mubr.msk.bf16.mxu1 %vm606_vm1, %v5510_v27  ;;  %v6949_v4 = vld [vmem:[%s8548_s6 + $0x2c] ss:$0 sps:$4 sm:$0x33]   ;;  %v6943_v6 = vld [vmem:[%s7358_s22 + $0x70] sm:$0xff]   ;;  %v1739_v8 = vld [vmem:[%s7452_s19 + $0x8] sm:$0xf]  ;;  %v5658_v9 = vcombine.low %v1737_v5, %v1738_v3 }
  0x36   : >> { %6796 = vmatprep.subr.msk.bf16.mxu1 %vm619_vm0, %v6918_v30  ;;  %v6950_v7 = vld [vmem:[%s8548_s6 + $0x20] ss:$0 sps:$4 sm:$0x33]   ;;  %v6942_v10 = vld [vmem:[%s7358_s22 + $0x6c] sm:$0xff]   ;;  %v5648_v11 = vcombine.low %v1738_v3, %v1739_v8  ;;  %v1742_v13 = vld [vmem:[%s7452_s19 + $0x14] sm:$0xf] }
  0x37   : >> { %v1740_v12 = vld [vmem:[%s7452_s19 + $0xc] sm:$0xf]  ;;  %v1741_v14 = vld [vmem:[%s7452_s19 + $0x10] sm:$0xf]  ;;  %v1743_v16 = vld [vmem:[%s7452_s19 + $0x18] sm:$0xf] }
  0x38   : >> { %v5659_v15 = vcombine.low %v1739_v8, %v1740_v12  ;;  %v2142_v17 = vsel %vm1795_vm2, %v6949_v4, 0  ;;  %v5660_v18 = vcombine.low %v1741_v14, %v1742_v13  ;;  %v6953_v19 = vld [vmem:[%s8548_s6 + $0x24] sm:$0xff]   ;;  %v5649_v20 = vcombine.low %v1740_v12, %v1741_v14  ;;  %v6956_v23 = vld [vmem:[%s8548_s6 + $0x18] sm:$0xff]   ;;  %v1748_v27 = vld [vmem:[%s7452_s19 + $0x20] sm:$0xf]  ;;  %s7095_s28 = sshll.u32 (%p527_p13), %s7180_s25, 4  ;;  %s7096_s28 = int_to_ptr.vmem [resolvable:$false] %s7095_s28 }
  0x39   : >> { %v5650_v21 = vcombine.low %v1742_v13, %v1743_v16  ;;  %v2013_v22 = vsel %vm1795_vm2, %v6950_v7, 0  ;;  %v6959_v24 = vld [vmem:[%s8548_s6 + $0x44] ss:$0 sps:$4 sm:$0x33]   ;;  %v1744_v25 = vld [vmem:[%s7452_s19 + $0x1c] sm:$0xf]  ;;  %s8489_s29 = scalar_lea.hbm (%p527_p13), %s8612_s20, %s6168_s27 }
  0x3a   : >> { %6415 = vmatmul.mubr.msk.bf16.gmra.mxu0 %vm606_vm1, %v6912_v31  ;;  %v6962_v26 = vld [vmem:[%s8548_s6 + $0x38] ss:$0 sps:$4 sm:$0x33]   ;;  %v5661_v28 = vcombine.low %v1743_v16, %v1744_v25  ;;  %v6958_v29 = vld [vmem:[%s7452_s19 + $0xc] sm:$0xff]   ;;  %v5651_v30 = vcombine.low %v1744_v25, %v1748_v27  ;;  %v6992_v3 = vld [vmem:[%s8548_s6 + $0x60] sm:$0xff]   ;;  %s7097_s16 = scalar_lea.vmem (%p527_p13), %s7096_s28, 16384 }
  0x3b   : >> { %6430 = vmatprep.mubr.msk.bf16.mxu0 %vm606_vm1, %v6914_v32  ;;  %v6957_v31 = vld [vmem:[%s7452_s19 + $0x8] sm:$0xff]   ;;  %v6960_v32 = vld [vmem:[%s7452_s19 + $0x10] sm:$0xff]  }
  0x3c   : >> { %6405 = vmatmul.mubr.msk.bf16.gmra.mxu1 %vm606_vm1, %v5511_v33  ;;  %v6961_v33 = vld [vmem:[%s7452_s19 + $0x14] sm:$0xff]   ;;  %v6990_v8 = vld [vmem:[%s7452_s19 + $0x4c] sm:$0xff]   ;;  %v6996_v12 = vld [vmem:[%s7452_s19 + $0x44] sm:$0xff]  }
  0x3d   : >> { %6420 = vmatprep.mubr.msk.bf16.mxu1 %vm606_vm1, %v6913_v34  ;;  %v6964_v34 = vld [vmem:[%s7452_s19 + $0x1c] sm:$0xff]   ;;  %v6991_v5 = vld [vmem:[%s7452_s19 + $0x50] sm:$0xff]   ;;  %v7001_v14 = vld [vmem:[%s8548_s6 + $0x84] sm:$0xff]  }
  0x3e   : >> { %v7008_v25 = vld [vmem:[%s7452_s19 + $0x68] sm:$0xff]  }
  0x42   : >> { %6431 = vmatmul.mubr.msk.bf16.vlgmr.msra.gmra.mxu0 %vm606_vm1, %v6917_v36  ;;  %v6965_v36 = vld [vmem:[%s8548_s6 + $0x3c] sm:$0xff]  }
  0x43   : >> { %6449 = vmatpush3.bf16.msra.mxu0 %v1332_v37  ;;  %6434 = vmatprep.mubr.msk.bf16.mxu0 %vm606_vm1, %v6920_v38  ;;  %v6963_v37 = vld [vmem:[%s7452_s19 + $0x18] sm:$0xff]   ;;  %v2271_v38 = vsel %vm1795_vm2, %v6962_v26, 0 }
  0x44   : >> { %6421 = vmatmul.mubr.msk.bf16.vlgmr.msra.gmra.mxu1 %vm606_vm1, %v6916_v35  ;;  %6799 = vmatprep.subr.msk.bf16.mxu0 %vm619_vm0, %v6925_v39  ;;  %v2403_v35 = vsel %vm1795_vm2, %v6959_v24, 0  ;;  %v6968_v39 = vld [vmem:[%s8548_s6 + $0x30] sm:$0xff]  }
  0x45   : >> { %6439 = vmatpush3.bf16.msra.mxu1 %v1204_v40  ;;  %6424 = vmatprep.mubr.msk.bf16.mxu1 %vm606_vm1, %v6919_v41  ;;  %v6971_v40 = vld [vmem:[%s8548_s6 + $0x5c] ss:$0 sps:$4 sm:$0x33]   ;;  %v6967_v41 = vld [vmem:[%s7452_s19 + $0x24] sm:$0xff]  }
  0x46   : >> { %6798 = vmatprep.subr.msk.bf16.mxu1 %vm619_vm0, %v6928_v42  ;;  %v6970_v42 = vld [vmem:[%s7452_s19 + $0x30] sm:$0xff]  }
  0x4a   : >> { %6435 = vmatmul.mubr.msk.bf16.gmra.mxu0 %vm606_vm1, %v6922_v43  ;;  %v6974_v43 = vld [vmem:[%s8548_s6 + $0x50] ss:$0 sps:$4 sm:$0x33]  }
  0x4b   : >> { %6450 = vmatprep.mubr.msk.bf16.mxu0 %vm606_vm1, %v6924_v45  ;;  %v6969_v45 = vld [vmem:[%s7452_s19 + $0x10] sm:$0xff]  }
  0x4c   : >> { %6425 = vmatmul.mubr.msk.bf16.gmra.mxu1 %vm606_vm1, %v6921_v44  ;;  %v6966_v44 = vld [vmem:[%s7452_s19 + $0x20] sm:$0xff]  }
  0x4d   : >> { %6440 = vmatprep.mubr.msk.bf16.mxu1 %vm606_vm1, %v6923_v46  ;;  %v6972_v46 = vld [vmem:[%s7452_s19 + $0x18] sm:$0xff]  }
  0x52   : >> { %6451 = vmatmul.mubr.msk.bf16.vlgmr.msra.gmra.mxu0 %vm606_vm1, %v6927_v47  ;;  %v6973_v47 = vld [vmem:[%s7452_s19 + $0x38] sm:$0xff]  }
  0x53   : >> { %6469 = vmatpush3.bf16.msra.mxu0 %v1580_v50  ;;  %6454 = vmatprep.mubr.msk.bf16.mxu0 %vm606_vm1, %v6930_v49  ;;  %v2661_v49 = vsel %vm1795_vm2, %v6971_v40, 0  ;;  %v6977_v50 = vld [vmem:[%s8548_s6 + $0x54] sm:$0xff]  }
  0x54   : >> { %6441 = vmatmul.mubr.msk.bf16.vlgmr.msra.gmra.mxu1 %vm606_vm1, %v6926_v48  ;;  %6801 = vmatprep.subr.msk.bf16.mxu0 %vm1795_vm2, %v6935_v51  ;;  %v6976_v48 = vld [vmem:[%s7452_s19 + $0x40] sm:$0xff]   ;;  %v2532_v51 = vsel %vm1795_vm2, %v6974_v43, 0 }
  0x55   : >> { %6459 = vmatpush3.bf16.msra.mxu1 %v1456_v54  ;;  %6444 = vmatprep.mubr.msk.bf16.mxu1 %vm606_vm1, %v6929_v52  ;;  %v6975_v52 = vld [vmem:[%s7452_s19 + $0x20] sm:$0xff]   ;;  %v6983_v54 = vld [vmem:[%s8548_s6 + $0x74] ss:$0 sps:$4 sm:$0x33]  }
  0x56   : >> { %6800 = vmatprep.subr.msk.bf16.mxu1 %vm1795_vm2, %v6938_v53  ;;  %v6980_v53 = vld [vmem:[%s8548_s6 + $0x48] sm:$0xff]  }
  0x5a   : >> { %6455 = vmatmul.mubr.msk.bf16.gmra.mxu0 %vm606_vm1, %v6932_v55  ;;  %v6986_v55 = vld [vmem:[%s8548_s6 + $0x68] ss:$0 sps:$4 sm:$0x33]  }
  0x5b   : >> { %6470 = vmatprep.mubr.msk.bf16.mxu0 %vm606_vm1, %v6934_v56  ;;  %v6979_v56 = vld [vmem:[%s7452_s19 + $0x48] sm:$0xff]  }
  0x5c   : >> { %6445 = vmatmul.mubr.msk.bf16.gmra.mxu1 %vm606_vm1, %v6931_v57  ;;  %v6982_v57 = vld [vmem:[%s7452_s19 + $0x38] sm:$0xff]  }
  0x5d   : >> { %6460 = vmatprep.mubr.msk.bf16.mxu1 %vm606_vm1, %v6933_v58  ;;  %v6978_v58 = vld [vmem:[%s7452_s19 + $0x28] sm:$0xff]  }
  0x62   : >> { %6471 = vmatmul.mubr.msk.bf16.vlgmr.msra.gmra.mxu0 %vm606_vm1, %v6937_v59  ;;  %v6981_v59 = vld [vmem:[%s7452_s19 + $0x34] sm:$0xff]  }
  0x63   : >> { %6491 = vmatpush3.bf16.msra.mxu0 %v1892_v63  ;;  %6474 = vmatprep.mubr.msk.bf16.mxu0 %vm606_vm1, %v6940_v61  ;;  %v6985_v61 = vld [vmem:[%s7452_s19 + $0x40] sm:$0xff]   ;;  %v2919_v63 = vsel %vm1795_vm2, %v6983_v54, 0 }
  0x64   : >> { %6461 = vmatmul.mubr.msk.bf16.vlgmr.msra.gmra.mxu1 %vm606_vm1, %v6936_v62  ;;  %6492 = vmatprep.subr.bf16.mxu0 %v6941_v60  ;;  %v6988_v62 = vld [vmem:[%s7452_s19 + $0x48] sm:$0xff]  }
  0x65   : >> { %6479 = vmatpush3.bf16.msra.mxu1 %v1797_v0  ;;  %6464 = vmatprep.mubr.msk.bf16.mxu1 %vm606_vm1, %v6939_v1  ;;  %v6989_v0 = vld [vmem:[%s8548_s6 + $0x6c] sm:$0xff]   ;;  %v6987_v1 = vld [vmem:[%s7452_s19 + $0x44] sm:$0xff]  }
  0x66   : >> { %6480 = vmatprep.subr.bf16.mxu1 %v6944_v2 }
  0x67   : >> { %6493 = vmatpush3.bf16.msra.mxu0 %v6941_v60  ;;  %v6984_v60 = vld [vmem:[%s7452_s19 + $0x3c] sm:$0xff]  }
  0x68   : >> { %6803 = vmatprep.subr.msk.bf16.mxu0 %vm1795_vm2, %v6949_v4  ;;  %v6995_v4 = vld [vmem:[%s8548_s6 + $0x8c] ss:$0 sps:$4 sm:$0x33]  }
  0x69   : >> { %6481 = vmatpush3.bf16.msra.mxu1 %v6944_v2  ;;  %v2790_v2 = vsel %vm1795_vm2, %v6986_v55, 0  ;;  %v3180_v13 = vsel %vm1795_vm2, %v6995_v4, 0 }
  0x6a   : >> { %6475 = vmatmul.mubr.msk.bf16.gmra.mxu0 %vm606_vm1, %v6943_v6  ;;  %6802 = vmatprep.subr.msk.bf16.mxu1 %vm1795_vm2, %v6950_v7  ;;  %v6998_v6 = vld [vmem:[%s8548_s6 + $0x80] ss:$0 sps:$4 sm:$0x33]  }
  0x6b   : >> { %6494 = vmatprep.mubr.msk.bf16.mxu0 %vm1782_vm3, %v5658_v9  ;;  %v6994_v7 = vld [vmem:[%s7452_s19 + $0x40] sm:$0xff]   ;;  %v3051_v16 = vsel %vm1795_vm2, %v6998_v6, 0 }
  0x6c   : >> { %6465 = vmatmul.mubr.msk.bf16.gmra.mxu1 %vm606_vm1, %v6942_v10  ;;  %v6993_v9 = vld [vmem:[%s7452_s19 + $0x3c] sm:$0xff]   ;;  %v6997_v10 = vld [vmem:[%s7452_s19 + $0x48] sm:$0xff]  }
  0x6d   : >> { %6482 = vmatprep.mubr.msk.bf16.mxu1 %vm1782_vm3, %v5648_v11  ;;  %v7000_v11 = vld [vmem:[%s7452_s19 + $0x50] sm:$0xff]  }
  0x72   : >> { %6495 = vmatmul.mubr.msk.bf16.vlgmr.msra.gmra.mxu0 %vm1782_vm3, %v5659_v15  ;;  %v6999_v15 = vld [vmem:[%s7452_s19 + $0x4c] sm:$0xff]  }
  0x73   : >> { %6515 = vmatpush3.bf16.msra.mxu0 %v2142_v17  ;;  %6498 = vmatprep.mubr.msk.bf16.mxu0 %vm1782_vm3, %v5660_v18  ;;  %v7004_v17 = vld [vmem:[%s8548_s6 + $0x78] sm:$0xff]   ;;  %v7007_v18 = vld [vmem:[%s8548_s6 + $0xa4] ss:$0 sps:$4 sm:$0x33]  }
  0x74   : >> { %6483 = vmatmul.mubr.msk.bf16.vlgmr.msra.gmra.mxu1 %vm1782_vm3, %v5649_v20  ;;  %6516 = vmatprep.subr.bf16.mxu0 %v6953_v19  ;;  %v7003_v20 = vld [vmem:[%s7452_s19 + $0x58] sm:$0xff]   ;;  %v3438_v27 = vsel %vm1795_vm2, %v7007_v18, 0 }
  0x75   : >> { %6503 = vmatpush3.bf16.msra.mxu1 %v2013_v22  ;;  %6486 = vmatprep.mubr.msk.bf16.mxu1 %vm1782_vm3, %v5650_v21  ;;  %v7006_v21 = vld [vmem:[%s7452_s19 + $0x64] sm:$0xff]   ;;  %v7002_v22 = vld [vmem:[%s7452_s19 + $0x54] sm:$0xff]  }
  0x76   : >> { %6504 = vmatprep.subr.bf16.mxu1 %v6956_v23 }
  0x77   : >> { %6517 = vmatpush3.bf16.msra.mxu0 %v6953_v19  ;;  %v7010_v19 = vld [vmem:[%s8548_s6 + $0x98] ss:$0 sps:$4 sm:$0x33]  }
  0x78   : >> { %6805 = vmatprep.subr.msk.bf16.mxu0 %vm1795_vm2, %v6959_v24  ;;  %v7009_v24 = vld [vmem:[%s7452_s19 + $0x6c] sm:$0xff]  }
  0x79   : >> { %6505 = vmatpush3.bf16.msra.mxu1 %v6956_v23  ;;  %v7005_v23 = vld [vmem:[%s7452_s19 + $0x60] sm:$0xff]  }
  0x7a   : >> { %6499 = vmatmul.mubr.msk.bf16.gmra.mxu0 %vm1782_vm3, %v5661_v28  ;;  %6804 = vmatprep.subr.msk.bf16.mxu1 %vm1795_vm2, %v6962_v26  ;;  %v7012_v26 = vld [vmem:[%s7452_s19 + $0x74] sm:$0xff]   ;;  %v7013_v28 = vld [vmem:[%s8548_s6 + $0x9c] sm:$0xff]  }
  0x7b   : >> { %6518 = vmatprep.mubr.msk.bf16.mxu0 %vm1782_vm3, %v6958_v29  ;;  %v7011_v29 = vld [vmem:[%s7452_s19 + $0x70] sm:$0xff]  }
  0x7c   : >> { %6487 = vmatmul.mubr.msk.bf16.gmra.mxu1 %vm1782_vm3, %v5651_v30  ;;  %v3309_v30 = vsel %vm1795_vm2, %v7010_v19, 0 }
  0x7d   : >> { %6506 = vmatprep.mubr.msk.bf16.mxu1 %vm1782_vm3, %v6957_v31  ;;  %v7016_v31 = vld [vmem:[%s8548_s6 + $0x90] sm:$0xff]  }
  0x82   : >> { %6519 = vmatmul.mubr.msk.bf16.vlgmr.msra.gmra.mxu0 %vm1782_vm3, %v6961_v33  ;;  %v7022_v33 = vld [vmem:[%s8548_s6 + $0xb0] ss:$0 sps:$4 sm:$0x33]  }
  0x83   : >> { %6539 = vmatpush3.bf16.msra.mxu0 %v2403_v35  ;;  %6522 = vmatprep.mubr.msk.bf16.mxu0 %vm1782_vm3, %v6964_v34  ;;  %v7015_v34 = vld [vmem:[%s7452_s19 + $0x7c] sm:$0xff]   ;;  %v7018_v35 = vld [vmem:[%s7452_s19 + $0x6c] sm:$0xff]  }
  0x84   : >> { %6507 = vmatmul.mubr.msk.bf16.vlgmr.msra.gmra.mxu1 %vm1782_vm3, %v6960_v32  ;;  %6540 = vmatprep.subr.bf16.mxu0 %v6965_v36  ;;  %v7019_v32 = vld [vmem:[%s8548_s6 + $0xbc] ss:$0 sps:$4 sm:$0x33]  }
  0x85   : >> { %6527 = vmatpush3.bf16.msra.mxu1 %v2271_v38  ;;  %6510 = vmatprep.mubr.msk.bf16.mxu1 %vm1782_vm3, %v6963_v37  ;;  %v7017_v37 = vld [vmem:[%s7452_s19 + $0x68] sm:$0xff]   ;;  %v7021_v38 = vld [vmem:[%s7452_s19 + $0x74] sm:$0xff]  }
  0x86   : >> { %6528 = vmatprep.subr.bf16.mxu1 %v6968_v39 }
  0x87   : >> { %6541 = vmatpush3.bf16.msra.mxu0 %v6965_v36  ;;  %v7014_v36 = vld [vmem:[%s7452_s19 + $0x78] sm:$0xff]  }
  0x88   : >> { %6807 = vmatprep.subr.msk.bf16.mxu0 %vm1795_vm2, %v6971_v40  ;;  %v7020_v40 = vld [vmem:[%s7452_s19 + $0x70] sm:$0xff]  }
  0x89   : >> { %6529 = vmatpush3.bf16.msra.mxu1 %v6968_v39  ;;  %v7024_v39 = vld [vmem:[%s7452_s19 + $0x7c] sm:$0xff]  }
  0x8a   : >> { %6523 = vmatmul.mubr.msk.bf16.gmra.mxu0 %vm1782_vm3, %v6967_v41  ;;  %6806 = vmatprep.subr.msk.bf16.mxu1 %vm1795_vm2, %v6974_v43  ;;  %v3700_v41 = vsel %vm1795_vm2, %v7019_v32, 0  ;;  %v7023_v43 = vld [vmem:[%s7452_s19 + $0x78] sm:$0xff]  }
  0x8b   : >> { %6542 = vmatprep.mubr.msk.bf16.mxu0 %vm1782_vm3, %v6970_v42  ;;  %v7025_v42 = vld [vmem:[%s8548_s6 + $0xb4] sm:$0xff]  }
  0x8c   : >> { %6511 = vmatmul.mubr.msk.bf16.gmra.mxu1 %vm1782_vm3, %v6966_v44  ;;  %v3567_v44 = vsel %vm1795_vm2, %v7022_v33, 0 }
  0x8d   : >> { %6530 = vmatprep.mubr.msk.bf16.mxu1 %vm1782_vm3, %v6969_v45  ;;  %v7028_v45 = vld [vmem:[%s8548_s6 + $0xa8] sm:$0xff]  }
  0x92   : >> { %6543 = vmatmul.mubr.msk.bf16.vlgmr.msra.gmra.mxu0 %vm1782_vm3, %v6973_v47  ;;  %v7027_v47 = vld [vmem:[%s7452_s19 + $0x84] sm:$0xff]  }
  0x93   : >> { %6563 = vmatpush3.bf16.msra.mxu0 %v2661_v49  ;;  %6546 = vmatprep.mubr.msk.bf16.mxu0 %vm1782_vm3, %v6976_v48  ;;  %v7034_v48 = vld [vmem:[%s8548_s6 + $0xc8] ss:$0 sps:$4 sm:$0x33]   ;;  %v7030_v49 = vld [vmem:[%s7452_s19 + $0x90] sm:$0xff]  }
  0x94   : >> { %6531 = vmatmul.mubr.msk.bf16.vlgmr.msra.gmra.mxu1 %vm1782_vm3, %v6972_v46  ;;  %6564 = vmatprep.subr.bf16.mxu0 %v6977_v50  ;;  %v7031_v46 = vld [vmem:[%s8548_s6 + $0xd4] ss:$0 sps:$4 sm:$0x33]  }
  0x95   : >> { %6551 = vmatpush3.bf16.msra.mxu1 %v2532_v51  ;;  %6534 = vmatprep.mubr.msk.bf16.mxu1 %vm1782_vm3, %v6975_v52  ;;  %v7029_v51 = vld [vmem:[%s7452_s19 + $0x70] sm:$0xff]   ;;  %v7033_v52 = vld [vmem:[%s7452_s19 + $0x98] sm:$0xff]  }
  0x96   : >> { %6552 = vmatprep.subr.bf16.mxu1 %v6980_v53 }
  0x97   : >> { %6565 = vmatpush3.bf16.msra.mxu0 %v6977_v50  ;;  %v7026_v50 = vld [vmem:[%s7452_s19 + $0x80] sm:$0xff]  }
  0x98   : >> { %6809 = vmatprep.subr.msk.bf16.mxu0 %vm1795_vm2, %v6983_v54  ;;  %v7032_v54 = vld [vmem:[%s7452_s19 + $0x78] sm:$0xff]  }
  0x99   : >> { %6553 = vmatpush3.bf16.msra.mxu1 %v6980_v53  ;;  %v7036_v53 = vld [vmem:[%s7452_s19 + $0xa0] sm:$0xff]  }
  0x9a   : >> { %6547 = vmatmul.mubr.msk.bf16.gmra.mxu0 %vm1782_vm3, %v6979_v56  ;;  %6808 = vmatprep.subr.msk.bf16.mxu1 %vm1795_vm2, %v6986_v55  ;;  %v3958_v55 = vsel %vm1795_vm2, %v7031_v46, 0  ;;  %v7037_v56 = vld [vmem:[%s8548_s6 + $0xcc] sm:$0xff]  }
  0x9b   : >> { %6566 = vmatprep.mubr.msk.bf16.mxu0 %vm1782_vm3, %v6982_v57  ;;  %v7035_v57 = vld [vmem:[%s7452_s19 + $0x80] sm:$0xff]  }
  0x9c   : >> { %6535 = vmatmul.mubr.msk.bf16.gmra.mxu1 %vm1782_vm3, %v6978_v58  ;;  %v3829_v58 = vsel %vm1795_vm2, %v7034_v48, 0 }
  0x9d   : >> { %6554 = vmatprep.mubr.msk.bf16.mxu1 %vm1782_vm3, %v6981_v59  ;;  %v7040_v59 = vld [vmem:[%s8548_s6 + $0xc0] sm:$0xff]  }
  0xa2   : >> { %6567 = vmatmul.mubr.msk.bf16.vlgmr.msra.gmra.mxu0 %vm1782_vm3, %v6985_v61  ;;  %v7039_v61 = vld [vmem:[%s7452_s19 + $0xa8] sm:$0xff]  }
  0xa3   : >> { %6587 = vmatpush3.bf16.msra.mxu0 %v2919_v63  ;;  %6570 = vmatprep.mubr.msk.bf16.mxu0 %vm1782_vm3, %v6988_v62  ;;  %v7046_v62 = vld [vmem:[%s8548_s6 + $0xe0] ss:$0 sps:$4 sm:$0x33]   ;;  %v7042_v63 = vld [vmem:[%s7452_s19 + $0x98] sm:$0xff]  }
  0xa4   : >> { %6555 = vmatmul.mubr.msk.bf16.vlgmr.msra.gmra.mxu1 %vm1782_vm3, %v6984_v60  ;;  %6588 = vmatprep.subr.bf16.mxu0 %v6989_v0  ;;  %v7043_v60 = vld [vmem:[%s8548_s6 + $0xec] ss:$0 sps:$4 sm:$0x33]  }
  0xa5   : >> { %6575 = vmatpush3.bf16.msra.mxu1 %v2790_v2  ;;  %6558 = vmatprep.mubr.msk.bf16.mxu1 %vm1782_vm3, %v6987_v1  ;;  %v7041_v1 = vld [vmem:[%s7452_s19 + $0x94] sm:$0xff]  }
  0xa6   : >> { %6576 = vmatprep.subr.bf16.mxu1 %v6992_v3 }
  0xa7   : >> { %6589 = vmatpush3.bf16.msra.mxu0 %v6989_v0  ;;  %v7038_v0 = vld [vmem:[%s7452_s19 + $0x88] sm:$0xff]  }
  0xa8   : >> { %6811 = vmatprep.subr.msk.bf16.mxu0 %vm1795_vm2, %v6995_v4 }
  0xa9   : >> { %6577 = vmatpush3.bf16.msra.mxu1 %v6992_v3 }
  0xaa   : >> { %6571 = vmatmul.mubr.msk.bf16.gmra.mxu0 %vm1782_vm3, %v6991_v5  ;;  %6810 = vmatprep.subr.msk.bf16.mxu1 %vm1795_vm2, %v6998_v6 }
  0xab   : >> { %6590 = vmatprep.mubr.msk.bf16.mxu0 %vm1782_vm3, %v6994_v7  ;;  %v7045_v7 = vld [vmem:[%s7452_s19 + $0xa0] sm:$0xff]  }
  0xac   : >> { %6559 = vmatmul.mubr.msk.bf16.gmra.mxu1 %vm1782_vm3, %v6990_v8  ;;  %v7048_v8 = vld [vmem:[%s7452_s19 + $0xa8] sm:$0xff]  }
  0xad   : >> { %6578 = vmatprep.mubr.msk.bf16.mxu1 %vm1782_vm3, %v6993_v9 }
  0xb2   : >> { %6591 = vmatmul.mubr.msk.bf16.vlgmr.msra.gmra.mxu0 %vm1782_vm3, %v6997_v10 }
  0xb3   : >> { %6611 = vmatpush3.bf16.msra.mxu0 %v3180_v13  ;;  %6594 = vmatprep.mubr.msk.bf16.mxu0 %vm1782_vm3, %v7000_v11  ;;  %v7044_v11 = vld [vmem:[%s7452_s19 + $0x9c] sm:$0xff]   ;;  %v7049_v13 = vld [vmem:[%s8548_s6 + $0xe4] sm:$0xff]  }
  0xb4   : >> { %6579 = vmatmul.mubr.msk.bf16.vlgmr.msra.gmra.mxu1 %vm1782_vm3, %v6996_v12  ;;  %6612 = vmatprep.subr.bf16.mxu0 %v7001_v14  ;;  %v4216_v12 = vsel %vm1795_vm2, %v7043_v60, 0 }
  0xb5   : >> { %6599 = vmatpush3.bf16.msra.mxu1 %v3051_v16  ;;  %6582 = vmatprep.mubr.msk.bf16.mxu1 %vm1782_vm3, %v6999_v15 }
  0xb6   : >> { %6600 = vmatprep.subr.bf16.mxu1 %v7004_v17 }
  0xb7   : >> { %6613 = vmatpush3.bf16.msra.mxu0 %v7001_v14  ;;  %v7047_v14 = vld [vmem:[%s7452_s19 + $0xa4] sm:$0xff]  }
  0xb8   : >> { %6813 = vmatprep.subr.msk.bf16.mxu0 %vm1795_vm2, %v7007_v18  ;;  %v7052_v18 = vld [vmem:[%s8548_s6 + $0xd8] sm:$0xff]  }
  0xb9   : >> { %6601 = vmatpush3.bf16.msra.mxu1 %v7004_v17  ;;  %v4087_v17 = vsel %vm1795_vm2, %v7046_v62, 0 }
  0xba   : >> { %6595 = vmatmul.mubr.msk.bf16.gmra.mxu0 %vm1782_vm3, %v7003_v20  ;;  %6812 = vmatprep.subr.msk.bf16.mxu1 %vm1795_vm2, %v7010_v19 }
  0xbb   : >> { %6614 = vmatprep.mubr.msk.bf16.mxu0 %vm1782_vm3, %v7006_v21  ;;  %v7055_v21 = vld [vmem:[%s8548_s6 + $0x104] ss:$0 sps:$4 sm:$0x33]  }
  0xbc   : >> { %6583 = vmatmul.mubr.msk.bf16.gmra.mxu1 %vm1782_vm3, %v7002_v22 }
  0xbd   : >> { %6602 = vmatprep.mubr.msk.bf16.mxu1 %vm1782_vm3, %v7005_v23 }
  0xc2   : >> { %6615 = vmatmul.mubr.msk.bf16.vlgmr.msra.gmra.mxu0 %vm1782_vm3, %v7009_v24  ;;  %v7051_v24 = vld [vmem:[%s7452_s19 + $0xb0] sm:$0xff]  }
  0xc3   : >> { %6635 = vmatpush3.bf16.msra.mxu0 %v3438_v27  ;;  %6618 = vmatprep.mubr.msk.bf16.mxu0 %vm1782_vm3, %v7012_v26  ;;  %v7050_v26 = vld [vmem:[%s7452_s19 + $0xac] sm:$0xff]   ;;  %v7054_v27 = vld [vmem:[%s7452_s19 + $0xa0] sm:$0xff]  }
  0xc4   : >> { %6603 = vmatmul.mubr.msk.bf16.vlgmr.msra.gmra.mxu1 %vm1782_vm3, %v7008_v25  ;;  %6636 = vmatprep.subr.bf16.mxu0 %v7013_v28  ;;  %v7058_v25 = vld [vmem:[%s8548_s6 + $0xf8] ss:$0 sps:$4 sm:$0x33]  }
  0xc5   : >> { %6623 = vmatpush3.bf16.msra.mxu1 %v3309_v30  ;;  %6606 = vmatprep.mubr.msk.bf16.mxu1 %vm1782_vm3, %v7011_v29  ;;  %v7053_v30 = vld [vmem:[%s7452_s19 + $0x9c] sm:$0xff]  }
  0xc6   : >> { %6624 = vmatprep.subr.bf16.mxu1 %v7016_v31 }
  0xc7   : >> { %6637 = vmatpush3.bf16.msra.mxu0 %v7013_v28 }
  0xc8   : >> { %6815 = vmatprep.subr.msk.bf16.mxu0 %vm1795_vm2, %v7019_v32  ;;  %v5022_v32 = vld [vmem:[%s7800_s14 + $0x4] sm:$0xf] }
  0xc9   : >> { %6625 = vmatpush3.bf16.msra.mxu1 %v7016_v31  ;;  %v5021_v31 = vld [vmem:[%s7800_s14] sm:$0xf] }
  0xca   : >> { %6619 = vmatmul.mubr.msk.bf16.gmra.mxu0 %vm1782_vm3, %v7015_v34  ;;  %6814 = vmatprep.subr.msk.bf16.mxu1 %vm1795_vm2, %v7022_v33  ;;  %v5023_v33 = vld [vmem:[%s7800_s14 + $0x8] sm:$0xf]  ;;  %v5024_v34 = vld [vmem:[%s7800_s14 + $0xc] sm:$0xf] }
  0xcb   : >> { %6638 = vmatprep.mubr.msk.bf16.mxu0 %vm1782_vm3, %v7018_v35  ;;  %v7823_v35 = vld [vmem:[%s7800_s14 + $0x10] sm:$0xf] }
  0xcc   : >> { %6607 = vmatmul.mubr.msk.bf16.gmra.mxu1 %vm1782_vm3, %v7014_v36 }
  0xcd   : >> { %6626 = vmatprep.mubr.msk.bf16.mxu1 %vm1782_vm3, %v7017_v37 }
  0xd2   : >> { %6639 = vmatmul.mubr.msk.bf16.vlgmr.msra.gmra.mxu0 %vm1782_vm3, %v7021_v38  ;;  %v5030_v38 = vmax.bf16 %v5022_v32, %v5021_v31 }
  0xd3   : >> { %6659 = vmatpush3.bf16.msra.mxu0 %v3700_v41  ;;  %6642 = vmatprep.mubr.msk.bf16.mxu0 %vm1782_vm3, %v7024_v39  ;;  %v5031_v41 = vmax.bf16 %v5023_v33, %v5022_v32  ;;  %v5027_v32 = vld [vmem:[%s7800_s14 + $0x18] sm:$0xf] }
  0xd4   : >> { %6627 = vmatmul.mubr.msk.bf16.vlgmr.msra.gmra.mxu1 %vm1782_vm3, %v7020_v40  ;;  %6660 = vmatprep.subr.bf16.mxu0 %v7025_v42 }
  0xd5   : >> { %6647 = vmatpush3.bf16.msra.mxu1 %v3567_v44  ;;  %6630 = vmatprep.mubr.msk.bf16.mxu1 %vm1782_vm3, %v7023_v43  ;;  %v5033_v43 = vmax.bf16 %v7823_v35, %v5024_v34  ;;  %v7840_v44 = vld [vmem:[%s7800_s14 + $0x14] sm:$0xf] }
  0xd6   : >> { %6648 = vmatprep.subr.bf16.mxu1 %v7028_v45 }
  0xd7   : >> { %6661 = vmatpush3.bf16.msra.mxu0 %v7025_v42  ;;  %v5032_v42 = vmax.bf16 %v5024_v34, %v5023_v33 }
  0xd8   : >> { %6817 = vmatprep.subr.msk.bf16.mxu0 %vm1795_vm2, %v7031_v46 }
  0xd9   : >> { %6649 = vmatpush3.bf16.msra.mxu1 %v7028_v45 }
  0xda   : >> { %6643 = vmatmul.mubr.msk.bf16.gmra.mxu0 %vm1782_vm3, %v7027_v47  ;;  %6816 = vmatprep.subr.msk.bf16.mxu1 %vm1795_vm2, %v7034_v48  ;;  %v7057_v47 = vld [vmem:[%s7452_s19 + $0xa8] sm:$0xff]  }
  0xdb   : >> { %6662 = vmatprep.mubr.msk.bf16.mxu0 %vm1782_vm3, %v7030_v49  ;;  %v7056_v48 = vld [vmem:[%s7452_s19 + $0xa4] sm:$0xff]   ;;  %v7060_v49 = vld [vmem:[%s7452_s19 + $0xb0] sm:$0xff]  }
  0xdc   : >> { %6631 = vmatmul.mubr.msk.bf16.gmra.mxu1 %vm1782_vm3, %v7026_v50  ;;  %v5039_v50 = vmax.bf16 %v5030_v38, %v5023_v33  ;;  %v7062_v38 = vld [vmem:[%s7452_s19 + $0xb4] sm:$0xff]  }
  0xdd   : >> { %6650 = vmatprep.mubr.msk.bf16.mxu1 %vm1782_vm3, %v7029_v51 }
  0xe2   : >> { %6663 = vmatmul.mubr.msk.bf16.vlgmr.msra.gmra.mxu0 %vm1782_vm3, %v7033_v52 }
  0xe3   : >> { %6683 = vmatpush3.bf16.msra.mxu0 %v3958_v55  ;;  %6666 = vmatprep.mubr.msk.bf16.mxu0 %vm1782_vm3, %v7036_v53  ;;  %v4478_v53 = vsel %vm1795_vm2, %v7055_v21, 0  ;;  %v7061_v55 = vld [vmem:[%s8548_s6 + $0xfc] sm:$0xff]  }
  0xe4   : >> { %6651 = vmatmul.mubr.msk.bf16.vlgmr.msra.gmra.mxu1 %vm1782_vm3, %v7032_v54  ;;  %6684 = vmatprep.subr.bf16.mxu0 %v7037_v56  ;;  %v7059_v54 = vld [vmem:[%s7452_s19 + $0xac] sm:$0xff]  }
  0xe5   : >> { %6671 = vmatpush3.bf16.msra.mxu1 %v3829_v58  ;;  %6654 = vmatprep.mubr.msk.bf16.mxu1 %vm1782_vm3, %v7035_v57  ;;  %v5041_v57 = vmax.bf16 %v5032_v42, %v7823_v35  ;;  %v5042_v58 = vmax.bf16 %v5033_v43, %v7840_v44 }
  0xe6   : >> { %6672 = vmatprep.subr.bf16.mxu1 %v7040_v59 }
  0xe7   : >> { %6685 = vmatpush3.bf16.msra.mxu0 %v7037_v56  ;;  %v5040_v56 = vmax.bf16 %v5031_v41, %v5024_v34 }
  0xe8   : >> { %6819 = vmatprep.subr.msk.bf16.mxu0 %vm1795_vm2, %v7043_v60  ;;  %v6131_v60 = vld [vmem:[%s7800_s14 + $0x2c] sm:$0xf] }
  0xe9   : >> { %6673 = vmatpush3.bf16.msra.mxu1 %v7040_v59  ;;  %v6130_v59 = vld [vmem:[%s7800_s14 + $0x28] sm:$0xf] }
  0xea   : >> { %v7751_v2 = vpop.f32.mrf.mxu0  ;;  %6667 = vmatmul.mubr.msk.bf16.gmra.mxu0 %vm1782_vm3, %v7039_v61  ;;  %6818 = vmatprep.subr.msk.bf16.mxu1 %vm1795_vm2, %v7046_v62  ;;  %v7863_v61 = vld [vmem:[%s7800_s14 + $0x30] sm:$0xf]  ;;  %v7866_v62 = vld [vmem:[%s7800_s14 + $0x34] sm:$0xf] }
  0xeb   : >> { %6686 = vmatprep.mubr.msk.bf16.mxu0 %vm1782_vm3, %v7042_v63 }
  0xec   : >> { %v7756_v3 = vpop.f32.mrf.mxu1  ;;  %6655 = vmatmul.mubr.msk.bf16.gmra.mxu1 %vm1782_vm3, %v7038_v0  ;;  %v7759_v4 = vpop.f32.mrf.mxu0 }
  0xed   : >> { %6674 = vmatprep.mubr.msk.bf16.mxu1 %vm1782_vm3, %v7041_v1  ;;  %v4349_v1 = vsel %vm1795_vm2, %v7058_v25, 0 }
  0xee   : >> { %v7762_v5 = vpop.f32.mrf.mxu1  ;;  %v7764_v6 = vpop.f32.mrf.mxu0 }
  0xf0   : >> { %v7768_v9 = vpop.f32.mrf.mxu1  ;;  %v7770_v10 = vpop.f32.mrf.mxu0 }
  0xf2   : >> { %v7778_v15 = vpop.f32.mrf.mxu1  ;;  %v7780_v16 = vpop.f32.mrf.mxu0  ;;  %6687 = vmatmul.mubr.msk.bf16.vlgmr.msra.gmra.mxu0 %vm1782_vm3, %v7045_v7  ;;  %v7064_v7 = vld [vmem:[%s8548_s6 + $0xf0] sm:$0xff]  }
  0xf3   : >> { %6707 = vmatpush3.bf16.msra.mxu0 %v4216_v12  ;;  %6690 = vmatprep.mubr.msk.bf16.mxu0 %vm1782_vm3, %v7048_v8  ;;  %v5057_v8 = vmax.bf16 %v6130_v59, %v5039_v50 }
  0xf4   : >> { %v7788_v19 = vpop.f32.mrf.mxu1  ;;  %6675 = vmatmul.mubr.msk.bf16.vlgmr.msra.gmra.mxu1 %vm1782_vm3, %v7044_v11  ;;  %v7791_v20 = vpop.f32.mrf.mxu0  ;;  %6708 = vmatprep.subr.bf16.mxu0 %v7049_v13 }
  0xf5   : >> { %6695 = vmatpush3.bf16.msra.mxu1 %v4087_v17  ;;  %6678 = vmatprep.mubr.msk.bf16.mxu1 %vm1782_vm3, %v7047_v14  ;;  %v5058_v14 = vmax.bf16 %v6131_v60, %v5040_v56  ;;  %v5059_v17 = vmax.bf16 %v7863_v61, %v5041_v57  ;;  %v5066_v31 = vmax.bf16 %v6131_v60, %v5057_v8  ;;  %v7942_v8 = vld [vmem:[%s7800_s14 + $0x58] sm:$0xf] }
  0xf6   : >> { %v7802_v22 = vpop.f32.mrf.mxu1  ;;  %v7804_v23 = vpop.f32.mrf.mxu0  ;;  %6696 = vmatprep.subr.bf16.mxu1 %v7052_v18  ;;  %v5035_v56 = vmax.bf16 %v5027_v32, %v7840_v44 }
  0xf7   : >> { %6709 = vmatpush3.bf16.msra.mxu0 %v7049_v13  ;;  %v7067_v13 = vld [vmem:[%s8548_s6 + $0x11c] ss:$0 sps:$4 sm:$0x33]   ;;  %v5067_v41 = vmax.bf16 %v7863_v61, %v5058_v14  ;;  %v5068_v42 = vmax.bf16 %v7866_v62, %v5059_v17  ;;  %v5075_v57 = vmax.bf16 %v7863_v61, %v5066_v31  ;;  %v7939_v61 = vld [vmem:[%s7800_s14 + $0x54] sm:$0xf] }
  0xf8   : >> { %v7812_v28 = vpop.f32.mrf.mxu1  ;;  %v7814_v29 = vpop.f32.mrf.mxu0  ;;  %6821 = vmatprep.subr.msk.bf16.mxu0 %vm1795_vm2, %v7055_v21  ;;  %v7890_v21 = vld [vmem:[%s7800_s14 + $0x38] sm:$0xf]  ;;  %v7945_v14 = vld [vmem:[%s7800_s14 + $0x5c] sm:$0xf] }
  0xf9   : >> { %6697 = vmatpush3.bf16.msra.mxu1 %v7052_v18  ;;  %v5060_v18 = vmax.bf16 %v7866_v62, %v5042_v58 }
  0xfa   : >> { %v7825_v36 = vpop.f32.mrf.mxu1  ;;  %v7827_v37 = vpop.f32.mrf.mxu0  ;;  %6691 = vmatmul.mubr.msk.bf16.gmra.mxu0 %vm1782_vm3, %v7051_v24  ;;  %6820 = vmatprep.subr.msk.bf16.mxu1 %vm1795_vm2, %v7058_v25 }
  0xfb   : >> { %6710 = vmatprep.mubr.msk.bf16.mxu0 %vm1782_vm3, %v7054_v27  ;;  %v7070_v27 = vld [vmem:[%s8548_s6 + $0x110] ss:$0 sps:$4 sm:$0x33]   ;;  %v5069_v43 = vmax.bf16 %v7890_v21, %v5060_v18 }
  0xfc   : >> { %v7832_v39 = vpop.f32.mrf.mxu1  ;;  %6679 = vmatmul.mubr.msk.bf16.gmra.mxu1 %vm1782_vm3, %v7050_v26  ;;  %v7835_v40 = vpop.f32.mrf.mxu0  ;;  %v7063_v26 = vld [vmem:[%s7452_s19 + $0xb8] sm:$0xff]  }
  0xfd   : >> { %6698 = vmatprep.mubr.msk.bf16.mxu1 %vm1782_vm3, %v7053_v30  ;;  %v7066_v30 = vld [vmem:[%s7452_s19 + $0xc4] sm:$0xff]  }
  0xfe   : >> { %v7842_v45 = vpop.f32.mrf.mxu1  ;;  %v7844_v46 = vpop.f32.mrf.mxu0 }
 0x100   : >> { %v7849_v51 = vpop.f32.mrf.mxu1  ;;  %v7851_v52 = vpop.f32.mrf.mxu0 }
 0x101   : >> { %8580 = vst [vmem:[#allocation14_spill] sm:$0xff] %v7851_v52  ;;  %v4736_v52 = vsel %vm1795_vm2, %v7067_v13, 0 }
 0x102   : >> { %v7868_v63 = vpop.f32.mrf.mxu1  ;;  %v7870_v0 = vpop.f32.mrf.mxu0  ;;  %6711 = vmatmul.mubr.msk.bf16.vlgmr.msra.gmra.mxu0 %vm1782_vm3, %v7057_v47  ;;  %v5028_v47 = vld [vmem:[%s7800_s14 + $0x1c] sm:$0xf] }
 0x103   : >> { %6731 = vmatpush3.bf16.msra.mxu0 %v4478_v53  ;;  %6714 = vmatprep.mubr.msk.bf16.mxu0 %vm1782_vm3, %v7060_v49  ;;  %v7914_v49 = vld [vmem:[%s7800_s14 + $0x3c] sm:$0xf]  ;;  %v5036_v58 = vmax.bf16 %v5028_v47, %v5027_v32 }
 0x104   : >> { %v7878_v11 = vpop.f32.mrf.mxu1  ;;  %6699 = vmatmul.mubr.msk.bf16.vlgmr.msra.gmra.mxu1 %vm1782_vm3, %v7056_v48  ;;  %v7881_v12 = vpop.f32.mrf.mxu0  ;;  %6732 = vmatprep.subr.bf16.mxu0 %v7061_v55  ;;  %v7065_v48 = vld [vmem:[%s7452_s19 + $0xc0] sm:$0xff]  }
 0x105   : >> { %6719 = vmatpush3.bf16.msra.mxu1 %v4349_v1  ;;  %6702 = vmatprep.mubr.msk.bf16.mxu1 %vm1782_vm3, %v7059_v54  ;;  %v5029_v54 = vld [vmem:[%s7800_s14 + $0x20] sm:$0xf]  ;;  %v5076_v1 = vmax.bf16 %v7866_v62, %v5067_v41  ;;  %v7069_v62 = vld [vmem:[%s7452_s19 + $0xcc] sm:$0xff]   ;;  %v7072_v41 = vld [vmem:[%s7452_s19 + $0xd4] sm:$0xff]  }
 0x106   : >> { %v7892_v24 = vpop.f32.mrf.mxu1  ;;  %v7894_v25 = vpop.f32.mrf.mxu0  ;;  %6720 = vmatprep.subr.bf16.mxu1 %v7064_v7  ;;  %v5037_v17 = vmax.bf16 %v5029_v54, %v5028_v47 }
 0x107   : >> { %6733 = vmatpush3.bf16.msra.mxu0 %v7061_v55  ;;  %v5034_v55 = vmax.bf16 %v7840_v44, %v7823_v35  ;;  %v5077_v35 = vmax.bf16 %v7890_v21, %v5068_v42  ;;  %v5078_v44 = vmax.bf16 %v7914_v49, %v5069_v43  ;;  %v5045_v43 = vmax.bf16 %v5036_v58, %v5029_v54  ;;  %v7071_v54 = vld [vmem:[%s7452_s19 + $0xd0] sm:$0xff]  }
 0x108   : >> { %v7902_v33 = vpop.f32.mrf.mxu1  ;;  %v7904_v34 = vpop.f32.mrf.mxu0  ;;  %6823 = vmatprep.subr.msk.bf16.mxu0 %vm1795_vm2, %v7067_v13  ;;  %v4607_v13 = vsel %vm1795_vm2, %v7070_v27, 0 }
 0x109   : >> { %8581 = vst [vmem:[#allocation15_spill] sm:$0xff] %v7904_v34  ;;  %6721 = vmatpush3.bf16.msra.mxu1 %v7064_v7  ;;  %v6140_v7 = vld [vmem:[%s7800_s14 + $0x50] sm:$0xf]  ;;  %v5043_v31 = vmax.bf16 %v5034_v55, %v5027_v32  ;;  %v5094_v34 = vmax.bf16 %v7939_v61, %v5076_v1  ;;  %v5095_v32 = vmax.bf16 %v7942_v8, %v5077_v35  ;;  %v7967_v55 = vld [vmem:[%s7800_s14 + $0x40] sm:$0xf]  ;;  %v7076_v1 = vld [vmem:[%s8548_s6 + $0x108] sm:$0xff]  }
 0x10a   : >> { %v7916_v50 = vpop.f32.mrf.mxu1  ;;  %v7918_v53 = vpop.f32.mrf.mxu0  ;;  %6715 = vmatmul.mubr.msk.bf16.gmra.mxu0 %vm1782_vm3, %v7063_v26  ;;  %6822 = vmatprep.subr.msk.bf16.mxu1 %vm1795_vm2, %v7070_v27  ;;  %v5093_v42 = vmax.bf16 %v6140_v7, %v5075_v57  ;;  %v7983_v35 = vld [vmem:[%s7800_s14 + $0x44] sm:$0xf]  ;;  %v5063_v27 = vmax.bf16 %v7967_v55, %v5045_v43 }
 0x10b   : >> { %8582 = vst [vmem:[#allocation16_spill] sm:$0xff] %v7918_v53  ;;  %6734 = vmatprep.mubr.msk.bf16.mxu0 %vm1782_vm3, %v7066_v30  ;;  %v5038_v30 = vld [vmem:[%s7800_s14 + $0x24] sm:$0xf]  ;;  %v7068_v53 = vld [vmem:[%s7452_s19 + $0xc8] sm:$0xff]  }
 0x10c   : >> { %v7928_v59 = vpop.f32.mrf.mxu1  ;;  %6703 = vmatmul.mubr.msk.bf16.gmra.mxu1 %vm1782_vm3, %v7062_v38  ;;  %v7931_v60 = vpop.f32.mrf.mxu0  ;;  %v5044_v38 = vmax.bf16 %v5035_v56, %v5028_v47  ;;  %v5096_v47 = vmax.bf16 %v7945_v14, %v5078_v44  ;;  %v7971_v56 = vld [vmem:[%s7800_s14 + $0x60] sm:$0xf]  ;;  %v5046_v57 = vmax.bf16 %v5038_v30, %v5037_v17  ;;  %v5061_v44 = vmax.bf16 %v7890_v21, %v5043_v31 }
 0x10d   : >> { %8583 = vst [vmem:[#allocation17_spill] sm:$0xff] %v7931_v60  ;;  %6722 = vmatprep.mubr.msk.bf16.mxu1 %vm1782_vm3, %v7065_v48  ;;  %v757_v17 = vadd.f32 %v7788_v19, %v7751_v2  ;;  %v5103_v21 = vmax.bf16 %v7942_v8, %v5094_v34  ;;  %v5104_v2 = vmax.bf16 %v7945_v14, %v5095_v32 }
 0x10e   : >> { %v7947_v18 = vpop.f32.mrf.mxu1  ;;  %v7949_v26 = vpop.f32.mrf.mxu0  ;;  %v5105_v19 = vmax.bf16 %v7971_v56, %v5096_v47  ;;  %v5064_v31 = vmax.bf16 %v7983_v35, %v5046_v57  ;;  %v760_v47 = vadd.f32 %v7812_v28, %v7764_v6  ;;  %v5072_v57 = vmax.bf16 %v7983_v35, %v5063_v27 }
 0x10f   : >> { %8584 = vst [vmem:[#allocation18_spill] sm:$0xff] %v7949_v26  ;;  %v7073_v26 = vld [vmem:[%s8548_s6 + $0x114] sm:$0xff]   ;;  %v897_v32 = vadd.f32 %v7780_v16, %v757_v17  ;;  %v8038_v16 = vmax.bf16 %v7945_v14, %v5103_v21  ;;  %v8041_v6 = vmax.bf16 %v7971_v56, %v5104_v2  ;;  %v773_v14 = vadd.f32 %v7832_v39, %v7756_v3 }
 0x110   : >> { %v7954_v48 = vpop.f32.mrf.mxu1  ;;  %v7956_v60 = vpop.f32.mrf.mxu0  ;;  %v765_v21 = vadd.f32 %v7842_v45, %v7762_v5 }
 0x111   : >> { %8585 = vst [vmem:[#allocation19_spill] sm:$0xff] %v7956_v60  ;;  %v5062_v60 = vmax.bf16 %v7914_v49, %v5044_v38 }
 0x112   : >> { %v7973_v58 = vpop.f32.mrf.mxu1  ;;  %v7975_v7 = vpop.f32.mrf.mxu0  ;;  %6735 = vmatmul.mubr.msk.bf16.vlgmr.msra.gmra.mxu0 %vm1782_vm3, %v7069_v62  ;;  %v5102_v62 = vmax.bf16 %v7939_v61, %v5093_v42  ;;  %v8007_v61 = vld [vmem:[%s7800_s14 + $0x64] sm:$0xf]  ;;  %v5070_v42 = vmax.bf16 %v7914_v49, %v5061_v44  ;;  %v1025_v44 = vadd.f32 %v7878_v11, %v897_v32  ;;  %v898_v11 = vadd.f32 %v7804_v23, %v760_v47 }
 0x113   : >> { %8586 = vst [vmem:[#allocation20_spill] sm:$0xff] %v7973_v58  ;;  %6755 = vmatpush3.bf16.msra.mxu0 %v4736_v52  ;;  %6738 = vmatprep.mubr.msk.bf16.mxu0 %vm1782_vm3, %v7072_v41  ;;  %v749_v52 = vadd.f32 %v7802_v22, %v7759_v4  ;;  %v7075_v41 = vld [vmem:[%s7452_s19 + $0xdc] sm:$0xff]   ;;  %v7081_v4 = vld [vmem:[%s8548_s6 + $0x128] ss:$0 sps:$4 sm:$0x33]   ;;  %v5071_v43 = vmax.bf16 %v7967_v55, %v5062_v60 }
 0x114   : >> { %v7992_v30 = vpop.f32.mrf.mxu1  ;;  %6723 = vmatmul.mubr.msk.bf16.vlgmr.msra.gmra.mxu1 %vm1782_vm3, %v7068_v53  ;;  %v7995_v58 = vpop.f32.mrf.mxu0  ;;  %6756 = vmatprep.subr.bf16.mxu0 %v7073_v26  ;;  %v5119_v53 = vld [vmem:[%s8552_s10] sm:$0x3]  ;;  %v8019_v22 = vld [vmem:[%s7800_s14 + $0x48] sm:$0xf]  ;;  %v8035_v49 = vmax.bf16 %v7942_v8, %v5102_v62  ;;  %v8044_v28 = vmax.bf16 %v8007_v61, %v5105_v19  ;;  %v8077_v23 = vsel %vm1795_vm2, %v7081_v4, 0  ;;  %v1149_v45 = vadd.f32 %v7870_v0, %v1025_v44  ;;  %v7082_v44 = vld [vmem:[%s7452_s19 + $0xd8] sm:$0xff]  }
 0x115   : >> { %8587 = vst [vmem:[#allocation21_spill] sm:$0xff] %v7995_v58  ;;  %6743 = vmatpush3.bf16.msra.mxu1 %v4607_v13  ;;  %6726 = vmatprep.mubr.msk.bf16.mxu1 %vm1782_vm3, %v7071_v54  ;;  %v7078_v54 = vld [vmem:[%s7452_s19 + $0xcc] sm:$0xff]   ;;  %v7074_v58 = vld [vmem:[%s7452_s19 + $0xd8] sm:$0xff]   ;;  %v895_v60 = vadd.f32 %v7791_v20, %v749_v52  ;;  %v5073_v17 = vmax.bf16 %v8019_v22, %v5064_v31  ;;  %v5154_v3 = vsel %vm1795_vm2, %v5119_v53, 0  ;;  %v8084_v19 = vld [vmem:[%s7800_s14 + $0x68] sm:$0xf] }
 0x116   : >> { %v8010_v34 = vpop.f32.mrf.mxu1  ;;  %v8012_v38 = vpop.f32.mrf.mxu0  ;;  %6744 = vmatprep.subr.bf16.mxu1 %v7076_v1  ;;  %v7077_v8 = vld [vmem:[%s7452_s19 + $0xc8] sm:$0xff]   ;;  %v5081_v39 = vmax.bf16 %v8019_v22, %v5072_v57  ;;  %v776_v31 = vadd.f32 %v7849_v51, %v7768_v9  ;;  %v7080_v22 = vld [vmem:[%s7452_s19 + $0xd4] sm:$0xff]   ;;  %v1273_v51 = vadd.f32 %v7992_v30, %v1149_v45  ;;  %v899_v32 = vadd.f32 %v7835_v40, %v765_v21 }
 0x117   : >> { %8588 = vst [vmem:[#allocation22_spill] sm:$0xff] %v8012_v38  ;;  %6757 = vmatpush3.bf16.msra.mxu0 %v7073_v26  ;;  %v752_v26 = vadd.f32 %v7825_v36, %v7770_v10  ;;  %v6139_v20 = vld [vmem:[%s7800_s14 + $0x4c] sm:$0xf]  ;;  %v5079_v10 = vmax.bf16 %v7967_v55, %v5070_v42  ;;  %v5080_v36 = vmax.bf16 %v7983_v35, %v5071_v43  ;;  %v7083_v42 = vld [vmem:[%s7452_s19 + $0xdc] sm:$0xff]   ;;  %v7079_v30 = vld [vmem:[%s7452_s19 + $0xd0] sm:$0xff]  }
 0x118   : >> { %v8028_v13 = vpop.f32.mrf.mxu1  ;;  %v8030_v38 = vpop.f32.mrf.mxu0  ;;  %6825 = vmatprep.subr.msk.bf16.mxu0 %vm1795_vm2, %v5119_v53  ;;  %v6151_v35 = vcombine.low %v8041_v6, %v8044_v28  ;;  %v5082_v52 = vmax.bf16 %v6139_v20, %v5073_v17  ;;  %v901_v53 = vadd.f32 %v7827_v37, %v773_v14  ;;  %v6185_v43 = vld [vmem:[%s8110_s30 + $0x8] sm:$0xff]   ;;  %v768_v47 = vadd.f32 %v7868_v63, %v7778_v15  ;;  %v6170_v15 = vld [vmem:[%s8110_s30] sm:$0xff]  }
 0x119   : >> { %6745 = vmatpush3.bf16.msra.mxu1 %v7076_v1  ;;  %v1023_v1 = vadd.f32 %v7892_v24, %v895_v60  ;;  %v6150_v24 = vcombine.low %v8035_v49, %v8038_v16  ;;  %v896_v5 = vadd.f32 %v7814_v29, %v752_v26  ;;  %v8101_v29 = vld [vmem:[%s7800_s14 + $0x6c] sm:$0xf]  ;;  %v8104_v0 = vmax.bf16 %v7971_v56, %v5079_v10 }
 0x11a   : >> { %v8054_v62 = vpop.f32.mrf.mxu1  ;;  %v8056_v27 = vpop.f32.mrf.mxu0  ;;  %6739 = vmatmul.mubr.msk.bf16.gmra.mxu0 %vm1782_vm3, %v7075_v41  ;;  %6824 = vmatprep.subr.msk.bf16.mxu1 %vm1795_vm2, %v7081_v4  ;;  %v8117_v56 = vmax.bf16 %v8084_v19, %v5081_v39  ;;  %v6175_v57 = vunpack.c.l.bf16 %v6185_v43  ;;  %v902_v40 = vadd.f32 %v7844_v46, %v776_v31  ;;  %v1027_v63 = vadd.f32 %v7947_v18, %v899_v32  ;;  %v8589_v20 = vld [vmem:[#allocation15_spill] sm:$0xff] }
 0x11b   : >> { %6758 = vmatprep.mubr.msk.bf16.mxu0 %vm1782_vm3, %v7078_v54  ;;  %v1147_v9 = vadd.f32 %v7881_v12, %v1023_v1  ;;  %v1024_v37 = vadd.f32 %v7916_v50, %v896_v5  ;;  %v1029_v54 = vadd.f32 %v7928_v59, %v901_v53  ;;  %v5106_v17 = vmax.bf16 %v8007_v61, %v8104_v0  ;;  %v8591_v1 = vld [vmem:[#allocation16_spill] sm:$0xff]  ;;  %v8174_v0 = vld [vmem:[%s8545_s3] ss:$0 sm:$0xff] }
 0x11c   : >> { %v8071_v2 = vpop.f32.mrf.mxu1  ;;  %6727 = vmatmul.mubr.msk.bf16.gmra.mxu1 %vm1782_vm3, %v7074_v58  ;;  %v8074_v55 = vpop.f32.mrf.mxu0  ;;  %v1026_v58 = vadd.f32 %v7902_v33, %v898_v11  ;;  %v8107_v33 = vmax.bf16 %v8007_v61, %v5080_v36  ;;  %558 = vst.msk [vmem:[%s8139_s18 + $0x10] sm:$0xff] %vm555_vm4, %v6175_v57  ;;  %v6171_v14 = vunpack.c.l.bf16 %v6170_v15  ;;  %v1401_v18 = vadd.f32 %v7975_v7, %v1273_v51  ;;  %v8590_v36 = vld [vmem:[#allocation14_spill] sm:$0xff]  ;;  %v8592_v45 = vld [vmem:[#allocation21_spill] sm:$0xff]  ;;  %v8594_v53 = vld [vmem:[#allocation20_spill] sm:$0xff] }
 0x11d   : >> { %6746 = vmatprep.mubr.msk.bf16.mxu1 %vm1782_vm3, %v7077_v8  ;;  %v1271_v26 = vadd.f32 %v8010_v34, %v1147_v9  ;;  %v8133_v8 = vmax.bf16 %v8101_v29, %v5082_v52  ;;  %v7086_v34 = vld [vmem:[%s8548_s6 + $0x120] sm:$0xff]   ;;  %v1148_v46 = vadd.f32 %v8589_v20, %v1024_v37  ;;  %v900_v11 = vadd.f32 %v8590_v36, %v768_v47  ;;  %v6187_v20 = vld [vmem:[%s8110_s30 + $0x18] sm:$0xff]  }
 0x11e   : >> { %v8095_v41 = vpop.f32.mrf.mxu1  ;;  %v8097_v4 = vpop.f32.mrf.mxu0  ;;  %v1150_v60 = vadd.f32 %v7894_v25, %v1026_v58  ;;  %v1153_v39 = vadd.f32 %v8591_v1, %v1029_v54  ;;  %v1030_v21 = vadd.f32 %v7954_v48, %v902_v40  ;;  %556 = vst.msk [vmem:[%s8139_s18] sm:$0xff] %vm555_vm4, %v6171_v14  ;;  %v6176_v7 = vunpack.c.h.bf16 %v6185_v43  ;;  %v8593_v48 = vld [vmem:[#allocation17_spill] sm:$0xff]  ;;  %v7085_v37 = vld [vmem:[%s7452_s19 + $0xe4] sm:$0xff]   ;;  %v7087_v14 = vld [vmem:[%s7452_s19 + $0xd0] sm:$0xff]  }
 0x11f   : >> { %v1151_v52 = vadd.f32 %v8593_v48, %v1027_v63  ;;  %v1028_v31 = vadd.f32 %v8594_v53, %v900_v11  ;;  %v8595_v51 = vld [vmem:[#allocation22_spill] sm:$0xff]  ;;  %v8193_v40 = vmax.bf16 %v8084_v19, %v5106_v17 }
 0x120   : >> { %v8124_v12 = vpop.f32.mrf.mxu1  ;;  %v8126_v50 = vpop.f32.mrf.mxu0  ;;  %v1274_v10 = vadd.f32 %v8028_v13, %v1150_v60  ;;  %v1399_v13 = vadd.f32 %v8592_v45, %v1271_v26  ;;  %559 = vst.msk [vmem:[%s8139_s18 + $0x18] sm:$0xff] %vm555_vm4, %v6176_v7  ;;  %v8596_v47 = vld [vmem:[#allocation18_spill] sm:$0xff]  ;;  %v6184_v45 = vunpack.c.h.bf16 %v6187_v20 }
 0x121   : >> { %v1154_v54 = vadd.f32 %v8596_v47, %v1030_v21  ;;  %v7084_v26 = vld [vmem:[%s7452_s19 + $0xe0] sm:$0xff]  }
 0x122   : >> { %v8144_v59 = vpop.f32.mrf.mxu1  ;;  %v6472_v25 = vpop.f32.mrf.mxu0  ;;  %6759 = vmatmul.mubr.msk.bf16.vlgmr.msra.gmra.mxu0 %vm1782_vm3, %v7080_v22  ;;  %v1277_v22 = vadd.f32 %v8071_v2, %v1153_v39  ;;  %v5107_v2 = vmax.bf16 %v8084_v19, %v8107_v33  ;;  %563 = vst.msk [vmem:[%s8139_s18 + $0x38] sm:$0xff] %vm555_vm4, %v6184_v45 }
 0x123   : >> { %6779 = vmatpush3.bf16.msra.mxu0 %v5154_v3  ;;  %6762 = vmatprep.mubr.msk.bf16.mxu0 %vm1782_vm3, %v7083_v42  ;;  %v1272_v3 = vadd.f32 %v8054_v62, %v1148_v46  ;;  %v1402_v42 = vadd.f32 %v8595_v51, %v1274_v10  ;;  %v8597_v46 = vld [vmem:[#allocation19_spill] sm:$0xff]  ;;  %v1278_v36 = vadd.f32 %v8124_v12, %v1154_v54 }
 0x124   : >> { %v6462_v5 = vpop.f32.mrf.mxu1  ;;  %6747 = vmatmul.mubr.msk.bf16.vlgmr.msra.gmra.mxu1 %vm1782_vm3, %v7079_v30  ;;  %v1616_v61 = vpop.f32.mrf.mxu0  ;;  %v1275_v30 = vadd.f32 %v8095_v41, %v1151_v52  ;;  %v1405_v10 = vadd.f32 %v8056_v27, %v1277_v22  ;;  %v6148_v27 = vld [vmem:[%s7800_s14 + $0x70] sm:$0xf]  ;;  %v5116_v7 = vmax.bf16 %v8101_v29, %v5107_v2 }
 0x125   : >> { %v1525_v58 = vadd.f32 %v6462_v5, %v1401_v18  ;;  %6767 = vmatpush3.bf16.msra.mxu1 %v8077_v23  ;;  %6750 = vmatprep.mubr.msk.bf16.mxu1 %vm1782_vm3, %v7082_v44  ;;  %v6172_v23 = vunpack.c.h.bf16 %v6170_v15  ;;  %v8188_v44 = vld [vmem:[%s8546_s4] ss:$0 sm:$0xff]  ;;  %v5108_v15 = vmax.bf16 %v8101_v29, %v8117_v56  ;;  %v1400_v33 = vadd.f32 %v8030_v38, %v1272_v3 }
 0x126   : >> { %v1492_v9 = vpop.f32.mrf.mxu1  ;;  %v6473_v62 = vpop.f32.mrf.mxu0  ;;  %6768 = vmatprep.subr.bf16.mxu1 %v7086_v34  ;;  %v1152_v18 = vadd.f32 %v8597_v46, %v1028_v31  ;;  %v6183_v38 = vunpack.c.l.bf16 %v6187_v20  ;;  %v1403_v12 = vadd.f32 %v8074_v55, %v1275_v30  ;;  %v6186_v55 = vld [vmem:[%s8110_s30 + $0x10] sm:$0xff]   ;;  %v5109_v52 = vmax.bf16 %v6148_v27, %v8133_v8 }
 0x127   : >> { %v1649_v43 = vadd.f32 %v6472_v25, %v1525_v58  ;;  %v1523_v32 = vadd.f32 %v1492_v9, %v1399_v13  ;;  %557 = vst.msk [vmem:[%s8139_s18 + $0x8] sm:$0xff] %vm555_vm4, %v6172_v23  ;;  %v6179_v53 = vunpack.c.l.bf16 %v6186_v55 }
 0x128   : >> { %v6463_v57 = vpop.f32.mrf.mxu1  ;;  %v1619_v60 = vpop.f32.mrf.mxu0  ;;  %v1276_v21 = vadd.f32 %v8144_v59, %v1152_v18  ;;  %562 = vst.msk [vmem:[%s8139_s18 + $0x30] sm:$0xff] %vm555_vm4, %v6183_v38  ;;  %v1406_v59 = vadd.f32 %v8097_v4, %v1278_v36 }
 0x129   : >> { %v1664_v41 = vmul.f32 %v8174_v0, %v1649_v43  ;;  %v1647_v63 = vadd.f32 %v1616_v61, %v1523_v32  ;;  %v1526_v25 = vadd.f32 %v6463_v57, %v1402_v42  ;;  %6769 = vmatpush3.bf16.msra.mxu1 %v7086_v34  ;;  %v7088_v42 = vld [vmem:[%s7452_s19 + $0xd8] sm:$0xff]   ;;  %v6152_v43 = vcombine.low %v8193_v40, %v5116_v7  ;;  %v7089_v57 = vld [vmem:[%s7452_s19 + $0xe0] sm:$0xff]  }
 0x12a   : >> { %v1495_v19 = vpop.f32.mrf.mxu1  ;;  %v6476_v17 = vpop.f32.mrf.mxu0  ;;  %6763 = vmatmul.mubr.msk.bf16.gmra.mxu0 %vm1782_vm3, %v7085_v37  ;;  %v1404_v37 = vadd.f32 %v8126_v50, %v1276_v21  ;;  %560 = vst.msk [vmem:[%s8139_s18 + $0x20] sm:$0xff] %vm555_vm4, %v6179_v53  ;;  %v6180_v32 = vunpack.c.h.bf16 %v6186_v55  ;;  %v5117_v40 = vmax.bf16 %v6148_v27, %v5108_v15 }
 0x12b   : >> { %v1662_v11 = vmul.f32 %v8174_v0, %v1647_v63  ;;  %v1650_v1 = vadd.f32 %v6473_v62, %v1526_v25  ;;  %v1524_v39 = vadd.f32 %v1495_v19, %v1400_v33  ;;  %v1679_v34 = vadd.f32 %v8188_v44, %v1664_v41  ;;  %6780 = vmatprep.mubr.msk.bf16.mxu0 %vm5140_vm5, %v6150_v24  ;;  %v6149_v62 = vld [vmem:[%s7800_s14 + $0x74] sm:$0xf]  ;;  %s8610_s14 = sld [smem:[#allocation6_spill]] (%p527_p13) }
 0x12c   : >> { %v6466_v5 = vpop.f32.mrf.mxu1  ;;  %6751 = vmatmul.mubr.msk.bf16.gmra.mxu1 %vm1782_vm3, %v7084_v26  ;;  %v1632_v61 = vpop.f32.mrf.mxu0  ;;  %v5118_v33 = vmax.bf16 %v6149_v62, %v5109_v52  ;;  %561 = vst.msk [vmem:[%s8139_s18 + $0x28] sm:$0xff] %vm555_vm4, %v6180_v32 }
 0x12d   : >> { %v1665_v49 = vmul.f32 %v8174_v0, %v1650_v1  ;;  %v1648_v16 = vadd.f32 %v1619_v60, %v1524_v39  ;;  %v1529_v13 = vadd.f32 %v6466_v5, %v1405_v10  ;;  %v1687_v24 = vmax.f32 %v1679_v34, 0.0  ;;  %6770 = vmatprep.mubr.msk.bf16.mxu1 %vm1782_vm3, %v7087_v14  ;;  %v7090_v1 = vld [vmem:[%s7452_s19 + $0xe8] sm:$0xff]   ;;  %s7179_s19 = smov 16  }
 0x12e   : >> { %v1508_v3 = vpop.f32.mrf.mxu1  ;;  %v6477_v58 = vpop.f32.mrf.mxu0  ;;  %v1677_v48 = vadd.f32 %v8188_v44, %v1662_v11  ;;  %v6153_v18 = vcombine.low %v5117_v40, %v5118_v33 }
 0x12f   : >> { %v1663_v31 = vmul.f32 %v8174_v0, %v1648_v16  ;;  %v1653_v22 = vadd.f32 %v6476_v17, %v1529_v13  ;;  %v1527_v9 = vadd.f32 %v1508_v3, %v1403_v12  ;;  %1705 = vrot.lane.b32.xlu1 %v1687_v24, %s7177_s21  ;;  %v1680_v4 = vadd.f32 %v8188_v44, %v1665_v49 }
 0x130   : >> { %v6467_v23 = vpop.f32.mrf.mxu1  ;;  %v1685_v51 = vmax.f32 %v1677_v48, 0.0  ;;  %v1635_v8 = vpop.f32.mrf.mxu0 }
 0x131   : >> { %v1668_v2 = vmul.f32 %v8174_v0, %v1653_v22  ;;  %v1651_v47 = vadd.f32 %v1632_v61, %v1527_v9  ;;  %v1530_v54 = vadd.f32 %v6467_v23, %v1406_v59  ;;  %v1688_v30 = vmax.f32 %v1680_v4, 0.0 }
 0x132   : >> { %1701 = vrot.lane.b32.xlu0 %v1685_v51, %s7177_s21  ;;  %v1511_v60 = vpop.f32.mrf.mxu1  ;;  %v6496_v50 = vpop.f32.mrf.mxu0  ;;  %6781 = vmatmul.mubr.msk.bf16.vlgmr.msra.gmra.mxu0 %vm5140_vm5, %v6151_v35  ;;  %v1678_v26 = vadd.f32 %v8188_v44, %v1663_v31 }
 0x133   : >> { %v1654_v41 = vadd.f32 %v6477_v58, %v1530_v54  ;;  %v1528_v63 = vadd.f32 %v1511_v60, %v1404_v37  ;;  %1707 = vrot.lane.b32.xlu1 %v1688_v30, %s7177_s21  ;;  %v1666_v25 = vmul.f32 %v8174_v0, %v1651_v47  ;;  %v1683_v35 = vadd.f32 %v8188_v44, %v1668_v2 }
 0x134   : >> { %v6484_v14 = vpop.f32.mrf.mxu1  ;;  %6771 = vmatmul.mubr.msk.bf16.vlgmr.msra.gmra.mxu1 %vm1782_vm3, %v7088_v42  ;;  %v1686_v6 = vmax.f32 %v1678_v26, 0.0  ;;  %v1928_v28 = vpop.f32.mrf.mxu0  ;;  %6784 = vmatprep.mubr.msk.bf16.mxu0 %vm5140_vm5, %v6152_v43 }
 0x135   : >> { %v1669_v29 = vmul.f32 %v8174_v0, %v1654_v41  ;;  %v1652_v56 = vadd.f32 %v1635_v8, %v1528_v63  ;;  %v1937_v15 = vadd.f32 %v6496_v50, %v6484_v14  ;;  %6774 = vmatprep.mubr.msk.bf16.mxu1 %vm1782_vm3, %v7089_v57  ;;  %v1691_v38 = vmax.f32 %v1683_v35, 0.0 }
 0x136   : >> { %1703 = vrot.lane.b32.xlu0 %v1686_v6, %s7177_s21  ;;  %v1833_v20 = vpop.f32.mrf.mxu1  ;;  %v6497_v46 = vpop.f32.mrf.mxu0  ;;  %v1681_v39 = vadd.f32 %v8188_v44, %v1666_v25 }
 0x137   : >> { %v1667_v10 = vmul.f32 %v8174_v0, %v1652_v56  ;;  %v1929_v36 = vadd.f32 %v1928_v28, %v1833_v20  ;;  %v1684_v19 = vadd.f32 %v8188_v44, %v1669_v29 }
 0x138   : >> { %v6485_v17 = vpop.f32.mrf.mxu1  ;;  %v1931_v11 = vpop.f32.mrf.mxu0  ;;  %v1689_v7 = vmax.f32 %v1681_v39, 0.0 }
 0x139   : >> { %v1940_v34 = vadd.f32 %v6497_v46, %v6485_v17  ;;  %v1692_v27 = vmax.f32 %v1684_v19, 0.0  ;;  %v1682_v12 = vadd.f32 %v8188_v44, %v1667_v10 }
 0x13a   : >> { %1713 = vrot.lane.b32.xlu0 %v1691_v38, %s7177_s21  ;;  %v1836_v21 = vpop.f32.mrf.mxu1  ;;  %v6500_v5 = vpop.f32.mrf.mxu0  ;;  %6785 = vmatmul.mubr.msk.bf16.gmra.mxu0 %vm5140_vm5, %v6153_v18 }
 0x13b   : >> { %v1932_v0 = vadd.f32 %v1931_v11, %v1836_v21  ;;  %1715 = vrot.lane.b32.xlu1 %v1692_v27, %s7177_s21  ;;  %v1690_v16 = vmax.f32 %v1682_v12, 0.0 }
 0x13c   : >> { %v6488_v61 = vpop.f32.mrf.mxu1  ;;  %6775 = vmatmul.mubr.msk.bf16.gmra.mxu1 %vm1782_vm3, %v7090_v1  ;;  %v1944_v45 = vpop.f32.mrf.mxu0 }
 0x13d   : >> { %v1953_v49 = vadd.f32 %v6500_v5, %v6488_v61 }
 0x13e   : >> { %1709 = vrot.lane.b32.xlu0 %v1689_v7, %s7177_s21  ;;  %v1849_v13 = vpop.f32.mrf.mxu1  ;;  %v6501_v44 = vpop.f32.mrf.mxu0 }
 0x13f   : >> { %v1945_v24 = vadd.f32 %v1944_v45, %v1849_v13  ;;  %1711 = vrot.lane.b32.xlu1 %v1690_v16, %s7177_s21  ;;  %s7178_s21 = smov 24  }
 0x140   : >> { %v6489_v55 = vpop.f32.mrf.mxu1  ;;  %v1947_v59 = vpop.f32.mrf.mxu0 }
 0x141   : >> { %v1956_v3 = vadd.f32 %v6501_v44, %v6489_v55 }
 0x142   : >> { %v1852_v58 = vpop.f32.mrf.mxu1  ;;  %v6520_v48 = vpop.f32.mrf.mxu0 }
 0x143   : >> { %v1948_v52 = vadd.f32 %v1947_v59, %v1852_v58 }
 0x144   : >> { %v6508_v53 = vpop.f32.mrf.mxu1  ;;  %v2178_v31 = vpop.f32.mrf.mxu0 }
 0x145   : >> { %v2082_v22 = vadd.f32 %v6508_v53, %v1937_v15 }
 0x146   : >> { %v2049_v9 = vpop.f32.mrf.mxu1  ;;  %v6521_v4 = vpop.f32.mrf.mxu0 }
 0x147   : >> { %v2211_v62 = vadd.f32 %v6520_v48, %v2082_v22  ;;  %v2080_v37 = vadd.f32 %v2049_v9, %v1929_v36 }
 0x148   : >> { %v6509_v23 = vpop.f32.mrf.mxu1  ;;  %v2181_v51 = vpop.f32.mrf.mxu0 }
 0x149   : >> { %v2209_v8 = vadd.f32 %v2178_v31, %v2080_v37  ;;  %v2083_v42 = vadd.f32 %v6509_v23, %v1940_v34 }
 0x14a   : >> { %v2052_v43 = vpop.f32.mrf.mxu1  ;;  %v6524_v32 = vpop.f32.mrf.mxu0 }
 0x14b   : >> { %v2212_v2 = vadd.f32 %v6521_v4, %v2083_v42  ;;  %v2081_v47 = vadd.f32 %v2052_v43, %v1932_v0 }
 0x14c   : >> { %v6512_v54 = vpop.f32.mrf.mxu1  ;;  %v2194_v30 = vpop.f32.mrf.mxu0 }
 0x14d   : >> { %v2210_v57 = vadd.f32 %v2181_v51, %v2081_v47  ;;  %v2086_v60 = vadd.f32 %v6512_v54, %v1953_v49 }
 0x14e   : >> { %v2065_v50 = vpop.f32.mrf.mxu1  ;;  %v6525_v26 = vpop.f32.mrf.mxu0 }
 0x14f   : >> { %v2215_v40 = vadd.f32 %v6524_v32, %v2086_v60  ;;  %v2084_v33 = vadd.f32 %v2065_v50, %v1945_v24 }
 0x150   : >> { %v6513_v41 = vpop.f32.mrf.mxu1  ;;  %v2197_v63 = vpop.f32.mrf.mxu0 }
 0x151   : >> { %v2213_v25 = vadd.f32 %v2194_v30, %v2084_v33  ;;  %v2087_v14 = vadd.f32 %v6513_v41, %v1956_v3 }
 0x152   : >> { %v2068_v6 = vpop.f32.mrf.mxu1  ;;  %v6544_v28 = vpop.f32.mrf.mxu0 }
 0x153   : >> { %v2216_v35 = vadd.f32 %v6525_v26, %v2087_v14  ;;  %v2085_v29 = vadd.f32 %v2068_v6, %v1948_v52 }
 0x154   : >> { %v6532_v56 = vpop.f32.mrf.mxu1  ;;  %v2439_v15 = vpop.f32.mrf.mxu0 }
 0x155   : >> { %v2214_v20 = vadd.f32 %v2197_v63, %v2085_v29  ;;  %v2340_v46 = vadd.f32 %v6532_v56, %v2211_v62 }
 0x156   : >> { %v2307_v18 = vpop.f32.mrf.mxu1  ;;  %v6545_v10 = vpop.f32.mrf.mxu0 }
 0x157   : >> { %v2472_v36 = vadd.f32 %v6544_v28, %v2340_v46  ;;  %v2338_v19 = vadd.f32 %v2307_v18, %v2209_v8 }
 0x158   : >> { %v6533_v17 = vpop.f32.mrf.mxu1  ;;  %v2442_v38 = vpop.f32.mrf.mxu0 }
 0x159   : >> { %v2470_v11 = vadd.f32 %v2439_v15, %v2338_v19  ;;  %v2341_v1 = vadd.f32 %v6533_v17, %v2212_v2 }
 0x15a   : >> { %v2310_v39 = vpop.f32.mrf.mxu1  ;;  %v6548_v34 = vpop.f32.mrf.mxu0 }
 0x15b   : >> { %v2473_v27 = vadd.f32 %v6545_v10, %v2341_v1  ;;  %v2339_v12 = vadd.f32 %v2310_v39, %v2210_v57 }
 0x15c   : >> { %v6536_v21 = vpop.f32.mrf.mxu1  ;;  %v2455_v5 = vpop.f32.mrf.mxu0 }
 0x15d   : >> { %v2471_v0 = vadd.f32 %v2442_v38, %v2339_v12  ;;  %v2344_v61 = vadd.f32 %v6536_v21, %v2215_v40 }
 0x15e   : >> { %v2323_v7 = vpop.f32.mrf.mxu1  ;;  %v6549_v45 = vpop.f32.mrf.mxu0 }
 0x15f   : >> { %v2476_v49 = vadd.f32 %v6548_v34, %v2344_v61  ;;  %v2342_v16 = vadd.f32 %v2323_v7, %v2213_v25 }
 0x160   : >> { %v6537_v13 = vpop.f32.mrf.mxu1  ;;  %v2458_v44 = vpop.f32.mrf.mxu0 }
 0x161   : >> { %v2474_v24 = vadd.f32 %v2455_v5, %v2342_v16  ;;  %v2345_v55 = vadd.f32 %v6537_v13, %v2216_v35 }
 0x162   : >> { %v2326_v59 = vpop.f32.mrf.mxu1  ;;  %v6568_v3 = vpop.f32.mrf.mxu0 }
 0x163   : >> { %v2477_v58 = vadd.f32 %v6549_v45, %v2345_v55  ;;  %v2343_v48 = vadd.f32 %v2326_v59, %v2214_v20 }
 0x164   : >> { %v6556_v52 = vpop.f32.mrf.mxu1  ;;  %v2697_v53 = vpop.f32.mrf.mxu0 }
 0x165   : >> { %v2475_v31 = vadd.f32 %v2458_v44, %v2343_v48  ;;  %v2601_v22 = vadd.f32 %v6556_v52, %v2472_v36 }
 0x166   : >> { %v2568_v9 = vpop.f32.mrf.mxu1  ;;  %v6569_v4 = vpop.f32.mrf.mxu0 }
 0x167   : >> { %v2730_v62 = vadd.f32 %v6568_v3, %v2601_v22  ;;  %v2599_v37 = vadd.f32 %v2568_v9, %v2470_v11 }
 0x168   : >> { %v6557_v23 = vpop.f32.mrf.mxu1  ;;  %v2700_v51 = vpop.f32.mrf.mxu0 }
 0x169   : >> { %v2728_v8 = vadd.f32 %v2697_v53, %v2599_v37  ;;  %v2602_v42 = vadd.f32 %v6557_v23, %v2473_v27 }
 0x16a   : >> { %v2571_v43 = vpop.f32.mrf.mxu1  ;;  %v6572_v32 = vpop.f32.mrf.mxu0 }
 0x16b   : >> { %v2731_v2 = vadd.f32 %v6569_v4, %v2602_v42  ;;  %v2600_v47 = vadd.f32 %v2571_v43, %v2471_v0 }
 0x16c   : >> { %v6560_v54 = vpop.f32.mrf.mxu1  ;;  %v2713_v30 = vpop.f32.mrf.mxu0 }
 0x16d   : >> { %v2729_v57 = vadd.f32 %v2700_v51, %v2600_v47  ;;  %v2605_v60 = vadd.f32 %v6560_v54, %v2476_v49 }
 0x16e   : >> { %v2584_v50 = vpop.f32.mrf.mxu1  ;;  %v6573_v26 = vpop.f32.mrf.mxu0 }
 0x16f   : >> { %v2734_v40 = vadd.f32 %v6572_v32, %v2605_v60  ;;  %v2603_v33 = vadd.f32 %v2584_v50, %v2474_v24 }
 0x170   : >> { %v6561_v41 = vpop.f32.mrf.mxu1  ;;  %v2716_v63 = vpop.f32.mrf.mxu0 }
 0x171   : >> { %v2732_v25 = vadd.f32 %v2713_v30, %v2603_v33  ;;  %v2606_v14 = vadd.f32 %v6561_v41, %v2477_v58 }
 0x172   : >> { %v2587_v6 = vpop.f32.mrf.mxu1  ;;  %v6592_v28 = vpop.f32.mrf.mxu0 }
 0x173   : >> { %v2735_v35 = vadd.f32 %v6573_v26, %v2606_v14  ;;  %v2604_v29 = vadd.f32 %v2587_v6, %v2475_v31 }
 0x174   : >> { %v6580_v56 = vpop.f32.mrf.mxu1  ;;  %v2955_v15 = vpop.f32.mrf.mxu0 }
 0x175   : >> { %v2733_v20 = vadd.f32 %v2716_v63, %v2604_v29  ;;  %v2859_v46 = vadd.f32 %v6580_v56, %v2730_v62 }
 0x176   : >> { %v2826_v18 = vpop.f32.mrf.mxu1  ;;  %v6593_v10 = vpop.f32.mrf.mxu0 }
 0x177   : >> { %v2988_v36 = vadd.f32 %v6592_v28, %v2859_v46  ;;  %v2857_v19 = vadd.f32 %v2826_v18, %v2728_v8 }
 0x178   : >> { %v6581_v17 = vpop.f32.mrf.mxu1  ;;  %v2958_v38 = vpop.f32.mrf.mxu0 }
 0x179   : >> { %v2986_v11 = vadd.f32 %v2955_v15, %v2857_v19  ;;  %v2860_v1 = vadd.f32 %v6581_v17, %v2731_v2 }
 0x17a   : >> { %v2829_v39 = vpop.f32.mrf.mxu1  ;;  %v6596_v34 = vpop.f32.mrf.mxu0 }
 0x17b   : >> { %v2989_v27 = vadd.f32 %v6593_v10, %v2860_v1  ;;  %v2858_v12 = vadd.f32 %v2829_v39, %v2729_v57 }
 0x17c   : >> { %v6584_v21 = vpop.f32.mrf.mxu1  ;;  %v2971_v5 = vpop.f32.mrf.mxu0 }
 0x17d   : >> { %v2987_v0 = vadd.f32 %v2958_v38, %v2858_v12  ;;  %v2863_v61 = vadd.f32 %v6584_v21, %v2734_v40 }
 0x17e   : >> { %v2842_v7 = vpop.f32.mrf.mxu1  ;;  %v6597_v45 = vpop.f32.mrf.mxu0 }
 0x17f   : >> { %v2992_v49 = vadd.f32 %v6596_v34, %v2863_v61  ;;  %v2861_v16 = vadd.f32 %v2842_v7, %v2732_v25 }
 0x180   : >> { %v6585_v13 = vpop.f32.mrf.mxu1  ;;  %v2974_v44 = vpop.f32.mrf.mxu0 }
 0x181   : >> { %v2990_v24 = vadd.f32 %v2971_v5, %v2861_v16  ;;  %v2864_v55 = vadd.f32 %v6585_v13, %v2735_v35 }
 0x182   : >> { %v2845_v59 = vpop.f32.mrf.mxu1  ;;  %v6616_v3 = vpop.f32.mrf.mxu0 }
 0x183   : >> { %v2993_v58 = vadd.f32 %v6597_v45, %v2864_v55  ;;  %v2862_v48 = vadd.f32 %v2845_v59, %v2733_v20 }
 0x184   : >> { %v6604_v52 = vpop.f32.mrf.mxu1  ;;  %v3216_v53 = vpop.f32.mrf.mxu0 }
 0x185   : >> { %v2991_v31 = vadd.f32 %v2974_v44, %v2862_v48  ;;  %v3120_v22 = vadd.f32 %v6604_v52, %v2988_v36 }
 0x186   : >> { %v3087_v9 = vpop.f32.mrf.mxu1  ;;  %v6617_v4 = vpop.f32.mrf.mxu0 }
 0x187   : >> { %v3249_v62 = vadd.f32 %v6616_v3, %v3120_v22  ;;  %v3118_v37 = vadd.f32 %v3087_v9, %v2986_v11 }
 0x188   : >> { %v6605_v23 = vpop.f32.mrf.mxu1  ;;  %v3219_v51 = vpop.f32.mrf.mxu0 }
 0x189   : >> { %v3247_v8 = vadd.f32 %v3216_v53, %v3118_v37  ;;  %v3121_v42 = vadd.f32 %v6605_v23, %v2989_v27 }
 0x18a   : >> { %v3090_v43 = vpop.f32.mrf.mxu1  ;;  %v6620_v32 = vpop.f32.mrf.mxu0 }
 0x18b   : >> { %v3250_v2 = vadd.f32 %v6617_v4, %v3121_v42  ;;  %v3119_v47 = vadd.f32 %v3090_v43, %v2987_v0 }
 0x18c   : >> { %v6608_v54 = vpop.f32.mrf.mxu1  ;;  %v3232_v30 = vpop.f32.mrf.mxu0 }
 0x18d   : >> { %v3248_v57 = vadd.f32 %v3219_v51, %v3119_v47  ;;  %v3124_v60 = vadd.f32 %v6608_v54, %v2992_v49 }
 0x18e   : >> { %v3103_v50 = vpop.f32.mrf.mxu1  ;;  %v6621_v26 = vpop.f32.mrf.mxu0 }
 0x18f   : >> { %v3253_v40 = vadd.f32 %v6620_v32, %v3124_v60  ;;  %v3122_v33 = vadd.f32 %v3103_v50, %v2990_v24 }
 0x190   : >> { %v6609_v41 = vpop.f32.mrf.mxu1  ;;  %v3235_v63 = vpop.f32.mrf.mxu0 }
 0x191   : >> { %v3251_v25 = vadd.f32 %v3232_v30, %v3122_v33  ;;  %v3125_v14 = vadd.f32 %v6609_v41, %v2993_v58 }
 0x192   : >> { %v3106_v6 = vpop.f32.mrf.mxu1  ;;  %v6640_v28 = vpop.f32.mrf.mxu0 }
 0x193   : >> { %v3254_v35 = vadd.f32 %v6621_v26, %v3125_v14  ;;  %v3123_v29 = vadd.f32 %v3106_v6, %v2991_v31 }
 0x194   : >> { %v6628_v56 = vpop.f32.mrf.mxu1  ;;  %v3474_v15 = vpop.f32.mrf.mxu0 }
 0x195   : >> { %v3252_v20 = vadd.f32 %v3235_v63, %v3123_v29  ;;  %v3378_v46 = vadd.f32 %v6628_v56, %v3249_v62 }
 0x196   : >> { %v3345_v18 = vpop.f32.mrf.mxu1  ;;  %v6641_v10 = vpop.f32.mrf.mxu0 }
 0x197   : >> { %v3507_v36 = vadd.f32 %v6640_v28, %v3378_v46  ;;  %v3376_v19 = vadd.f32 %v3345_v18, %v3247_v8 }
 0x198   : >> { %v6629_v17 = vpop.f32.mrf.mxu1  ;;  %v3477_v38 = vpop.f32.mrf.mxu0 }
 0x199   : >> { %v3505_v11 = vadd.f32 %v3474_v15, %v3376_v19  ;;  %v3379_v1 = vadd.f32 %v6629_v17, %v3250_v2 }
 0x19a   : >> { %v3348_v39 = vpop.f32.mrf.mxu1  ;;  %v6644_v34 = vpop.f32.mrf.mxu0 }
 0x19b   : >> { %v3508_v27 = vadd.f32 %v6641_v10, %v3379_v1  ;;  %v3377_v12 = vadd.f32 %v3348_v39, %v3248_v57 }
 0x19c   : >> { %v6632_v21 = vpop.f32.mrf.mxu1  ;;  %v3490_v5 = vpop.f32.mrf.mxu0 }
 0x19d   : >> { %v3506_v0 = vadd.f32 %v3477_v38, %v3377_v12  ;;  %v3382_v61 = vadd.f32 %v6632_v21, %v3253_v40 }
 0x19e   : >> { %v3361_v7 = vpop.f32.mrf.mxu1  ;;  %v6645_v45 = vpop.f32.mrf.mxu0 }
 0x19f   : >> { %v3511_v49 = vadd.f32 %v6644_v34, %v3382_v61  ;;  %v3380_v16 = vadd.f32 %v3361_v7, %v3251_v25 }
 0x1a0   : >> { %v6633_v13 = vpop.f32.mrf.mxu1  ;;  %v3493_v44 = vpop.f32.mrf.mxu0 }
 0x1a1   : >> { %v3509_v24 = vadd.f32 %v3490_v5, %v3380_v16  ;;  %v3383_v55 = vadd.f32 %v6633_v13, %v3254_v35  ;;  %v1706_v59 = vpop.permute.xlu1 %1705 }
 0x1a2   : >> { %1728 = vst.msk [vmem:[%s8139_s18 + $0x10] sm:$0xff] %vm1725_vm6, %v1706_v59  ;;  %v3364_v3 = vpop.f32.mrf.mxu1  ;;  %v6664_v58 = vpop.f32.mrf.mxu0 }
 0x1a3   : >> { %v3512_v48 = vadd.f32 %v6645_v45, %v3383_v55  ;;  %v3381_v52 = vadd.f32 %v3364_v3, %v3252_v20 }
 0x1a4   : >> { %v1702_v53 = vpop.permute.xlu0 %1701  ;;  %v6652_v31 = vpop.f32.mrf.mxu1 }
 0x1a5   : >> { %v3510_v22 = vadd.f32 %v3493_v44, %v3381_v52  ;;  %1726 = vst.msk [vmem:[%s8139_s18] sm:$0xff] %vm1725_vm6, %v1702_v53  ;;  %v3636_v9 = vadd.f32 %v6652_v31, %v3507_v36  ;;  %v1708_v4 = vpop.permute.xlu1 %1707  ;;  %v3736_v62 = vpop.f32.mrf.mxu0 }
 0x1a6   : >> { %1729 = vst.msk [vmem:[%s8139_s18 + $0x18] sm:$0xff] %vm1725_vm6, %v1708_v4  ;;  %v3603_v37 = vpop.f32.mrf.mxu1 }
 0x1a7   : >> { %v8273_v23 = vadd.f32 %v6664_v58, %v3636_v9  ;;  %v3634_v51 = vadd.f32 %v3603_v37, %v3505_v11  ;;  %v6665_v8 = vpop.f32.mrf.mxu0 }
 0x1a8   : >> { %v1704_v42 = vpop.permute.xlu0 %1703  ;;  %v6653_v43 = vpop.f32.mrf.mxu1 }
 0x1a9   : >> { %v8275_v32 = vadd.f32 %v3736_v62, %v3634_v51  ;;  %1727 = vst.msk [vmem:[%s8139_s18 + $0x8] sm:$0xff] %vm1725_vm6, %v1704_v42  ;;  %v3637_v2 = vadd.f32 %v6653_v43, %v3508_v27  ;;  %v3739_v47 = vpop.f32.mrf.mxu0 }
 0x1aa   : >> { %v3606_v54 = vpop.f32.mrf.mxu1 }
 0x1ab   : >> { %v8279_v30 = vadd.f32 %v6665_v8, %v3637_v2  ;;  %v3635_v57 = vadd.f32 %v3606_v54, %v3506_v0  ;;  %v6668_v60 = vpop.f32.mrf.mxu0 }
 0x1ac   : >> { %v1714_v50 = vpop.permute.xlu0 %1713  ;;  %v6656_v26 = vpop.f32.mrf.mxu1 }
 0x1ad   : >> { %v8281_v40 = vadd.f32 %v3739_v47, %v3635_v57  ;;  %1732 = vst.msk [vmem:[%s8139_s18 + $0x30] sm:$0xff] %vm1725_vm6, %v1714_v50  ;;  %v3640_v33 = vadd.f32 %v6656_v26, %v3511_v49  ;;  %v1716_v41 = vpop.permute.xlu1 %1715  ;;  %v3752_v63 = vpop.f32.mrf.mxu0 }
 0x1ae   : >> { %1733 = vst.msk [vmem:[%s8139_s18 + $0x38] sm:$0xff] %vm1725_vm6, %v1716_v41  ;;  %v3619_v25 = vpop.f32.mrf.mxu1 }
 0x1af   : >> { %v8287_v14 = vadd.f32 %v6668_v60, %v3640_v33  ;;  %v3638_v6 = vadd.f32 %v3619_v25, %v3509_v24  ;;  %v6669_v28 = vpop.f32.mrf.mxu0 }
 0x1b0   : >> { %v1710_v35 = vpop.permute.xlu0 %1709  ;;  %v6657_v29 = vpop.f32.mrf.mxu1 }
 0x1b1   : >> { %v8289_v56 = vadd.f32 %v3752_v63, %v3638_v6  ;;  %1730 = vst.msk [vmem:[%s8139_s18 + $0x20] sm:$0xff] %vm1725_vm6, %v1710_v35  ;;  %v3641_v15 = vadd.f32 %v6657_v29, %v3512_v48  ;;  %v1712_v20 = vpop.permute.xlu1 %1711  ;;  %v3755_v46 = vpop.f32.mrf.mxu0 }
 0x1b2   : >> { %1731 = vst.msk [vmem:[%s8139_s18 + $0x28] sm:$0xff] %vm1725_vm6, %v1712_v20  ;;  %v3622_v18 = vpop.f32.mrf.mxu1 }
 0x1b3   : >> { %v8295_v10 = vadd.f32 %v6669_v28, %v3641_v15  ;;  %v3639_v36 = vadd.f32 %v3622_v18, %v3510_v22  ;;  %v6688_v19 = vpop.f32.mrf.mxu0 }
 0x1b4   : >> { %v6676_v17 = vpop.f32.mrf.mxu1 }
 0x1b5   : >> { %v8297_v38 = vadd.f32 %v3755_v46, %v3639_v36  ;;  %v3994_v11 = vpop.f32.mrf.mxu0  ;;  %v3898_v26 = vadd.f32 %v6676_v17, %v8273_v23 }
 0x1b6   : >> { %v3865_v1 = vpop.f32.mrf.mxu1 }
 0x1b7   : >> { %v6689_v39 = vpop.f32.mrf.mxu0  ;;  %v3896_v25 = vadd.f32 %v3865_v1, %v8275_v32  ;;  %v4027_v28 = vadd.f32 %v6688_v19, %v3898_v26 }
 0x1b8   : >> { %v6677_v34 = vpop.f32.mrf.mxu1 }
 0x1b9   : >> { %v3997_v27 = vpop.f32.mrf.mxu0  ;;  %v3899_v35 = vadd.f32 %v6677_v34, %v8279_v30  ;;  %v4025_v18 = vadd.f32 %v3994_v11, %v3896_v25 }
 0x1ba   : >> { %v3868_v12 = vpop.f32.mrf.mxu1 }
 0x1bb   : >> { %v6692_v21 = vpop.f32.mrf.mxu0  ;;  %v3897_v20 = vadd.f32 %v3868_v12, %v8281_v40 }
 0x1bc   : >> { %v6680_v5 = vpop.f32.mrf.mxu1 }
 0x1bd   : >> { %v8299_v0 = vpop.f32.mrf.mxu0  ;;  %v3902_v36 = vadd.f32 %v6680_v5, %v8287_v14 }
 0x1be   : >> { %v3881_v61 = vpop.f32.mrf.mxu1 }
 0x1bf   : >> { %v8301_v7 = vpop.f32.mrf.mxu0  ;;  %v4031_v34 = vadd.f32 %v6692_v21, %v3902_v36  ;;  %v3900_v11 = vadd.f32 %v3881_v61, %v8289_v56 }
 0x1c0   : >> { %v6681_v45 = vpop.f32.mrf.mxu1 }
 0x1c1   : >> { %v8303_v49 = vpop.f32.mrf.mxu0 }
 0x1c2   : >> { %v8305_v16 = vpop.f32.mrf.mxu1 }
 0x1c3   : >> { %v6712_v13 = vpop.f32.mrf.mxu0  ;;  %v3901_v56 = vadd.f32 %v8305_v16, %v8297_v38  ;;  %v8363_v38 = vld [vmem:[%s8553_s11] ss:$0 sm:$0xff] }
 0x1c4   : >> { %v6700_v44 = vpop.f32.mrf.mxu1 }
 0x1c5   : >> { %v4252_v24 = vpop.f32.mrf.mxu0  ;;  %v4156_v23 = vadd.f32 %v6700_v44, %v4027_v28 }
 0x1c6   : >> { %v4123_v55 = vpop.f32.mrf.mxu1 }
 0x1c7   : >> { %v6713_v59 = vpop.f32.mrf.mxu0  ;;  %v4154_v32 = vadd.f32 %v4123_v55, %v4025_v18  ;;  %v4285_v19 = vadd.f32 %v6712_v13, %v4156_v23 }
 0x1c8   : >> { %v6701_v3 = vpop.f32.mrf.mxu1 }
 0x1c9   : >> { %v4255_v58 = vpop.f32.mrf.mxu0  ;;  %v4283_v14 = vadd.f32 %v4252_v24, %v4154_v32 }
 0x1ca   : >> { %v4126_v48 = vpop.f32.mrf.mxu1 }
 0x1cb   : >> { %v8307_v52 = vpop.f32.mrf.mxu0 }
 0x1cc   : >> { %v6704_v53 = vpop.f32.mrf.mxu1 }
 0x1cd   : >> { %v8309_v31 = vpop.f32.mrf.mxu0  ;;  %v4160_v5 = vadd.f32 %v6704_v53, %v4031_v34 }
 0x1ce   : >> { %v8311_v22 = vpop.f32.mrf.mxu1 }
 0x1cf   : >> { %v8313_v9 = vpop.f32.mrf.mxu0  ;;  %v4289_v61 = vadd.f32 %v8307_v52, %v4160_v5 }
 0x1d0   : >> { %v6705_v4 = vpop.f32.mrf.mxu1 }
 0x1d1   : >> { %v8315_v62 = vpop.f32.mrf.mxu0 }
 0x1d2   : >> { %8598 = vst [vmem:[#allocation15_spill] sm:$0xff] %v8315_v62  ;;  %v8317_v37 = vpop.f32.mrf.mxu1  ;;  %v4026_v62 = vadd.f32 %v3997_v27, %v3897_v20 }
 0x1d3   : >> { %v6736_v51 = vpop.f32.mrf.mxu0 }
 0x1d4   : >> { %v6724_v8 = vpop.f32.mrf.mxu1 }
 0x1d5   : >> { %v4514_v42 = vpop.f32.mrf.mxu0  ;;  %v4418_v40 = vadd.f32 %v6724_v8, %v4285_v19 }
 0x1d6   : >> { %v4385_v43 = vpop.f32.mrf.mxu1 }
 0x1d7   : >> { %v6737_v2 = vpop.f32.mrf.mxu0  ;;  %v4416_v27 = vadd.f32 %v4385_v43, %v4283_v14 }
 0x1d8   : >> { %v6725_v47 = vpop.f32.mrf.mxu1 }
 0x1d9   : >> { %v8319_v54 = vpop.f32.mrf.mxu0 }
 0x1da   : >> { %v4388_v57 = vpop.f32.mrf.mxu1 }
 0x1db   : >> { %v8321_v60 = vpop.f32.mrf.mxu0 }
 0x1dc   : >> { %v6728_v50 = vpop.f32.mrf.mxu1 }
 0x1dd   : >> { %v8324_v33 = vpop.f32.mrf.mxu0 }
 0x1de   : >> { %8599 = vst [vmem:[#allocation14_spill] sm:$0xff] %v8324_v33  ;;  %v8326_v41 = vpop.f32.mrf.mxu1  ;;  %v4028_v33 = vadd.f32 %v6689_v39, %v3899_v35 }
 0x1df   : >> { %8600 = vst [vmem:[#allocation16_spill] sm:$0xff] %v8326_v41  ;;  %v8328_v63 = vpop.f32.mrf.mxu0  ;;  %v4155_v41 = vadd.f32 %v4126_v48, %v4026_v62 }
 0x1e0   : >> { %8601 = vst [vmem:[#allocation21_spill] sm:$0xff] %v8328_v63  ;;  %v8331_v6 = vpop.f32.mrf.mxu1  ;;  %v4157_v26 = vadd.f32 %v6701_v3, %v4028_v33  ;;  %v4547_v33 = vadd.f32 %v6736_v51, %v4418_v40  ;;  %v4422_v51 = vadd.f32 %v6728_v50, %v4289_v61 }
 0x1e1   : >> { %v8334_v29 = vpop.f32.mrf.mxu0  ;;  %v4284_v21 = vadd.f32 %v4255_v58, %v4155_v41  ;;  %v4545_v58 = vadd.f32 %v4514_v42, %v4416_v27 }
 0x1e2   : >> { %8602 = vst [vmem:[#allocation17_spill] sm:$0xff] %v8334_v29  ;;  %v8336_v15 = vpop.f32.mrf.mxu1  ;;  %v4286_v44 = vadd.f32 %v6713_v59, %v4157_v26  ;;  %v8605_v26 = vld [vmem:[#allocation15_spill] sm:$0xff] }
 0x1e3   : >> { %8603 = vst [vmem:[#allocation20_spill] sm:$0xff] %v8336_v15  ;;  %v6760_v46 = vpop.f32.mrf.mxu0  ;;  %v3903_v15 = vadd.f32 %v6681_v45, %v8295_v10  ;;  %v4029_v45 = vadd.f32 %v8299_v0, %v3900_v11  ;;  %v4417_v48 = vadd.f32 %v4388_v57, %v4284_v21  ;;  %v4030_v0 = vadd.f32 %v8303_v49, %v3901_v56 }
 0x1e4   : >> { %v6748_v17 = vpop.f32.mrf.mxu1  ;;  %v4419_v25 = vadd.f32 %v6725_v47, %v4286_v44  ;;  %v4551_v49 = vadd.f32 %v8321_v60, %v4422_v51 }
 0x1e5   : >> { %v4772_v63 = vpop.f32.mrf.mxu0  ;;  %v4032_v3 = vadd.f32 %v8301_v7, %v3903_v15  ;;  %v4676_v53 = vadd.f32 %v6748_v17, %v4547_v33  ;;  %v4158_v7 = vadd.f32 %v8311_v22, %v4029_v45  ;;  %v4546_v22 = vadd.f32 %v8319_v54, %v4417_v48  ;;  %v8390_v17 = vld [vmem:[%s8550_s8] ss:$0 sm:$0xff] }
 0x1e6   : >> { %v4643_v1 = vpop.f32.mrf.mxu1  ;;  %v4548_v43 = vadd.f32 %v6737_v2, %v4419_v25  ;;  %v8373_v2 = vld [vmem:[%s8554_s12] ss:$0 sm:$0xff]  ;;  %v4159_v28 = vadd.f32 %v8317_v37, %v4030_v0 }
 0x1e7   : >> { %v6761_v30 = vpop.f32.mrf.mxu0  ;;  %v4161_v59 = vadd.f32 %v6705_v4, %v4032_v3  ;;  %v4674_v16 = vadd.f32 %v4643_v1, %v4545_v58  ;;  %v4805_v42 = vadd.f32 %v6760_v46, %v4676_v53  ;;  %v4287_v41 = vadd.f32 %v8309_v31, %v4158_v7  ;;  %v8604_v46 = vld [vmem:[#allocation16_spill] sm:$0xff]  ;;  %v8606_v5 = vld [vmem:[#allocation21_spill] sm:$0xff]  ;;  %v8607_v3 = vld [vmem:[#allocation14_spill] sm:$0xff] }
 0x1e8   : >> { %v6749_v29 = vpop.f32.mrf.mxu1  ;;  %v4288_v34 = vadd.f32 %v8605_v26, %v4159_v28 }
 0x1e9   : >> { %v8341_v12 = vpop.f32.mrf.mxu0  ;;  %v4290_v4 = vadd.f32 %v8313_v9, %v4161_v59  ;;  %v4677_v57 = vadd.f32 %v6749_v29, %v4548_v43  ;;  %v8381_v9 = vld [vmem:[%s8549_s7] ss:$0 sm:$0xff]  ;;  %v4420_v18 = vadd.f32 %v8604_v46, %v4287_v41  ;;  %v4803_v31 = vadd.f32 %v4772_v63, %v4674_v16 }
 0x1ea   : >> { %v4646_v39 = vpop.f32.mrf.mxu1  ;;  %v8608_v33 = vld [vmem:[#allocation20_spill] sm:$0xff] }
 0x1eb   : >> { %v8344_v55 = vpop.f32.mrf.mxu0  ;;  %v4423_v29 = vadd.f32 %v8331_v6, %v4290_v4  ;;  %v4675_v15 = vadd.f32 %v4646_v39, %v4546_v22  ;;  %v4806_v32 = vadd.f32 %v6761_v30, %v4677_v57  ;;  %v4549_v21 = vadd.f32 %v8607_v3, %v4420_v18  ;;  %v8609_v57 = vld [vmem:[#allocation17_spill] sm:$0xff] }
 0x1ec   : >> { %v6752_v13 = vpop.f32.mrf.mxu1  ;;  %v4421_v25 = vadd.f32 %v8608_v33, %v4288_v34 }
 0x1ed   : >> { %v8347_v10 = vpop.f32.mrf.mxu0  ;;  %v4680_v36 = vadd.f32 %v6752_v13, %v4551_v49  ;;  %v4552_v39 = vadd.f32 %v8606_v5, %v4423_v29  ;;  %v4804_v44 = vadd.f32 %v8341_v12, %v4675_v15 }
 0x1ee   : >> { %v8353_v24 = vpop.f32.mrf.mxu1 }
 0x1ef   : >> { %v8355_v62 = vpop.f32.mrf.mxu0  ;;  %v4809_v45 = vadd.f32 %v8344_v55, %v4680_v36  ;;  %v4678_v16 = vadd.f32 %v8353_v24, %v4549_v21 }
 0x1f0   : >> { %v6753_v8 = vpop.f32.mrf.mxu1 }
 0x1f1   : >> { %v8358_v47 = vpop.f32.mrf.mxu0  ;;  %v4681_v59 = vadd.f32 %v6753_v8, %v4552_v39 }
 0x1f2   : >> { %v8366_v52 = vpop.f32.mrf.mxu1 }
 0x1f3   : >> { %v6782_v50 = vpop.f32.mrf.mxu0  ;;  %v4810_v41 = vadd.f32 %v8355_v62, %v4681_v59 }
 0x1f4   : >> { %v6772_v35 = vpop.f32.mrf.mxu1  ;;  %v5230_v54 = vmul.f32 %v6782_v50, %v8363_v38  ;;  %v4550_v50 = vadd.f32 %v8609_v57, %v4421_v25 }
 0x1f5   : >> { %v4934_v20 = vadd.f32 %v6772_v35, %v4805_v42  ;;  %v5190_v23 = vpop.f32.mrf.mxu0 }
 0x1f6   : >> { %v5245_v37 = vadd.f32 %v8373_v2, %v5230_v54  ;;  %v4901_v60 = vpop.f32.mrf.mxu1  ;;  %v5228_v6 = vmul.f32 %v8363_v38, %v5190_v23  ;;  %v4679_v18 = vadd.f32 %v8366_v52, %v4550_v50 }
 0x1f7   : >> { %v4949_v1 = vmul.f32 %v8381_v9, %v4934_v20  ;;  %v6783_v19 = vpop.f32.mrf.mxu0  ;;  %v4932_v11 = vadd.f32 %v4901_v60, %v4803_v31  ;;  %v4807_v20 = vadd.f32 %v8347_v10, %v4678_v16 }
 0x1f8   : >> { %v5253_v40 = vmax.f32 %v5245_v37, 0.0  ;;  %v6773_v63 = vpop.f32.mrf.mxu1  ;;  %v5231_v14 = vmul.f32 %v6783_v19, %v8363_v38  ;;  %v5243_v48 = vadd.f32 %v8373_v2, %v5228_v6  ;;  %v4808_v19 = vadd.f32 %v8358_v47, %v4679_v18 }
 0x1f9   : >> { %v4935_v27 = vadd.f32 %v6773_v63, %v4806_v32  ;;  %v5193_v13 = vpop.f32.mrf.mxu0  ;;  %v4964_v30 = vadd.f32 %v8390_v17, %v4949_v1  ;;  %v4947_v58 = vmul.f32 %v8381_v9, %v4932_v11 }
 0x1fa   : >> { %v5246_v56 = vadd.f32 %v8373_v2, %v5231_v14  ;;  %v4904_v61 = vpop.f32.mrf.mxu1  ;;  %5271 = vrot.lane.b32.xlu0 %v5253_v40, %s7178_s21  ;;  %v5229_v43 = vmul.f32 %v8363_v38, %v5193_v13  ;;  %v5251_v28 = vmax.f32 %v5243_v48, 0.0 }
 0x1fb   : >> { %v4950_v12 = vmul.f32 %v8381_v9, %v4935_v27  ;;  %v4933_v53 = vadd.f32 %v4904_v61, %v4804_v44  ;;  %v6786_v7 = vpop.f32.mrf.mxu0  ;;  %v4972_v55 = vmax.f32 %v4964_v30, 0.0  ;;  %v4962_v15 = vadd.f32 %v8390_v17, %v4947_v58 }
 0x1fc   : >> { %v5254_v51 = vmax.f32 %v5246_v56, 0.0  ;;  %v6776_v0 = vpop.f32.mrf.mxu1  ;;  %v5244_v35 = vadd.f32 %v8373_v2, %v5229_v43  ;;  %v5234_v47 = vmul.f32 %v6786_v7, %v8363_v38 }
 0x1fd   : >> { %v4938_v4 = vadd.f32 %v6776_v0, %v4809_v45  ;;  %v5206_v22 = vpop.f32.mrf.mxu0  ;;  %v4965_v42 = vadd.f32 %v8390_v17, %v4950_v12  ;;  %v4948_v49 = vmul.f32 %v8381_v9, %v4933_v53  ;;  %v4970_v32 = vmax.f32 %v4962_v15, 0.0 }
 0x1fe   : >> { %v4917_v8 = vpop.f32.mrf.mxu1  ;;  %5273 = vrot.lane.b32.xlu1 %v5254_v51, %s7178_s21  ;;  %4990 = vrot.lane.b32.xlu0 %v4972_v55, %s7179_s19  ;;  %v5232_v31 = vmul.f32 %v8363_v38, %v5206_v22  ;;  %v5252_v37 = vmax.f32 %v5244_v35, 0.0  ;;  %v5249_v30 = vadd.f32 %v8373_v2, %v5234_v47 }
 0x1ff   : >> { %v4953_v24 = vmul.f32 %v8381_v9, %v4938_v4  ;;  %v4973_v29 = vmax.f32 %v4965_v42, 0.0  ;;  %v6787_v46 = vpop.f32.mrf.mxu0  ;;  %v4936_v62 = vadd.f32 %v4917_v8, %v4807_v20  ;;  %v4963_v36 = vadd.f32 %v8390_v17, %v4948_v49 }
 0x200   : >> { %v6777_v54 = vpop.f32.mrf.mxu1  ;;  %v5247_v26 = vadd.f32 %v8373_v2, %v5232_v31  ;;  %v5235_v3 = vmul.f32 %v6787_v46, %v8363_v38 }
 0x201   : >> { %v4939_v23 = vadd.f32 %v6777_v54, %v4810_v41  ;;  %v4968_v1 = vadd.f32 %v8390_v17, %v4953_v24  ;;  %v5209_v6 = vpop.f32.mrf.mxu0  ;;  %v4951_v52 = vmul.f32 %v8381_v9, %v4936_v62  ;;  %v4971_v34 = vmax.f32 %v4963_v36, 0.0 }
 0x202   : >> { %4992 = vrot.lane.b32.xlu1 %v4973_v29, %s7179_s19  ;;  %5267 = vrot.lane.b32.xlu0 %v5251_v28, %s7178_s21  ;;  %v4920_v10 = vpop.f32.mrf.mxu1  ;;  %v5233_v11 = vmul.f32 %v8363_v38, %v5209_v6  ;;  %v5255_v5 = vmax.f32 %v5247_v26, 0.0  ;;  %v5250_v45 = vadd.f32 %v8373_v2, %v5235_v3 }
 0x203   : >> { %v4954_v60 = vmul.f32 %v8381_v9, %v4939_v23  ;;  %v4937_v40 = vadd.f32 %v4920_v10, %v4808_v19  ;;  %v4976_v63 = vmax.f32 %v4968_v1, 0.0  ;;  %v4966_v13 = vadd.f32 %v8390_v17, %v4951_v52 }
 0x204   : >> { %v5248_v44 = vadd.f32 %v8373_v2, %v5233_v11  ;;  %v5258_v38 = vmax.f32 %v5250_v45, 0.0 }
 0x205   : >> { %v4969_v14 = vadd.f32 %v8390_v17, %v4954_v60  ;;  %v4952_v39 = vmul.f32 %v8381_v9, %v4937_v40  ;;  %v4974_v33 = vmax.f32 %v4966_v13, 0.0  ;;  %v5257_v9 = vmax.f32 %v5249_v30, 0.0 }
 0x206   : >> { %5269 = vrot.lane.b32.xlu1 %v5252_v37, %s7178_s21  ;;  %4986 = vrot.lane.b32.xlu0 %v4970_v32, %s7179_s19  ;;  %v5256_v21 = vmax.f32 %v5248_v44, 0.0 }
 0x207   : >> { %v4977_v27 = vmax.f32 %v4969_v14, 0.0  ;;  %v4967_v25 = vadd.f32 %v8390_v17, %v4952_v39 }
 0x209   : >> { %v4975_v56 = vmax.f32 %v4967_v25, 0.0 }
 0x20a   : >> { %4988 = vrot.lane.b32.xlu1 %v4971_v34, %s7179_s19  ;;  %4998 = vrot.lane.b32.xlu0 %v4976_v63, %s7179_s19 }
 0x20e   : >> { %5000 = vrot.lane.b32.xlu1 %v4977_v27, %s7179_s19  ;;  %5275 = vrot.lane.b32.xlu0 %v5255_v5, %s7178_s21 }
 0x212   : >> { %5277 = vrot.lane.b32.xlu1 %v5256_v21, %s7178_s21  ;;  %4994 = vrot.lane.b32.xlu0 %v4974_v33, %s7179_s19 }
 0x216   : >> { %4996 = vrot.lane.b32.xlu1 %v4975_v56, %s7179_s19  ;;  %5279 = vrot.lane.b32.xlu0 %v5257_v9, %s7178_s21 }
 0x21a   : >> { %5281 = vrot.lane.b32.xlu1 %v5258_v38, %s7178_s21  ;;  %s5315_s21 = sshll.u32 (%p527_p13), %s498_s17, 4  ;;  %s8493_s21 = int_to_ptr.vmem [resolvable:$true] %s5315_s21 }
 0x21b   : > { %s7091_s13 = scalar_lea.vmem (%p527_p13), %s8493_s21, 8192  ;;  %p7098_p3 = scmp.lt.s32.totalorder (%p527_p13), %s8493_s21, %s7096_s28 }
 0x21c   : > { %p7092_p0 = scmp.ne.s32.totalorder (%p527_p13), %s8493_s21, %s7091_s13  ;;  %p7099_p5 = scmp.lt.s32.totalorder (%p527_p13), %s7097_s16, %s7091_s13 }
 0x21e   : > { %p7093_p1 = pnand (%p527_p13), %p7092_p0, %p7293_p4  ;;  %p7100_p6 = por (%p527_p13), %p7099_p5, %p7098_p3 }
 0x220   : > { %p7094_p2 = pneg (%p527_p13), %p7093_p1 }
 0x222   : > { %p7101_p7 = pnand (%p527_p13), %p7100_p6, %p7094_p2 }
 0x26c   : >> { %v5272_v17 = vpop.permute.xlu0 %5271 }
 0x270   : >> { %v5274_v61 = vpop.permute.xlu1 %5273  ;;  %v4991_v59 = vpop.permute.xlu0 %4990 }
 0x271   : >> { %5013 = vst.msk [vmem:[%s8139_s18 + $0x10] sm:$0xff] %vm5010_vm7, %v4991_v59 }
 0x272   : >> { %5294 = vst.msk [vmem:[%s8139_s18 + $0x10] sm:$0xff] %vm5291_vm8, %v5272_v17 }
 0x274   : >> { %v4993_v2 = vpop.permute.xlu1 %4992  ;;  %v5268_v48 = vpop.permute.xlu0 %5267 }
 0x275   : >> { %5014 = vst.msk [vmem:[%s8139_s18 + $0x18] sm:$0xff] %vm5010_vm7, %v4993_v2 }
 0x276   : >> { %5295 = vst.msk [vmem:[%s8139_s18 + $0x18] sm:$0xff] %vm5291_vm8, %v5274_v61 }
 0x278   : >> { %v5270_v12 = vpop.permute.xlu1 %5269  ;;  %v4987_v53 = vpop.permute.xlu0 %4986 }
 0x279   : >> { %5011 = vst.msk [vmem:[%s8139_s18] sm:$0xff] %vm5010_vm7, %v4987_v53 }
 0x27a   : >> { %5292 = vst.msk [vmem:[%s8139_s18] sm:$0xff] %vm5291_vm8, %v5268_v48 }
 0x27c   : >> { %v4989_v7 = vpop.permute.xlu1 %4988  ;;  %v4999_v58 = vpop.permute.xlu0 %4998 }
 0x27d   : >> { %5012 = vst.msk [vmem:[%s8139_s18 + $0x8] sm:$0xff] %vm5010_vm7, %v4989_v7  ;;  %5017 = vst.msk [vmem:[%s8139_s18 + $0x30] sm:$0xff] %vm5010_vm7, %v4999_v58 }
 0x27e   : >> { %5293 = vst.msk [vmem:[%s8139_s18 + $0x8] sm:$0xff] %vm5291_vm8, %v5270_v12 }
 0x280   : >> { %v5001_v51 = vpop.permute.xlu1 %5000  ;;  %v5276_v43 = vpop.permute.xlu0 %5275 }
 0x281   : >> { %5018 = vst.msk [vmem:[%s8139_s18 + $0x38] sm:$0xff] %vm5010_vm7, %v5001_v51 }
 0x284   : >> { %v5278_v0 = vpop.permute.xlu1 %5277  ;;  %v4995_v55 = vpop.permute.xlu0 %4994 }
 0x285   : >> { %5015 = vst.msk [vmem:[%s8139_s18 + $0x20] sm:$0xff] %vm5010_vm7, %v4995_v55 }
 0x286   : >> { %5296 = vst.msk [vmem:[%s8139_s18 + $0x20] sm:$0xff] %vm5291_vm8, %v5276_v43 }
 0x288   : >> { %v4997_v16 = vpop.permute.xlu1 %4996  ;;  %v5280_v4 = vpop.permute.xlu0 %5279 }
 0x289   : >> { %5016 = vst.msk [vmem:[%s8139_s18 + $0x28] sm:$0xff] %vm5010_vm7, %v4997_v16  ;;  %529 = sbr.rel (!%p527_p13) target bundleno = 35 (0x23), region = 168 }
 0x28a   : >> { %5298 = vst.msk [vmem:[%s8139_s18 + $0x30] sm:$0xff] %vm5291_vm8, %v5280_v4  ;;  %5297 = vst.msk [vmem:[%s8139_s18 + $0x28] sm:$0xff] %vm5291_vm8, %v5278_v0 }
 0x28c   : >> { %v5282_v22 = vpop.permute.xlu1 %5281 }
 0x28d   : >> { %5299 = vst.msk [vmem:[%s8139_s18 + $0x38] sm:$0xff] %vm5291_vm8, %v5282_v22  ;;  %s8613_s18 = sand.u32 (%p527_p13), 1, %s8610_s14  }
 0x28e   : > { %s8497_s15 = scalar_lea.sflag [#allocation3], %s8613_s18 }
 0x28f   : > { %7104 = shalt.err (!%p7101_p7)
}
 0x290   : > { %s7105_s24 = scalar_lea.hbm %s8489_s29, 8192  ;;  %s7109_s19 = scalar_lea.hbm %s8612_s20, 16384 }
 0x291   : > { %p7106_p9 = scmp.ne.s32.totalorder %s8489_s29, %s7105_s24  ;;  %p7110_p12 = scmp.lt.s32.totalorder %s8489_s29, %s8612_s20 }
 0x292   : > { %p7111_p13 = scmp.lt.s32.totalorder %s7109_s19, %s7105_s24 }
 0x293   : > { %p7107_p10 = pnand %p7106_p9, %p7293_p4 }
 0x294   : > { %p7112_p0 = por %p7111_p13, %p7110_p12 }
 0x295   : > { %p7108_p11 = pneg %p7107_p10 }
 0x297   : > { %p7113_p1 = pnand %p7112_p0, %p7108_p11 }
 0x299   : > { %7116 = shalt.err (!%p7113_p1)
}
 0x29a   : > { %s7181_s22 = smov 128   ;;  %s7182_s26 = smov 8  }
 0x29b   : > { %6828 = dma.vmem_to_hbm [thread:$0]  (%p7293_p4), %s8493_s21, 8192, %s8489_s29, %s8497_s15, %s7181_s22, %s7181_s22, %s7182_s26  }
 0x29c PF: > { %s8614_s18 = sld [smem:[#allocation9_spill]] }
 0x29d   : > { %s8615_s13 = sld [smem:[#allocation5_spill]] }
 0x2a2   : > { %p6834_p2 = scmp.ge.s32.totalorder %s8614_s18, 2 }
 0x2a3   : > { %s5330_s28 = sand.u32 1, %s8615_s13  }
 0x2a4   : > { %p6831_p3 = pnand %p6834_p2, %p7300_p8  ;;  %s5331_s16 = scalar_lea.sflag [#allocation3], %s5330_s28 }
 0x2a6   : > { %p6832_p5 = pneg %p6831_p3 }
 0x2a8   : > { %7146 = dma.done.wait (%p6832_p5), %s5331_s16, 8192  }
 0x2a9   : > { %7148 = vsyncadd (%p6832_p5), %s5331_s16, 4294959104  ;;  %s26_s30 = sadd.s32 1, %s8614_s18   ;;  %s8617_s25 = sld [smem:[#allocation6_spill]] }
 0x2aa   : > { %p23_p6 = scmp.ge.s32.totalorder %s26_s30, 4   ;;  %s8618_s26 = sld [smem:[#allocation7_spill]] }
 0x2ab   : > { %s8619_s27 = sld [smem:[#allocation13_spill]] }
 0x2ac   : > { %s8620_s28 = sld [smem:[#allocation8_spill]]  ;;  %25 = sbr.rel (!%p23_p6) target bundleno = 6 (0x6), region = 179 }
 0x2ad   : > { %s8621_s29 = sld [smem:[#allocation10_spill]] }
 0x2b1   :  { %5336 = vsyncpa [#allocation3], 1 }
 0x2b2   :  { %5338 = vsyncpa [#allocation3 + $0x1], 1 }

</bundles_post_ra>
